<compile_context>
chip_gen: v5e
topology: v5e:2x2
jax: 0.10.0
libtpu: 0.0.40
codegen_flags: <defaults>
</compile_context>

<pallas_src>
import numpy as np

import jax
import jax.numpy as jnp
from jax.experimental import pallas as pl
from jax.experimental.pallas import tpu as pltpu

WP = 32     # lanes reserved per channel group (lane = channel*WP + column)
PAD = 8     # scratch row padding (one 8-sublane tile)


# ----------------------------------------------------------------------------
# The single fused kernel (one grid step == BT batch elements)
# ----------------------------------------------------------------------------
def _net_kernel(x_ref,                                   # (BT*32, in_lanes)
                b1_ref, bias1_ref,                        # conv1
                b2a_ref, bias2a_ref, pick1_ref,           # conv2 (1st) + pool1
                b2b_ref, bias2b_ref, pick2_ref,           # conv2 (2nd) + pool2
                wfs_ref, mask_ref, g_ref, rs_ref, bf_ref, # fc1
                out_ref,                                  # (1, BT, 128)
                xs_ref, s1_ref, s2_ref):                  # padded VMEM scratch
    f32 = jnp.float32
    bf16 = jnp.bfloat16
    M0 = xs_ref.shape[0] - PAD        # BT*32  (conv1 / conv2a / pool1 slabs)
    M1 = s2_ref.shape[0] - PAD        # BT*16  (conv2b / pool2 slabs)

    def mdot(a, b):
        # MXU matmul; operands go in as bf16 (the MXU truncates to bf16 at
        # default precision anyway), accumulate in f32.
        return jnp.dot(a.astype(bf16), b.astype(bf16),
                       preferred_element_type=f32)

    def wmax(x):
        # max over lanes (j-1, j, j+1): symmetric window, so the result is
        # correct for either rotate sign convention; shifts are positive.
        n = x.shape[-1]
        return jnp.maximum(jnp.maximum(pltpu.roll(x, 1, axis=1), x),
                           pltpu.roll(x, n - 1, axis=1))

    def conv(src_ref, band_ref, bias_ref, rows):
        # 3 accumulating banded MXU matmuls; the kh row shift is a
        # static-offset read from the padded scratch (no selection matmuls).
        acc = mdot(src_ref[0:rows, :], band_ref[0])
        acc = acc + mdot(src_ref[1:rows + 1, :], band_ref[1])
        acc = acc + mdot(src_ref[2:rows + 2, :], band_ref[2])
        return jnp.maximum(acc + bias_ref[...], 0.0)

    def hmax(src_ref, rows):
        # max over rows (r, r+1, r+2) via static-offset slices of the scratch.
        return jnp.maximum(jnp.maximum(src_ref[0:rows, :],
                                       src_ref[1:rows + 1, :]),
                           src_ref[2:rows + 2, :])

    # Zero the scratch padding rows so every matmul input stays finite
    # (garbage rows/lanes are confined to invalid positions and never reach
    # valid outputs, but they must not be NaN/Inf).
    xs_ref[M0:M0 + PAD, :] = jnp.zeros((PAD, xs_ref.shape[1]), f32)
    s1_ref[M0:M0 + PAD, :] = jnp.zeros((PAD, s1_ref.shape[1]), f32)
    s2_ref[M1:M1 + PAD, :] = jnp.zeros((PAD, s2_ref.shape[1]), f32)

    # ---- conv1 + relu  (input channels concatenated along K) ----------------
    xs_ref[0:M0, :] = x_ref[...]
    a1 = conv(xs_ref, b1_ref, bias1_ref, M0)              # [M0, 256]

    # ---- conv2 (1st application) + relu --------------------------------------
    s1_ref[0:M0, :] = a1
    a2 = conv(s1_ref, b2a_ref, bias2a_ref, M0)            # [M0, 256]

    # ---- max-pool 3x3 stride 2 -----------------------------------------------
    # W window-max on the XLU/VPU (lane rolls), H window-max via offset slices,
    # stride-2 row decimation as ONE block-diagonal pick matmul.
    s1_ref[0:M0, :] = wmax(a2)
    p1 = mdot(pick1_ref[...], hmax(s1_ref, M0))           # [M1, 256]

    # ---- conv2 (2nd application) + relu (stride-2 W pick folded into band) ---
    s2_ref[0:M1, :] = p1
    a3 = conv(s2_ref, b2b_ref, bias2b_ref, M1)            # [M1, 256]

    # ---- max-pool #2 ----------------------------------------------------------
    s2_ref[0:M1, :] = wmax(a3)
    p2 = mdot(pick2_ref[...], hmax(s2_ref, M1))           # [BT*8, 256]

    # ---- fc1: one wide matmul + masked fold of per-row partials --------------
    t = mdot(p2, wfs_ref[...])                            # [BT*8, 5*nc]
    u = mdot(t * mask_ref[...], g_ref[...])               # [BT*8, 128]
    out_ref[0] = mdot(rs_ref[...], u) + bf_ref[...]       # [BT, 128]


# ----------------------------------------------------------------------------
# One-time weight preprocessing (runs once, OUTSIDE the jitted hot path)
# ----------------------------------------------------------------------------
def _conv_band(w, w_out, in_lanes, in_stride=1, in_off=0):
    """w: [Cout, Cin, 3, 3] -> banded weights [3, in_lanes, Cout*WP].

    band[kh, ci*WP + in_off + in_stride*(ow+kw), co*WP + ow] = w[co, ci, kh, kw]
    Only output columns ow < w_out are populated; padded lanes are all-zero, so
    junk lanes in the activations never pollute the result.
    """
    w = np.asarray(w, np.float32)
    cout, cin = w.shape[0], w.shape[1]
    band = np.zeros((3, in_lanes, cout * WP), np.float32)
    for kh in range(3):
        for co in range(cout):
            for ci in range(cin):
                for ow in range(w_out):
                    for kw in range(3):
                        il = ci * WP + in_off + in_stride * (ow + kw)
                        band[kh, il, co * WP + ow] = w[co, ci, kh, kw]
    return band


def _bias_row(b, w_out):
    b = np.asarray(b, np.float32)
    row = np.zeros((1, b.shape[0] * WP), np.float32)
    for co in range(b.shape[0]):
        row[0, co * WP:co * WP + w_out] = b[co]
    return row


def _pick(bt, s_in, s_out, n_valid):
    """Block-diagonal stride-2 row pick: out row b*s_out+oh <- in row b*s_in+2*oh."""
    m = np.zeros((bt * s_out, bt * s_in), np.float32)
    for b in range(bt):
        for oh in range(n_valid):
            m[b * s_out + oh, b * s_in + 2 * oh] = 1.0
    return m


def _fc_pack(wf, bf, bt):
    """Pack fc1 (PyTorch (c,h,w) flatten order) into stacked / fold matrices."""
    wf = np.asarray(wf, np.float32)
    nc = wf.shape[0]
    wf = wf.reshape(nc, 8, 5, 5)                          # [n, c, h, w]
    wfs = np.zeros((8 * WP, 5 * nc), np.float32)
    for n in range(nc):
        for c in range(8):
            for h in range(5):
                for w in range(5):
                    wfs[c * WP + 2 * w + 1, h * nc + n] = wf[n, c, h, w]
    mask = np.zeros((bt * 8, 5 * nc), np.float32)
    for b in range(bt):
        for h in range(5):
            mask[b * 8 + h, h * nc:(h + 1) * nc] = 1.0
    g = np.zeros((5 * nc, 128), np.float32)
    for h in range(5):
        for n in range(nc):
            g[h * nc + n, n] = 1.0
    rs = np.zeros((bt, bt * 8), np.float32)
    for b in range(bt):
        rs[b, b * 8:b * 8 + 5] = 1.0
    bfr = np.zeros((1, 128), np.float32)
    bfr[0, :nc] = np.asarray(bf, np.float32)
    return wfs, mask, g, rs, bfr


def prepare_constants(params, bt, in_channels=3):
    """Pack (w1,b1,w2,b2,wf,bf) into the grid-invariant kernel inputs."""
    w1, b1, w2, b2, wf, bf = params
    in_lanes = ((in_channels * WP + 127) // 128) * 128
    wdt = jnp.bfloat16       # MXU operands: bf16 (exact for 0/1 picks too)
    consts = (
        jnp.asarray(_conv_band(w1, 30, in_lanes), wdt),              # B1
        jnp.asarray(_bias_row(b1, 30), jnp.float32),                 # BIAS1
        jnp.asarray(_conv_band(w2, 28, 8 * WP), wdt),                # B2A
        jnp.asarray(_bias_row(b2, 28), jnp.float32),                 # BIAS2A
        jnp.asarray(_pick(bt, 32, 16, 13), wdt),                     # PICK1
        jnp.asarray(_conv_band(w2, 11, 8 * WP, in_stride=2, in_off=1), wdt),  # B2B
        jnp.asarray(_bias_row(b2, 11), jnp.float32),                 # BIAS2B
        jnp.asarray(_pick(bt, 16, 8, 5), wdt),                       # PICK2
    )
    wfs, mask, g, rs, bfr = _fc_pack(wf, bf, bt)
    consts += (
        jnp.asarray(wfs, wdt),                                       # WFS
        jnp.asarray(mask, jnp.float32),                              # MASK
        jnp.asarray(g, wdt),                                         # G
        jnp.asarray(rs, wdt),                                        # RS
        jnp.asarray(bfr, jnp.float32),                               # BF
    )
    return consts


def _choose_bt(batch, target=8):
    """Images per grid step: large M for MXU fill, but keep >=2 steps (v7x)."""
    cap = min(target, batch)
    if batch >= 2:
        cap = min(cap, max(1, batch // 2))
    for d in range(cap, 0, -1):
        if batch % d == 0:
            return d
    return 1


# ----------------------------------------------------------------------------
# Forward pass: a single pallas_call over grid=(batch // BT,)
# ----------------------------------------------------------------------------
def net_forward(x, consts):
    """x: [B, 3, 32, 32] (NCHW) -> [B, num_classes]."""
    B, C, H, W = x.shape
    assert (H, W) == (32, 32)
    bt = consts[11].shape[0]              # rows of ROWSUM == images per step
    assert B % bt == 0
    n_steps = B // bt
    m0, m1, m2 = bt * 32, bt * 16, bt * 8
    in_lanes = consts[0].shape[1]
    num_classes = consts[8].shape[1] // 5

    # lane-dense input: [B*32, in_lanes], lane = ci*32 + column (zero-padded)
    xr = jnp.transpose(x, (0, 2, 1, 3)).reshape(B, 32, C * WP)
    if in_lanes > C * WP:
        xr = jnp.pad(xr, ((0, 0), (0, 0), (0, in_lanes - C * WP)))
    xr = xr.reshape(B * 32, in_lanes)

    def const_spec(a):
        # whole-array, grid-invariant block (DMA'd once, kept in VMEM)
        return pl.BlockSpec(a.shape, lambda i, n=a.ndim: (0,) * n)

    per_step_flops = 2 * (
        3 * m0 * in_lanes * 256          # conv1
        + 3 * m0 * 256 * 256             # conv2 (1st)
        + m1 * m0 * 256                  # pool1 row pick
        + 3 * m1 * 256 * 256             # conv2 (2nd)
        + m2 * m1 * 256                  # pool2 row pick
        + m2 * 256 * consts[8].shape[1]  # fc stack
        + m2 * consts[8].shape[1] * 128  # fc fold
        + bt * m2 * 128)                 # fc row-sum
    bytes_accessed = int(xr.size * 4 + B * 128 * 4
                         + sum(int(c.size) * c.dtype.itemsize for c in consts))

    out = pl.pallas_call(
        _net_kernel,
        out_shape=jax.ShapeDtypeStruct((n_steps, bt, 128), jnp.float32),
        grid_spec=pltpu.PrefetchScalarGridSpec(
            num_scalar_prefetch=0,
            grid=(n_steps,),
            in_specs=[pl.BlockSpec((m0, in_lanes), lambda i: (i, 0))]
            + [const_spec(a) for a in consts],
            out_specs=pl.BlockSpec((1, bt, 128), lambda i: (i, 0, 0)),
            scratch_shapes=[
                pltpu.VMEM((m0 + PAD, in_lanes), jnp.float32),   # conv1 input
                pltpu.VMEM((m0 + PAD, 8 * WP), jnp.float32),     # a1 / pool1
                pltpu.VMEM((m1 + PAD, 8 * WP), jnp.float32),     # p1 / pool2
            ]),
        compiler_params=pltpu.CompilerParams(
            dimension_semantics=("parallel",)),                  # feeds both v7x TCs
        cost_estimate=pl.CostEstimate(
            flops=int(n_steps * per_step_flops), transcendentals=0,
            bytes_accessed=bytes_accessed),
    )(xr, *consts)
    return out.reshape(B, 128)[:, :num_classes]


# ----------------------------------------------------------------------------
# Deterministic parameter init (PyTorch-style uniform(-1/sqrt(fan_in), ...))
# ----------------------------------------------------------------------------
def init_params(key, in_channels=3, flatten_shape=200, num_classes=10):
    ks = jax.random.split(key, 6)

    def u(k, shape, fan_in):
        bound = 1.0 / (fan_in ** 0.5)
        return jax.random.uniform(k, shape, jnp.float32, -bound, bound)

    w1 = u(ks[0], (8, in_channels, 3, 3), in_channels * 9)
    b1 = u(ks[1], (8,), in_channels * 9)
    w2 = u(ks[2], (8, 8, 3, 3), 8 * 9)
    b2 = u(ks[3], (8,), 8 * 9)
    wf = u(ks[4], (num_classes, flatten_shape), flatten_shape)
    bf = u(ks[5], (num_classes,), flatten_shape)
    return w1, b1, w2, b2, wf, bf


# Pure-JAX reference (NCHW, matches PyTorch semantics) for a sanity check.
def reference_forward(x, params):
    w1, b1, w2, b2, wf, bf = params

    def conv(x, w, b):
        y = jax.lax.conv_general_dilated(
            x, w, (1, 1), "VALID",
            dimension_numbers=("NCHW", "OIHW", "NCHW"),
            precision=jax.lax.Precision.HIGHEST)
        return jax.nn.relu(y + b[None, :, None, None])

    def pool(x):
        return jax.lax.reduce_window(
            x, -jnp.inf, jax.lax.max, (1, 1, 3, 3), (1, 1, 2, 2), "VALID")

    y = conv(x, w1, b1)
    y = pool(conv(y, w2, b2))
    y = pool(conv(y, w2, b2))
    flat = y.reshape(y.shape[0], -1)
    return jnp.dot(flat, wf.T, precision=jax.lax.Precision.HIGHEST) + bf


if __name__ == "__main__":
    key = jax.random.PRNGKey(0)
    pkey, xkey = jax.random.split(key)
    params = init_params(pkey)

    # batch=8, in_channels=3, 32x32 spatial (required so that flatten == 200)
    batch = 8
    bt = _choose_bt(batch)                 # -> 4 images/step, grid of 2 steps
    consts = prepare_constants(params, bt)  # one-time packing, off hot path

    x = jax.random.normal(xkey, (batch, 3, 32, 32), jnp.float32)

    fwd = jax.jit(net_forward)
    out = jax.block_until_ready(fwd(x, consts))
    assert out.shape == (batch, 10), out.shape

    ref = reference_forward(x, params)
    # MXU operands are bf16 (default MXU precision), the reference is HIGHEST
    # precision f32, so allow a few e-2 of absolute/relative slack.
    err = float(jnp.max(jnp.abs(out - ref)))
    assert jnp.allclose(out, ref, rtol=5e-2, atol=5e-2), err

    print("KERNEL_OK")
</pallas_src>

<mosaic_0001>
module attributes {stable_mosaic.version = 11 : i64} {
  func.func @_net_kernel(%arg0: i32, %arg1: memref<128x128xf32, #tpu.memory_space<vmem>>, %arg2: memref<3x128x256xbf16, #tpu.memory_space<vmem>>, %arg3: memref<1x256xf32, #tpu.memory_space<vmem>>, %arg4: memref<3x256x256xbf16, #tpu.memory_space<vmem>>, %arg5: memref<1x256xf32, #tpu.memory_space<vmem>>, %arg6: memref<64x128xbf16, #tpu.memory_space<vmem>>, %arg7: memref<3x256x256xbf16, #tpu.memory_space<vmem>>, %arg8: memref<1x256xf32, #tpu.memory_space<vmem>>, %arg9: memref<32x64xbf16, #tpu.memory_space<vmem>>, %arg10: memref<256x50xbf16, #tpu.memory_space<vmem>>, %arg11: memref<32x50xf32, #tpu.memory_space<vmem>>, %arg12: memref<50x128xbf16, #tpu.memory_space<vmem>>, %arg13: memref<4x32xbf16, #tpu.memory_space<vmem>>, %arg14: memref<1x128xf32, #tpu.memory_space<vmem>>, %arg15: memref<1x4x128xf32, #tpu.memory_space<vmem>>, %arg16: memref<136x128xf32, #tpu.memory_space<vmem>>, %arg17: memref<136x256xf32, #tpu.memory_space<vmem>>, %arg18: memref<72x256xf32, #tpu.memory_space<vmem>>) attributes {dimension_semantics = [#tpu.dimension_semantics<parallel>], iteration_bounds = array<i64: 2>, scalar_prefetch = 0 : i64, scratch_operands = 3 : i64, tpu.core_type = #tpu.core_type<tc>, window_params = [{transform_indices = @transform_0, window_bounds = array<i64: 128, 128>}, {pipeline_mode = #tpu.pipeline_mode<synchronous>, transform_indices = @transform_1, window_bounds = array<i64: 3, 128, 256>}, {pipeline_mode = #tpu.pipeline_mode<synchronous>, transform_indices = @transform_2, window_bounds = array<i64: 1, 256>}, {pipeline_mode = #tpu.pipeline_mode<synchronous>, transform_indices = @transform_3, window_bounds = array<i64: 3, 256, 256>}, {pipeline_mode = #tpu.pipeline_mode<synchronous>, transform_indices = @transform_4, window_bounds = array<i64: 1, 256>}, {pipeline_mode = #tpu.pipeline_mode<synchronous>, transform_indices = @transform_5, window_bounds = array<i64: 64, 128>}, {pipeline_mode = #tpu.pipeline_mode<synchronous>, transform_indices = @transform_6, window_bounds = array<i64: 3, 256, 256>}, {pipeline_mode = #tpu.pipeline_mode<synchronous>, transform_indices = @transform_7, window_bounds = array<i64: 1, 256>}, {pipeline_mode = #tpu.pipeline_mode<synchronous>, transform_indices = @transform_8, window_bounds = array<i64: 32, 64>}, {pipeline_mode = #tpu.pipeline_mode<synchronous>, transform_indices = @transform_9, window_bounds = array<i64: 256, 50>}, {pipeline_mode = #tpu.pipeline_mode<synchronous>, transform_indices = @transform_10, window_bounds = array<i64: 32, 50>}, {pipeline_mode = #tpu.pipeline_mode<synchronous>, transform_indices = @transform_11, window_bounds = array<i64: 50, 128>}, {pipeline_mode = #tpu.pipeline_mode<synchronous>, transform_indices = @transform_12, window_bounds = array<i64: 4, 32>}, {pipeline_mode = #tpu.pipeline_mode<synchronous>, transform_indices = @transform_13, window_bounds = array<i64: 1, 128>}, {transform_indices = @transform_14, window_bounds = array<i64: 1, 4, 128>}]} {
    %cst = arith.constant 0.000000e+00 : f32
    %0 = vector.broadcast %cst : f32 to vector<8x128xf32>
    %c128 = arith.constant 128 : index
    %c0 = arith.constant 0 : index
    %1 = vector.load %arg16[%c128, %c0] : memref<136x128xf32, #tpu.memory_space<vmem>>, vector<8x128xf32>
    tpu.vector_store %arg16[%c128, %c0], %0 {strides = array<i32>} : memref<136x128xf32, #tpu.memory_space<vmem>>, vector<8x128xf32>,
    %cst_0 = arith.constant 0.000000e+00 : f32
    %2 = vector.broadcast %cst_0 : f32 to vector<8x256xf32>
    %c128_1 = arith.constant 128 : index
    %c0_2 = arith.constant 0 : index
    %3 = vector.load %arg17[%c128_1, %c0_2] : memref<136x256xf32, #tpu.memory_space<vmem>>, vector<8x256xf32>
    tpu.vector_store %arg17[%c128_1, %c0_2], %2 {strides = array<i32>} : memref<136x256xf32, #tpu.memory_space<vmem>>, vector<8x256xf32>,
    %cst_3 = arith.constant 0.000000e+00 : f32
    %4 = vector.broadcast %cst_3 : f32 to vector<8x256xf32>
    %c64 = arith.constant 64 : index
    %c0_4 = arith.constant 0 : index
    %5 = vector.load %arg18[%c64, %c0_4] : memref<72x256xf32, #tpu.memory_space<vmem>>, vector<8x256xf32>
    tpu.vector_store %arg18[%c64, %c0_4], %4 {strides = array<i32>} : memref<72x256xf32, #tpu.memory_space<vmem>>, vector<8x256xf32>,
    %c0_5 = arith.constant 0 : index
    %c0_6 = arith.constant 0 : index
    %6 = vector.load %arg1[%c0_5, %c0_6] : memref<128x128xf32, #tpu.memory_space<vmem>>, vector<128x128xf32>
    %c0_7 = arith.constant 0 : index
    %c0_8 = arith.constant 0 : index
    %7 = vector.load %arg16[%c0_7, %c0_8] : memref<136x128xf32, #tpu.memory_space<vmem>>, vector<128x128xf32>
    tpu.vector_store %arg16[%c0_7, %c0_8], %6 {strides = array<i32>} : memref<136x128xf32, #tpu.memory_space<vmem>>, vector<128x128xf32>,
    %c0_9 = arith.constant 0 : index
    %c0_10 = arith.constant 0 : index
    %8 = vector.load %arg16[%c0_9, %c0_10] : memref<136x128xf32, #tpu.memory_space<vmem>>, vector<128x128xf32>
    %c0_11 = arith.constant 0 : index
    %c0_12 = arith.constant 0 : index
    %c0_13 = arith.constant 0 : index
    %9 = vector.load %arg2[%c0_11, %c0_12, %c0_13] : memref<3x128x256xbf16, #tpu.memory_space<vmem>>, vector<1x128x256xbf16>
    %10 = vector.shape_cast %9 : vector<1x128x256xbf16> to vector<128x256xbf16>
    %11 = arith.truncf %8 : vector<128x128xf32> to vector<128x128xbf16>
    %cst_14 = arith.constant dense<0.000000e+00> : vector<128x256xf32>
    %12 = tpu.matmul %11, %10, %cst_14 {dimension_numbers = #tpu.dot_dimension_numbers<[1], [0], [0], [1], [0, 0, 1, 1], [], []>} : vector<128x128xbf16>, vector<128x256xbf16>, vector<128x256xf32> -> vector<128x256xf32>
    %c1 = arith.constant 1 : index
    %c0_15 = arith.constant 0 : index
    %13 = vector.load %arg16[%c1, %c0_15] : memref<136x128xf32, #tpu.memory_space<vmem>>, vector<128x128xf32>
    %c1_16 = arith.constant 1 : index
    %c0_17 = arith.constant 0 : index
    %c0_18 = arith.constant 0 : index
    %14 = vector.load %arg2[%c1_16, %c0_17, %c0_18] : memref<3x128x256xbf16, #tpu.memory_space<vmem>>, vector<1x128x256xbf16>
    %15 = vector.shape_cast %14 : vector<1x128x256xbf16> to vector<128x256xbf16>
    %16 = arith.truncf %13 : vector<128x128xf32> to vector<128x128xbf16>
    %cst_19 = arith.constant dense<0.000000e+00> : vector<128x256xf32>
    %17 = tpu.matmul %16, %15, %cst_19 {dimension_numbers = #tpu.dot_dimension_numbers<[1], [0], [0], [1], [0, 0, 1, 1], [], []>} : vector<128x128xbf16>, vector<128x256xbf16>, vector<128x256xf32> -> vector<128x256xf32>
    %18 = arith.addf %12, %17 : vector<128x256xf32>
    %c2 = arith.constant 2 : index
    %c0_20 = arith.constant 0 : index
    %19 = vector.load %arg16[%c2, %c0_20] : memref<136x128xf32, #tpu.memory_space<vmem>>, vector<128x128xf32>
    %c2_21 = arith.constant 2 : index
    %c0_22 = arith.constant 0 : index
    %c0_23 = arith.constant 0 : index
    %20 = vector.load %arg2[%c2_21, %c0_22, %c0_23] : memref<3x128x256xbf16, #tpu.memory_space<vmem>>, vector<1x128x256xbf16>
    %21 = vector.shape_cast %20 : vector<1x128x256xbf16> to vector<128x256xbf16>
    %22 = arith.truncf %19 : vector<128x128xf32> to vector<128x128xbf16>
    %cst_24 = arith.constant dense<0.000000e+00> : vector<128x256xf32>
    %23 = tpu.matmul %22, %21, %cst_24 {dimension_numbers = #tpu.dot_dimension_numbers<[1], [0], [0], [1], [0, 0, 1, 1], [], []>} : vector<128x128xbf16>, vector<128x256xbf16>, vector<128x256xf32> -> vector<128x256xf32>
    %24 = arith.addf %18, %23 : vector<128x256xf32>
    %c0_25 = arith.constant 0 : index
    %c0_26 = arith.constant 0 : index
    %25 = vector.load %arg3[%c0_25, %c0_26] : memref<1x256xf32, #tpu.memory_space<vmem>>, vector<1x256xf32>
    %26 = vector.broadcast %25 : vector<1x256xf32> to vector<128x256xf32>
    %27 = arith.addf %24, %26 : vector<128x256xf32>
    %cst_27 = arith.constant 0.000000e+00 : f32
    %28 = vector.broadcast %cst_27 : f32 to vector<128x256xf32>
    %29 = arith.maximumf %27, %28 : vector<128x256xf32>
    %c0_28 = arith.constant 0 : index
    %c0_29 = arith.constant 0 : index
    %30 = vector.load %arg17[%c0_28, %c0_29] : memref<136x256xf32, #tpu.memory_space<vmem>>, vector<128x256xf32>
    tpu.vector_store %arg17[%c0_28, %c0_29], %29 {strides = array<i32>} : memref<136x256xf32, #tpu.memory_space<vmem>>, vector<128x256xf32>,
    %c0_30 = arith.constant 0 : index
    %c0_31 = arith.constant 0 : index
    %31 = vector.load %arg17[%c0_30, %c0_31] : memref<136x256xf32, #tpu.memory_space<vmem>>, vector<128x256xf32>
    %c0_32 = arith.constant 0 : index
    %c0_33 = arith.constant 0 : index
    %c0_34 = arith.constant 0 : index
    %32 = vector.load %arg4[%c0_32, %c0_33, %c0_34] : memref<3x256x256xbf16, #tpu.memory_space<vmem>>, vector<1x256x256xbf16>
    %33 = vector.shape_cast %32 : vector<1x256x256xbf16> to vector<256x256xbf16>
    %34 = arith.truncf %31 : vector<128x256xf32> to vector<128x256xbf16>
    %cst_35 = arith.constant dense<0.000000e+00> : vector<128x256xf32>
    %35 = tpu.matmul %34, %33, %cst_35 {dimension_numbers = #tpu.dot_dimension_numbers<[1], [0], [0], [1], [0, 0, 1, 1], [], []>} : vector<128x256xbf16>, vector<256x256xbf16>, vector<128x256xf32> -> vector<128x256xf32>
    %c1_36 = arith.constant 1 : index
    %c0_37 = arith.constant 0 : index
    %36 = vector.load %arg17[%c1_36, %c0_37] : memref<136x256xf32, #tpu.memory_space<vmem>>, vector<128x256xf32>
    %c1_38 = arith.constant 1 : index
    %c0_39 = arith.constant 0 : index
    %c0_40 = arith.constant 0 : index
    %37 = vector.load %arg4[%c1_38, %c0_39, %c0_40] : memref<3x256x256xbf16, #tpu.memory_space<vmem>>, vector<1x256x256xbf16>
    %38 = vector.shape_cast %37 : vector<1x256x256xbf16> to vector<256x256xbf16>
    %39 = arith.truncf %36 : vector<128x256xf32> to vector<128x256xbf16>
    %cst_41 = arith.constant dense<0.000000e+00> : vector<128x256xf32>
    %40 = tpu.matmul %39, %38, %cst_41 {dimension_numbers = #tpu.dot_dimension_numbers<[1], [0], [0], [1], [0, 0, 1, 1], [], []>} : vector<128x256xbf16>, vector<256x256xbf16>, vector<128x256xf32> -> vector<128x256xf32>
    %41 = arith.addf %35, %40 : vector<128x256xf32>
    %c2_42 = arith.constant 2 : index
    %c0_43 = arith.constant 0 : index
    %42 = vector.load %arg17[%c2_42, %c0_43] : memref<136x256xf32, #tpu.memory_space<vmem>>, vector<128x256xf32>
    %c2_44 = arith.constant 2 : index
    %c0_45 = arith.constant 0 : index
    %c0_46 = arith.constant 0 : index
    %43 = vector.load %arg4[%c2_44, %c0_45, %c0_46] : memref<3x256x256xbf16, #tpu.memory_space<vmem>>, vector<1x256x256xbf16>
    %44 = vector.shape_cast %43 : vector<1x256x256xbf16> to vector<256x256xbf16>
    %45 = arith.truncf %42 : vector<128x256xf32> to vector<128x256xbf16>
    %cst_47 = arith.constant dense<0.000000e+00> : vector<128x256xf32>
    %46 = tpu.matmul %45, %44, %cst_47 {dimension_numbers = #tpu.dot_dimension_numbers<[1], [0], [0], [1], [0, 0, 1, 1], [], []>} : vector<128x256xbf16>, vector<256x256xbf16>, vector<128x256xf32> -> vector<128x256xf32>
    %47 = arith.addf %41, %46 : vector<128x256xf32>
    %c0_48 = arith.constant 0 : index
    %c0_49 = arith.constant 0 : index
    %48 = vector.load %arg5[%c0_48, %c0_49] : memref<1x256xf32, #tpu.memory_space<vmem>>, vector<1x256xf32>
    %49 = vector.broadcast %48 : vector<1x256xf32> to vector<128x256xf32>
    %50 = arith.addf %47, %49 : vector<128x256xf32>
    %cst_50 = arith.constant 0.000000e+00 : f32
    %51 = vector.broadcast %cst_50 : f32 to vector<128x256xf32>
    %52 = arith.maximumf %50, %51 : vector<128x256xf32>
    %c1_i32 = arith.constant 1 : i32
    %53 = tpu.dynamic_rotate %52 by %c1_i32 dim 1 : vector<128x256xf32>, i32 -> vector<128x256xf32>
    %54 = arith.maximumf %53, %52 : vector<128x256xf32>
    %c255_i32 = arith.constant 255 : i32
    %55 = tpu.dynamic_rotate %52 by %c255_i32 dim 1 : vector<128x256xf32>, i32 -> vector<128x256xf32>
    %56 = arith.maximumf %54, %55 : vector<128x256xf32>
    %c0_51 = arith.constant 0 : index
    %c0_52 = arith.constant 0 : index
    %57 = vector.load %arg17[%c0_51, %c0_52] : memref<136x256xf32, #tpu.memory_space<vmem>>, vector<128x256xf32>
    tpu.vector_store %arg17[%c0_51, %c0_52], %56 {strides = array<i32>} : memref<136x256xf32, #tpu.memory_space<vmem>>, vector<128x256xf32>,
    %c0_53 = arith.constant 0 : index
    %c0_54 = arith.constant 0 : index
    %58 = vector.load %arg6[%c0_53, %c0_54] : memref<64x128xbf16, #tpu.memory_space<vmem>>, vector<64x128xbf16>
    %c0_55 = arith.constant 0 : index
    %c0_56 = arith.constant 0 : index
    %59 = vector.load %arg17[%c0_55, %c0_56] : memref<136x256xf32, #tpu.memory_space<vmem>>, vector<128x256xf32>
    %c1_57 = arith.constant 1 : index
    %c0_58 = arith.constant 0 : index
    %60 = vector.load %arg17[%c1_57, %c0_58] : memref<136x256xf32, #tpu.memory_space<vmem>>, vector<128x256xf32>
    %61 = arith.maximumf %59, %60 : vector<128x256xf32>
    %c2_59 = arith.constant 2 : index
    %c0_60 = arith.constant 0 : index
    %62 = vector.load %arg17[%c2_59, %c0_60] : memref<136x256xf32, #tpu.memory_space<vmem>>, vector<128x256xf32>
    %63 = arith.maximumf %61, %62 : vector<128x256xf32>
    %64 = arith.truncf %63 : vector<128x256xf32> to vector<128x256xbf16>
    %cst_61 = arith.constant dense<0.000000e+00> : vector<64x256xf32>
    %65 = tpu.matmul %58, %64, %cst_61 {dimension_numbers = #tpu.dot_dimension_numbers<[1], [0], [0], [1], [0, 0, 1, 1], [], []>} : vector<64x128xbf16>, vector<128x256xbf16>, vector<64x256xf32> -> vector<64x256xf32>
    %c0_62 = arith.constant 0 : index
    %c0_63 = arith.constant 0 : index
    %66 = vector.load %arg18[%c0_62, %c0_63] : memref<72x256xf32, #tpu.memory_space<vmem>>, vector<64x256xf32>
    tpu.vector_store %arg18[%c0_62, %c0_63], %65 {strides = array<i32>} : memref<72x256xf32, #tpu.memory_space<vmem>>, vector<64x256xf32>,
    %c0_64 = arith.constant 0 : index
    %c0_65 = arith.constant 0 : index
    %67 = vector.load %arg18[%c0_64, %c0_65] : memref<72x256xf32, #tpu.memory_space<vmem>>, vector<64x256xf32>
    %c0_66 = arith.constant 0 : index
    %c0_67 = arith.constant 0 : index
    %c0_68 = arith.constant 0 : index
    %68 = vector.load %arg7[%c0_66, %c0_67, %c0_68] : memref<3x256x256xbf16, #tpu.memory_space<vmem>>, vector<1x256x256xbf16>
    %69 = vector.shape_cast %68 : vector<1x256x256xbf16> to vector<256x256xbf16>
    %70 = arith.truncf %67 : vector<64x256xf32> to vector<64x256xbf16>
    %cst_69 = arith.constant dense<0.000000e+00> : vector<64x256xf32>
    %71 = tpu.matmul %70, %69, %cst_69 {dimension_numbers = #tpu.dot_dimension_numbers<[1], [0], [0], [1], [0, 0, 1, 1], [], []>} : vector<64x256xbf16>, vector<256x256xbf16>, vector<64x256xf32> -> vector<64x256xf32>
    %c1_70 = arith.constant 1 : index
    %c0_71 = arith.constant 0 : index
    %72 = vector.load %arg18[%c1_70, %c0_71] : memref<72x256xf32, #tpu.memory_space<vmem>>, vector<64x256xf32>
    %c1_72 = arith.constant 1 : index
    %c0_73 = arith.constant 0 : index
    %c0_74 = arith.constant 0 : index
    %73 = vector.load %arg7[%c1_72, %c0_73, %c0_74] : memref<3x256x256xbf16, #tpu.memory_space<vmem>>, vector<1x256x256xbf16>
    %74 = vector.shape_cast %73 : vector<1x256x256xbf16> to vector<256x256xbf16>
    %75 = arith.truncf %72 : vector<64x256xf32> to vector<64x256xbf16>
    %cst_75 = arith.constant dense<0.000000e+00> : vector<64x256xf32>
    %76 = tpu.matmul %75, %74, %cst_75 {dimension_numbers = #tpu.dot_dimension_numbers<[1], [0], [0], [1], [0, 0, 1, 1], [], []>} : vector<64x256xbf16>, vector<256x256xbf16>, vector<64x256xf32> -> vector<64x256xf32>
    %77 = arith.addf %71, %76 : vector<64x256xf32>
    %c2_76 = arith.constant 2 : index
    %c0_77 = arith.constant 0 : index
    %78 = vector.load %arg18[%c2_76, %c0_77] : memref<72x256xf32, #tpu.memory_space<vmem>>, vector<64x256xf32>
    %c2_78 = arith.constant 2 : index
    %c0_79 = arith.constant 0 : index
    %c0_80 = arith.constant 0 : index
    %79 = vector.load %arg7[%c2_78, %c0_79, %c0_80] : memref<3x256x256xbf16, #tpu.memory_space<vmem>>, vector<1x256x256xbf16>
    %80 = vector.shape_cast %79 : vector<1x256x256xbf16> to vector<256x256xbf16>
    %81 = arith.truncf %78 : vector<64x256xf32> to vector<64x256xbf16>
    %cst_81 = arith.constant dense<0.000000e+00> : vector<64x256xf32>
    %82 = tpu.matmul %81, %80, %cst_81 {dimension_numbers = #tpu.dot_dimension_numbers<[1], [0], [0], [1], [0, 0, 1, 1], [], []>} : vector<64x256xbf16>, vector<256x256xbf16>, vector<64x256xf32> -> vector<64x256xf32>
    %83 = arith.addf %77, %82 : vector<64x256xf32>
    %c0_82 = arith.constant 0 : index
    %c0_83 = arith.constant 0 : index
    %84 = vector.load %arg8[%c0_82, %c0_83] : memref<1x256xf32, #tpu.memory_space<vmem>>, vector<1x256xf32>
    %85 = vector.broadcast %84 : vector<1x256xf32> to vector<64x256xf32>
    %86 = arith.addf %83, %85 : vector<64x256xf32>
    %cst_84 = arith.constant 0.000000e+00 : f32
    %87 = vector.broadcast %cst_84 : f32 to vector<64x256xf32>
    %88 = arith.maximumf %86, %87 : vector<64x256xf32>
    %c1_i32_85 = arith.constant 1 : i32
    %89 = tpu.dynamic_rotate %88 by %c1_i32_85 dim 1 : vector<64x256xf32>, i32 -> vector<64x256xf32>
    %90 = arith.maximumf %89, %88 : vector<64x256xf32>
    %c255_i32_86 = arith.constant 255 : i32
    %91 = tpu.dynamic_rotate %88 by %c255_i32_86 dim 1 : vector<64x256xf32>, i32 -> vector<64x256xf32>
    %92 = arith.maximumf %90, %91 : vector<64x256xf32>
    %c0_87 = arith.constant 0 : index
    %c0_88 = arith.constant 0 : index
    %93 = vector.load %arg18[%c0_87, %c0_88] : memref<72x256xf32, #tpu.memory_space<vmem>>, vector<64x256xf32>
    tpu.vector_store %arg18[%c0_87, %c0_88], %92 {strides = array<i32>} : memref<72x256xf32, #tpu.memory_space<vmem>>, vector<64x256xf32>,
    %c0_89 = arith.constant 0 : index
    %c0_90 = arith.constant 0 : index
    %94 = vector.load %arg9[%c0_89, %c0_90] : memref<32x64xbf16, #tpu.memory_space<vmem>>, vector<32x64xbf16>
    %c0_91 = arith.constant 0 : index
    %c0_92 = arith.constant 0 : index
    %95 = vector.load %arg18[%c0_91, %c0_92] : memref<72x256xf32, #tpu.memory_space<vmem>>, vector<64x256xf32>
    %c1_93 = arith.constant 1 : index
    %c0_94 = arith.constant 0 : index
    %96 = vector.load %arg18[%c1_93, %c0_94] : memref<72x256xf32, #tpu.memory_space<vmem>>, vector<64x256xf32>
    %97 = arith.maximumf %95, %96 : vector<64x256xf32>
    %c2_95 = arith.constant 2 : index
    %c0_96 = arith.constant 0 : index
    %98 = vector.load %arg18[%c2_95, %c0_96] : memref<72x256xf32, #tpu.memory_space<vmem>>, vector<64x256xf32>
    %99 = arith.maximumf %97, %98 : vector<64x256xf32>
    %100 = arith.truncf %99 : vector<64x256xf32> to vector<64x256xbf16>
    %cst_97 = arith.constant dense<0.000000e+00> : vector<32x256xf32>
    %101 = tpu.matmul %94, %100, %cst_97 {dimension_numbers = #tpu.dot_dimension_numbers<[1], [0], [0], [1], [0, 0, 1, 1], [], []>} : vector<32x64xbf16>, vector<64x256xbf16>, vector<32x256xf32> -> vector<32x256xf32>
    %c0_98 = arith.constant 0 : index
    %c0_99 = arith.constant 0 : index
    %102 = vector.load %arg10[%c0_98, %c0_99] : memref<256x50xbf16, #tpu.memory_space<vmem>>, vector<256x50xbf16>
    %103 = arith.truncf %101 : vector<32x256xf32> to vector<32x256xbf16>
    %cst_100 = arith.constant dense<0.000000e+00> : vector<32x50xf32>
    %104 = tpu.matmul %103, %102, %cst_100 {dimension_numbers = #tpu.dot_dimension_numbers<[1], [0], [0], [1], [0, 0, 1, 1], [], []>} : vector<32x256xbf16>, vector<256x50xbf16>, vector<32x50xf32> -> vector<32x50xf32>
    %c0_101 = arith.constant 0 : index
    %c0_102 = arith.constant 0 : index
    %105 = vector.load %arg11[%c0_101, %c0_102] : memref<32x50xf32, #tpu.memory_space<vmem>>, vector<32x50xf32>
    %106 = arith.mulf %104, %105 : vector<32x50xf32>
    %c0_103 = arith.constant 0 : index
    %c0_104 = arith.constant 0 : index
    %107 = vector.load %arg12[%c0_103, %c0_104] : memref<50x128xbf16, #tpu.memory_space<vmem>>, vector<50x128xbf16>
    %108 = arith.truncf %106 : vector<32x50xf32> to vector<32x50xbf16>
    %cst_105 = arith.constant dense<0.000000e+00> : vector<32x128xf32>
    %109 = tpu.matmul %108, %107, %cst_105 {dimension_numbers = #tpu.dot_dimension_numbers<[1], [0], [0], [1], [0, 0, 1, 1], [], []>} : vector<32x50xbf16>, vector<50x128xbf16>, vector<32x128xf32> -> vector<32x128xf32>
    %c0_106 = arith.constant 0 : index
    %c0_107 = arith.constant 0 : index
    %110 = vector.load %arg13[%c0_106, %c0_107] : memref<4x32xbf16, #tpu.memory_space<vmem>>, vector<4x32xbf16>
    %111 = arith.truncf %109 : vector<32x128xf32> to vector<32x128xbf16>
    %cst_108 = arith.constant dense<0.000000e+00> : vector<4x128xf32>
    %112 = tpu.matmul %110, %111, %cst_108 {dimension_numbers = #tpu.dot_dimension_numbers<[1], [0], [0], [1], [0, 0, 1, 1], [], []>} : vector<4x32xbf16>, vector<32x128xbf16>, vector<4x128xf32> -> vector<4x128xf32>
    %c0_109 = arith.constant 0 : index
    %c0_110 = arith.constant 0 : index
    %113 = vector.load %arg14[%c0_109, %c0_110] : memref<1x128xf32, #tpu.memory_space<vmem>>, vector<1x128xf32>
    %114 = vector.broadcast %113 : vector<1x128xf32> to vector<4x128xf32>
    %115 = arith.addf %112, %114 : vector<4x128xf32>
    %c0_111 = arith.constant 0 : index
    %c0_112 = arith.constant 0 : index
    %c0_113 = arith.constant 0 : index
    %116 = vector.load %arg15[%c0_111, %c0_112, %c0_113] : memref<1x4x128xf32, #tpu.memory_space<vmem>>, vector<1x4x128xf32>
    %117 = vector.shape_cast %116 : vector<1x4x128xf32> to vector<4x128xf32>
    %118 = vector.shape_cast %115 : vector<4x128xf32> to vector<1x4x128xf32>
    tpu.vector_store %arg15[%c0_111, %c0_112, %c0_113], %118 {strides = array<i32>} : memref<1x4x128xf32, #tpu.memory_space<vmem>>, vector<1x4x128xf32>,
    return
  }
  func.func @transform_0(%arg0: i32) -> (i32, i32) {
    %c0_i32 = arith.constant 0 : i32
    %c0_i32_0 = arith.constant 0 : i32
    return %arg0, %c0_i32 : i32, i32
  }
  func.func @transform_1(%arg0: i32) -> (i32, i32, i32) {
    %c0_i32 = arith.constant 0 : i32
    %c0_i32_0 = arith.constant 0 : i32
    %c0_i32_1 = arith.constant 0 : i32
    %c0_i32_2 = arith.constant 0 : i32
    return %c0_i32, %c0_i32_0, %c0_i32_1 : i32, i32, i32
  }
  func.func @transform_2(%arg0: i32) -> (i32, i32) {
    %c0_i32 = arith.constant 0 : i32
    %c0_i32_0 = arith.constant 0 : i32
    %c0_i32_1 = arith.constant 0 : i32
    return %c0_i32, %c0_i32_0 : i32, i32
  }
  func.func @transform_3(%arg0: i32) -> (i32, i32, i32) {
    %c0_i32 = arith.constant 0 : i32
    %c0_i32_0 = arith.constant 0 : i32
    %c0_i32_1 = arith.constant 0 : i32
    %c0_i32_2 = arith.constant 0 : i32
    return %c0_i32, %c0_i32_0, %c0_i32_1 : i32, i32, i32
  }
  func.func @transform_4(%arg0: i32) -> (i32, i32) {
    %c0_i32 = arith.constant 0 : i32
    %c0_i32_0 = arith.constant 0 : i32
    %c0_i32_1 = arith.constant 0 : i32
    return %c0_i32, %c0_i32_0 : i32, i32
  }
  func.func @transform_5(%arg0: i32) -> (i32, i32) {
    %c0_i32 = arith.constant 0 : i32
    %c0_i32_0 = arith.constant 0 : i32
    %c0_i32_1 = arith.constant 0 : i32
    return %c0_i32, %c0_i32_0 : i32, i32
  }
  func.func @transform_6(%arg0: i32) -> (i32, i32, i32) {
    %c0_i32 = arith.constant 0 : i32
    %c0_i32_0 = arith.constant 0 : i32
    %c0_i32_1 = arith.constant 0 : i32
    %c0_i32_2 = arith.constant 0 : i32
    return %c0_i32, %c0_i32_0, %c0_i32_1 : i32, i32, i32
  }
  func.func @transform_7(%arg0: i32) -> (i32, i32) {
    %c0_i32 = arith.constant 0 : i32
    %c0_i32_0 = arith.constant 0 : i32
    %c0_i32_1 = arith.constant 0 : i32
    return %c0_i32, %c0_i32_0 : i32, i32
  }
  func.func @transform_8(%arg0: i32) -> (i32, i32) {
    %c0_i32 = arith.constant 0 : i32
    %c0_i32_0 = arith.constant 0 : i32
    %c0_i32_1 = arith.constant 0 : i32
    return %c0_i32, %c0_i32_0 : i32, i32
  }
  func.func @transform_9(%arg0: i32) -> (i32, i32) {
    %c0_i32 = arith.constant 0 : i32
    %c0_i32_0 = arith.constant 0 : i32
    %c0_i32_1 = arith.constant 0 : i32
    return %c0_i32, %c0_i32_0 : i32, i32
  }
  func.func @transform_10(%arg0: i32) -> (i32, i32) {
    %c0_i32 = arith.constant 0 : i32
    %c0_i32_0 = arith.constant 0 : i32
    %c0_i32_1 = arith.constant 0 : i32
    return %c0_i32, %c0_i32_0 : i32, i32
  }
  func.func @transform_11(%arg0: i32) -> (i32, i32) {
    %c0_i32 = arith.constant 0 : i32
    %c0_i32_0 = arith.constant 0 : i32
    %c0_i32_1 = arith.constant 0 : i32
    return %c0_i32, %c0_i32_0 : i32, i32
  }
  func.func @transform_12(%arg0: i32) -> (i32, i32) {
    %c0_i32 = arith.constant 0 : i32
    %c0_i32_0 = arith.constant 0 : i32
    %c0_i32_1 = arith.constant 0 : i32
    return %c0_i32, %c0_i32_0 : i32, i32
  }
  func.func @transform_13(%arg0: i32) -> (i32, i32) {
    %c0_i32 = arith.constant 0 : i32
    %c0_i32_0 = arith.constant 0 : i32
    %c0_i32_1 = arith.constant 0 : i32
    return %c0_i32, %c0_i32_0 : i32, i32
  }
  func.func @transform_14(%arg0: i32) -> (i32, i32, i32) {
    %c0_i32 = arith.constant 0 : i32
    %c0_i32_0 = arith.constant 0 : i32
    %c0_i32_1 = arith.constant 0 : i32
    return %arg0, %c0_i32, %c0_i32_0 : i32, i32, i32
  }
}

</mosaic_0001>

<bundles_post_ra>
// kernel: net_forward.1
= control target key start
LH: loop header
LB: loop body
LE: loop exit
PB: predicated region body
PF: predicated region fallthrough
CT: control target
= control target key end

     0   :  { %s10830_s0 = inlined_call_operand.vmem [shape: f32[256,128], index: 0, kind: input, shape index: {}]   ;;  %s10831_s1 = inlined_call_operand.vmem [shape: bf16[3,128,256], index: 1, kind: input, shape index: {}]   ;;  %s10832_s2 = inlined_call_operand.vmem [shape: f32[1,256], index: 2, kind: input, shape index: {}]   ;;  %s10833_s3 = inlined_call_operand.vmem [shape: bf16[3,256,256], index: 3, kind: input, shape index: {}]   ;;  %s10834_s4 = inlined_call_operand.vmem [shape: f32[1,256], index: 4, kind: input, shape index: {}]   ;;  %s10835_s5 = inlined_call_operand.vmem [shape: bf16[64,128], index: 5, kind: input, shape index: {}]   ;;  %s10836_s6 = inlined_call_operand.vmem [shape: bf16[3,256,256], index: 6, kind: input, shape index: {}]   ;;  %s10837_s7 = inlined_call_operand.vmem [shape: f32[1,256], index: 7, kind: input, shape index: {}]   ;;  %s10838_s8 = inlined_call_operand.vmem [shape: bf16[32,64], index: 8, kind: input, shape index: {}]   ;;  %s10839_s9 = inlined_call_operand.vmem [shape: bf16[256,50], index: 9, kind: input, shape index: {}]   ;;  %s10840_s10 = inlined_call_operand.vmem [shape: f32[32,50], index: 10, kind: input, shape index: {}]   ;;  %s10841_s11 = inlined_call_operand.vmem [shape: bf16[50,128], index: 11, kind: input, shape index: {}]   ;;  %s10842_s12 = inlined_call_operand.vmem [shape: bf16[4,32], index: 12, kind: input, shape index: {}]   ;;  %s10843_s13 = inlined_call_operand.vmem [shape: f32[1,128], index: 13, kind: input, shape index: {}]   ;;  %s10844_s14 = inlined_call_operand.hbm [shape: f32[2,4,128], index: 14, kind: output, shape index: {}]  }
   0x1   :  { %10874 = sst [smem:[#allocation25_spill]] %s10830_s0 }
   0x2   :  { %19 = vsyncpa [#allocation6], 0 }
   0x3   :  { %21 = vsyncpa [#allocation6 + $0x1], 0  ;;  %s7271_s29 = smov 0   ;;  %s7273_s30 = smov 0  }
   0x4   :  { %s7275_s15 = smov 0   ;;  %s7277_s16 = smov 0  }
   0x5 LB: > { %10875 = sst [smem:[#allocation8_spill]] %s7179_s29  ;;  %s7292_s17 = sadd.s32 4294967295, %s7191_s16   ;;  %s7191_s16 = sphi %s7277_s16, %s10946_s16   ;;  %s7187_s15 = sphi %s7275_s15, %s10948_s15   ;;  %s7183_s30 = sphi %s7273_s30, %s10950_s30   ;;  %s7179_s29 = sphi %s7271_s29, %s10949_s29  }
   0x6   : > { %10876 = sst [smem:[#allocation9_spill]] %s7187_s15  ;;  %s5575_s18 = sadd.s32 4294967294, %s7191_s16  }
   0x7   : > { %s7296_s19 = sadd.s32 1, %s7191_s16   ;;  %s333_s20 = sadd.s32 1, %s7187_s15 }
   0x8   : > { %10877 = sst [smem:[#allocation10_spill]] %s7296_s19  ;;  %s330_s21 = ssub.s32 %s7191_s16, %s7296_s19 }
   0x9   : > { %p343_p0 = scmp.ne.s32.totalorder %s7187_s15, %s7183_s30  ;;  %p331_p1 = scmp.eq.s32.totalorder %s330_s21, 0 }
   0xa   : > { %p344_p2 = scmp.eq.s32.totalorder %s7292_s17, 1  ;;  %p349_p3 = scmp.ne.s32.totalorder %s7183_s30, %s7179_s29 }
   0xb   : > { %p350_p4 = scmp.eq.s32.totalorder %s5575_s18, 1  ;;  %p5578_p7 = scmp.ge.s32.totalorder %s7191_s16, 1 }
   0xc   : > { %s7307_s22 = scalar_select %p331_p1, %s7187_s15, %s333_s20  }
   0xd   : > { %p7309_p5 = por %p344_p2, %p343_p0  ;;  %p7313_p6 = por %p350_p4, %p349_p3 }
   0xe   : > { %10878 = sst [smem:[#allocation11_spill]] %s7307_s22  ;;  %p416_p8 = scmp.lt.s32.totalorder %s7191_s16, 3 }
   0xf   : > { %s10880_s24 = scalar_select %p7313_p6, 1, 0 }
  0x10   : > { %p417_p9 = pnand %p5578_p7, %p416_p8 }
  0x11   : > { %10881 = sst [smem:[#allocation12_spill]] %s10880_s24 }
  0x12   : > { %420 = sbr.rel (%p417_p9) target bundleno = 2309 (0x905), region = 76 }
  0x17   : > { %v5656_v0 = vld [vmem:[%s10831_s1 + $0xf0] sm:$0xf]  ;;  %v6844_v1 = vld [vmem:[%s10831_s1 + $0xf4] sm:$0xf0]  ;;  %v6843_v2 = vld [vmem:[%s10831_s1 + $0xf4] sm:$0xf] }
  0x18   : > { %v5657_v3 = vor.u32 %v6844_v1, %v5656_v0  ;;  %v5658_v4 = vld [vmem:[%s10831_s1 + $0xf8] sm:$0xf0]  ;;  %v5720_v5 = vld [vmem:[%s10831_s1 + $0x70] sm:$0xf]  ;;  %v6828_v6 = vld [vmem:[%s10831_s1 + $0x74] sm:$0xf0] }
  0x19   : > { %v5661_v7 = vor.u32 %v6843_v2, %v5658_v4  ;;  %v5721_v8 = vor.u32 %v6828_v6, %v5720_v5  ;;  %v6827_v9 = vld [vmem:[%s10831_s1 + $0x74] sm:$0xf]  ;;  %v5722_v10 = vld [vmem:[%s10831_s1 + $0x78] sm:$0xf0]  ;;  %v5648_v11 = vld [vmem:[%s10831_s1 + $0xe0] sm:$0xf] }
  0x1a   : > { %667 = vmatpush.bf16.msra.mxu0 %v5657_v3  ;;  %v5725_v12 = vor.u32 %v6827_v9, %v5722_v10  ;;  %v6842_v13 = vld [vmem:[%s10831_s1 + $0xe4] sm:$0xf0]  ;;  %v6841_v14 = vld [vmem:[%s10831_s1 + $0xe4] sm:$0xf]  ;;  %v5650_v15 = vld [vmem:[%s10831_s1 + $0xe8] sm:$0xf0] }
  0x1b   : > { %716 = vmatpush.bf16.msra.mxu1 %v5661_v7  ;;  %845 = vmatpush.bf16.msra.mxu2 %v5721_v8  ;;  %v5649_v16 = vor.u32 %v6842_v13, %v5648_v11  ;;  %v5653_v17 = vor.u32 %v6841_v14, %v5650_v15  ;;  %v5712_v18 = vld [vmem:[%s10831_s1 + $0x60] sm:$0xf]  ;;  %v6826_v19 = vld [vmem:[%s10831_s1 + $0x64] sm:$0xf0]  ;;  %v6825_v20 = vld [vmem:[%s10831_s1 + $0x64] sm:$0xf] }
  0x1c   : > { %894 = vmatpush.bf16.msra.mxu3 %v5725_v12  ;;  %v5713_v21 = vor.u32 %v6826_v19, %v5712_v18  ;;  %v5714_v22 = vld [vmem:[%s10831_s1 + $0x68] sm:$0xf0]  ;;  %v5640_v23 = vld [vmem:[%s10831_s1 + $0xd0] sm:$0xf]  ;;  %v6840_v24 = vld [vmem:[%s10831_s1 + $0xd4] sm:$0xf0] }
  0x1d   : > { %v5717_v25 = vor.u32 %v6825_v20, %v5714_v22  ;;  %v6839_v26 = vld [vmem:[%s10831_s1 + $0xd4] sm:$0xf]  ;;  %v5642_v27 = vld [vmem:[%s10831_s1 + $0xd8] sm:$0xf0]  ;;  %v5704_v28 = vld [vmem:[%s10831_s1 + $0x50] sm:$0xf]  ;;  %v5641_v29 = vor.u32 %v6840_v24, %v5640_v23 }
  0x1e   : > { %668 = vmatpush.bf16.msra.mxu0 %v5649_v16  ;;  %v6824_v30 = vld [vmem:[%s10831_s1 + $0x54] sm:$0xf0]  ;;  %v6823_v31 = vld [vmem:[%s10831_s1 + $0x54] sm:$0xf]  ;;  %v5706_v32 = vld [vmem:[%s10831_s1 + $0x58] sm:$0xf0]  ;;  %v5645_v33 = vor.u32 %v6839_v26, %v5642_v27 }
  0x1f   : > { %717 = vmatpush.bf16.msra.mxu1 %v5653_v17  ;;  %846 = vmatpush.bf16.msra.mxu2 %v5713_v21  ;;  %v5705_v34 = vor.u32 %v6824_v30, %v5704_v28  ;;  %v5632_v35 = vld [vmem:[%s10831_s1 + $0xc0] sm:$0xf]  ;;  %v6838_v36 = vld [vmem:[%s10831_s1 + $0xc4] sm:$0xf0]  ;;  %v6837_v37 = vld [vmem:[%s10831_s1 + $0xc4] sm:$0xf]  ;;  %v5709_v38 = vor.u32 %v6823_v31, %v5706_v32 }
  0x20   : > { %895 = vmatpush.bf16.msra.mxu3 %v5717_v25  ;;  %v5634_v39 = vld [vmem:[%s10831_s1 + $0xc8] sm:$0xf0]  ;;  %v5696_v40 = vld [vmem:[%s10831_s1 + $0x40] sm:$0xf]  ;;  %v6822_v41 = vld [vmem:[%s10831_s1 + $0x44] sm:$0xf0]  ;;  %v5633_v44 = vor.u32 %v6838_v36, %v5632_v35 }
  0x21   : > { %v6821_v42 = vld [vmem:[%s10831_s1 + $0x44] sm:$0xf]  ;;  %v5698_v43 = vld [vmem:[%s10831_s1 + $0x48] sm:$0xf0]  ;;  %v5637_v45 = vor.u32 %v6837_v37, %v5634_v39  ;;  %v5697_v46 = vor.u32 %v6822_v41, %v5696_v40  ;;  %v5624_v47 = vld [vmem:[%s10831_s1 + $0xb0] sm:$0xf] }
  0x22   : > { %669 = vmatpush.bf16.msra.mxu0 %v5641_v29  ;;  %v6836_v48 = vld [vmem:[%s10831_s1 + $0xb4] sm:$0xf0]  ;;  %v6835_v49 = vld [vmem:[%s10831_s1 + $0xb4] sm:$0xf]  ;;  %v5701_v50 = vor.u32 %v6821_v42, %v5698_v43  ;;  %v5626_v51 = vld [vmem:[%s10831_s1 + $0xb8] sm:$0xf0] }
  0x23   : > { %718 = vmatpush.bf16.msra.mxu1 %v5645_v33  ;;  %847 = vmatpush.bf16.msra.mxu2 %v5705_v34  ;;  %v5688_v52 = vld [vmem:[%s10831_s1 + $0x30] sm:$0xf]  ;;  %v6820_v53 = vld [vmem:[%s10831_s1 + $0x34] sm:$0xf0]  ;;  %v6819_v54 = vld [vmem:[%s10831_s1 + $0x34] sm:$0xf]  ;;  %v5625_v56 = vor.u32 %v6836_v48, %v5624_v47  ;;  %v5629_v57 = vor.u32 %v6835_v49, %v5626_v51 }
  0x24   : > { %896 = vmatpush.bf16.msra.mxu3 %v5709_v38  ;;  %v5690_v55 = vld [vmem:[%s10831_s1 + $0x38] sm:$0xf0]  ;;  %v5689_v58 = vor.u32 %v6820_v53, %v5688_v52  ;;  %v5616_v59 = vld [vmem:[%s10831_s1 + $0xa0] sm:$0xf]  ;;  %v6834_v60 = vld [vmem:[%s10831_s1 + $0xa4] sm:$0xf0] }
  0x25   : > { %v6833_v61 = vld [vmem:[%s10831_s1 + $0xa4] sm:$0xf]  ;;  %v5693_v62 = vor.u32 %v6819_v54, %v5690_v55  ;;  %v5618_v63 = vld [vmem:[%s10831_s1 + $0xa8] sm:$0xf0]  ;;  %v5680_v0 = vld [vmem:[%s10831_s1 + $0x20] sm:$0xf]  ;;  %v5617_v4 = vor.u32 %v6834_v60, %v5616_v59 }
  0x26   : > { %670 = vmatpush.bf16.msra.mxu0 %v5633_v44  ;;  %v6818_v1 = vld [vmem:[%s10831_s1 + $0x24] sm:$0xf0]  ;;  %v6817_v2 = vld [vmem:[%s10831_s1 + $0x24] sm:$0xf]  ;;  %v5682_v3 = vld [vmem:[%s10831_s1 + $0x28] sm:$0xf0]  ;;  %v5621_v7 = vor.u32 %v6833_v61, %v5618_v63 }
  0x27   : > { %719 = vmatpush.bf16.msra.mxu1 %v5637_v45  ;;  %848 = vmatpush.bf16.msra.mxu2 %v5697_v46  ;;  %v5608_v5 = vld [vmem:[%s10831_s1 + $0x90] sm:$0xf]  ;;  %v6832_v6 = vld [vmem:[%s10831_s1 + $0x94] sm:$0xf0]  ;;  %v5681_v8 = vor.u32 %v6818_v1, %v5680_v0  ;;  %v6831_v9 = vld [vmem:[%s10831_s1 + $0x94] sm:$0xf]  ;;  %v5685_v12 = vor.u32 %v6817_v2, %v5682_v3 }
  0x28   : > { %897 = vmatpush.bf16.msra.mxu3 %v5701_v50  ;;  %v5610_v10 = vld [vmem:[%s10831_s1 + $0x98] sm:$0xf0]  ;;  %v5672_v11 = vld [vmem:[%s10831_s1 + $0x10] sm:$0xf]  ;;  %v6816_v13 = vld [vmem:[%s10831_s1 + $0x14] sm:$0xf0]  ;;  %v5609_v16 = vor.u32 %v6832_v6, %v5608_v5 }
  0x29   : > { %s5580_s24 = sshll.u32 %s7292_s17, 4  ;;  %v6815_v14 = vld [vmem:[%s10831_s1 + $0x14] sm:$0xf]  ;;  %v5674_v15 = vld [vmem:[%s10831_s1 + $0x18] sm:$0xf0]  ;;  %v5613_v18 = vor.u32 %v6831_v9, %v5610_v10  ;;  %v5673_v19 = vor.u32 %v6816_v13, %v5672_v11  ;;  %s10882_s0 = sld [smem:[#allocation25_spill]] }
  0x2a   : > { %671 = vmatpush.bf16.msra.mxu0 %v5625_v56  ;;  %p463_p10 = scmp.lt.s32.totalorder %s5580_s24, 31  ;;  %v5600_v17 = vld [vmem:[%s10831_s1 + $0x80] sm:$0xf]  ;;  %v6830_v20 = vld [vmem:[%s10831_s1 + $0x84] sm:$0xf0]  ;;  %v5677_v22 = vor.u32 %v6815_v14, %v5674_v15  ;;  %vm2385_vm1 = vcmask 1046528  }
  0x2b   : > { %720 = vmatpush.bf16.msra.mxu1 %v5629_v57  ;;  %849 = vmatpush.bf16.msra.mxu2 %v5689_v58  ;;  %v6829_v21 = vld [vmem:[%s10831_s1 + $0x84] sm:$0xf]  ;;  %v5602_v23 = vld [vmem:[%s10831_s1 + $0x88] sm:$0xf0]  ;;  %v5664_v24 = vld [vmem:[%s10831_s1] sm:$0xf]  ;;  %v5601_v28 = vor.u32 %v6830_v20, %v5600_v17 }
  0x2c   : > { %898 = vmatpush.bf16.msra.mxu3 %v5693_v62  ;;  %s10952_s24 = smov (!%p463_p10, %s5580_s24), 31  ;;  %v6814_v25 = vld [vmem:[%s10831_s1 + $0x4] sm:$0xf0]  ;;  %v6813_v26 = vld [vmem:[%s10831_s1 + $0x4] sm:$0xf]  ;;  %v5605_v29 = vor.u32 %v6829_v21, %v5602_v23  ;;  %s10868_s25 = smov 127  }
  0x2d   : > { %v5666_v27 = vld [vmem:[%s10831_s1 + $0x8] sm:$0xf0]  ;;  %s5581_s29 = sshll.u32 %s10952_s24, 3  ;;  %v5665_v30 = vor.u32 %v6814_v25, %v5664_v24  ;;  %v5800_v61 = vld [vmem:[%s10831_s1 + $0x170] sm:$0xf]  ;;  %vm3433_vm4 = vcmask 1045504  }
  0x2e   : > { %672 = vmatpush.bf16.msra.mxu0 %v5617_v4  ;;  %v5669_v34 = vor.u32 %v6813_v26, %v5666_v27  ;;  %v6860_v62 = vld [vmem:[%s10831_s1 + $0x174] sm:$0xf0]  ;;  %v6859_v63 = vld [vmem:[%s10831_s1 + $0x174] sm:$0xf]  ;;  %v5802_v1 = vld [vmem:[%s10831_s1 + $0x178] sm:$0xf0] }
  0x2f   : > { %721 = vmatpush.bf16.msra.mxu1 %v5621_v7  ;;  %850 = vmatpush.bf16.msra.mxu2 %v5681_v8  ;;  %s7515_s26 = scalar_lea.vmem %s10882_s0, %s5581_s29  ;;  %v5801_v0 = vor.u32 %v6860_v62, %v5800_v61  ;;  %v5805_v4 = vor.u32 %v6859_v63, %v5802_v1  ;;  %v5792_v9 = vld [vmem:[%s10831_s1 + $0x160] sm:$0xf]  ;;  %v6858_v10 = vld [vmem:[%s10831_s1 + $0x164] sm:$0xf0]  ;;  %v6857_v11 = vld [vmem:[%s10831_s1 + $0x164] sm:$0xf] }
  0x30   : > { %899 = vmatpush.bf16.msra.mxu3 %v5685_v12  ;;  %v474_v31 = vld [vmem:[%s7515_s26] sm:$0xff]  ;;  %v475_v32 = vld [vmem:[%s7515_s26 + $0x8] sm:$0xff]  ;;  %v476_v33 = vld [vmem:[%s7515_s26 + $0x10] sm:$0xff]  ;;  %v5793_v12 = vor.u32 %v6858_v10, %v5792_v9  ;;  %v7193_v26 = vmov 0.0   ;;  %vm1461_vm0 = vsmask.f32 7424 }
  0x31   : > { %490 = vst [vmem:[#allocation2] sm:$0xff] %v474_v31  ;;  %v477_v35 = vld [vmem:[%s7515_s26 + $0x18] sm:$0xff]  ;;  %v478_v36 = vld [vmem:[%s7515_s26 + $0x20] sm:$0xff]  ;;  %v538_v37 = vpack.c.bf16 %v475_v32, %v474_v31  ;;  %v479_v38 = vld [vmem:[%s7515_s26 + $0x28] sm:$0xff]  ;;  %s10939_s22 = smov 1   ;;  %s10940_s20 = smov 127  }
  0x32   : > { %673 = vmatpush.bf16.msra.mxu0 %v5609_v16  ;;  %491 = vst [vmem:[#allocation2 + $0x8] sm:$0xff] %v475_v32  ;;  %v480_v39 = vld [vmem:[%s7515_s26 + $0x30] sm:$0xff]  ;;  %v481_v43 = vld [vmem:[%s7515_s26 + $0x38] sm:$0xff]  ;;  %v482_v44 = vld [vmem:[%s7515_s26 + $0x40] sm:$0xff]  ;;  %v539_v45 = vpack.c.bf16 %v477_v35, %v476_v33  ;;  %v540_v51 = vpack.c.bf16 %v479_v38, %v478_v36  ;;  %vm5192_vm5 = vcmask 523264   ;;  %vm5452_vm6 = vcmask 1040384  }
  0x33   : > { %722 = vmatpush.bf16.msra.mxu1 %v5613_v18  ;;  %851 = vmatpush.bf16.msra.mxu2 %v5673_v19  ;;  %492 = vst [vmem:[#allocation2 + $0x10] sm:$0xff] %v476_v33  ;;  %v483_v49 = vld [vmem:[%s7515_s26 + $0x48] sm:$0xff]  ;;  %v7528_v50 = vld [vmem:[%s7515_s26 + $0x50] sm:$0xff]  ;;  %v485_v55 = vld [vmem:[%s7515_s26 + $0x58] sm:$0xff]  ;;  %v541_v57 = vpack.c.bf16 %v481_v43, %v480_v39  ;;  %vm5445_vm7 = vcmask 408576   ;;  %vm5482_vm8 = vcmask 261120  }
  0x34   : > { %900 = vmatpush.bf16.msra.mxu3 %v5677_v22  ;;  %493 = vst [vmem:[#allocation2 + $0x18] sm:$0xff] %v477_v35  ;;  %v7533_v56 = vld [vmem:[%s7515_s26 + $0x60] sm:$0xff]  ;;  %v7549_v2 = vld [vmem:[%s7515_s26 + $0x68] sm:$0xff]  ;;  %v7552_v3 = vld [vmem:[%s7515_s26 + $0x70] sm:$0xff]  ;;  %v542_v5 = vpack.c.bf16 %v483_v49, %v482_v44  ;;  %v543_v27 = vpack.c.bf16 %v485_v55, %v7528_v50  ;;  %s459_s28 = sand.u32 1, %s7183_s30   ;;  %s6810_s18 = sshll.u32 %s7292_s17, 2 }
  0x35   : > { %494 = vst [vmem:[#allocation2 + $0x20] sm:$0xff] %v478_v36  ;;  %v5794_v13 = vld [vmem:[%s10831_s1 + $0x168] sm:$0xf0]  ;;  %v5784_v14 = vld [vmem:[%s10831_s1 + $0x150] sm:$0xf]  ;;  %v7587_v23 = vld [vmem:[%s7515_s26 + $0x78] sm:$0xff] }
  0x36   : > { %674 = vmatpush.bf16.msra.mxu0 %v5601_v28  ;;  %495 = vst [vmem:[#allocation2 + $0x28] sm:$0xff] %v479_v38  ;;  %v6856_v15 = vld [vmem:[%s10831_s1 + $0x154] sm:$0xf0]  ;;  %v5797_v16 = vor.u32 %v6857_v11, %v5794_v13  ;;  %v6855_v17 = vld [vmem:[%s10831_s1 + $0x154] sm:$0xf]  ;;  %v545_v61 = vpack.c.bf16 %v7587_v23, %v7552_v3  ;;  %s10870_s26 = smov 1  }
  0x37   : > { %723 = vmatpush.bf16.msra.mxu1 %v5605_v29  ;;  %852 = vmatpush.bf16.msra.mxu2 %v5665_v30  ;;  %496 = vst [vmem:[#allocation2 + $0x30] sm:$0xff] %v480_v39  ;;  %v5786_v18 = vld [vmem:[%s10831_s1 + $0x158] sm:$0xf0]  ;;  %v5785_v19 = vor.u32 %v6856_v15, %v5784_v14  ;;  %v5776_v21 = vld [vmem:[%s10831_s1 + $0x140] sm:$0xf]  ;;  %s5501_s24 = scalar_lea.sflag [#allocation6], %s459_s28 }
  0x38   : > { %901 = vmatpush.bf16.msra.mxu3 %v5669_v34  ;;  %497 = vst [vmem:[#allocation2 + $0x38] sm:$0xff] %v481_v43  ;;  %v5789_v20 = vor.u32 %v6855_v17, %v5786_v18  ;;  %v6854_v22 = vld [vmem:[%s10831_s1 + $0x144] sm:$0xf0]  ;;  %v6853_v24 = vld [vmem:[%s10831_s1 + $0x144] sm:$0xf] }
  0x39   : > { %v546_v40 = vld [vmem:[#allocation2 + $0x1] sm:$0xff]  ;;  %498 = vst [vmem:[#allocation2 + $0x40] sm:$0xff] %v482_v44  ;;  %v5778_v25 = vld [vmem:[%s10831_s1 + $0x148] sm:$0xf0]  ;;  %v5777_v28 = vor.u32 %v6854_v22, %v5776_v21  ;;  %v5768_v33 = vld [vmem:[%s10831_s1 + $0x130] sm:$0xf] }
  0x3a   : > { %853 = vmatmul.bf16.vlgmr.msra.gmra.mxu2 %v538_v37  ;;  %v547_v41 = vld [vmem:[#allocation2 + $0x9] sm:$0xff]  ;;  %499 = vst [vmem:[#allocation2 + $0x48] sm:$0xff] %v483_v49  ;;  %1064 = vmatpush.bf16.msrb.mxu0 %v5801_v0  ;;  %v5781_v29 = vor.u32 %v6853_v24, %v5778_v25  ;;  %v6852_v34 = vld [vmem:[%s10831_s1 + $0x134] sm:$0xf0]  ;;  %v6851_v35 = vld [vmem:[%s10831_s1 + $0x134] sm:$0xf] }
  0x3b   : > { %902 = vmatmul.bf16.vlgmr.msra.gmra.mxu3 %v538_v37  ;;  %v579_v42 = vpack.c.bf16 %v547_v41, %v546_v40  ;;  %v548_v46 = vld [vmem:[#allocation2 + $0x11] sm:$0xff]  ;;  %500 = vst [vmem:[#allocation2 + $0x50] sm:$0xff] %v7528_v50  ;;  %1113 = vmatpush.bf16.msrb.mxu1 %v5805_v4  ;;  %v5769_v36 = vor.u32 %v6852_v34, %v5768_v33  ;;  %v5770_v37 = vld [vmem:[%s10831_s1 + $0x138] sm:$0xf0]  ;;  %v5760_v39 = vld [vmem:[%s10831_s1 + $0x120] sm:$0xf] }
  0x3c   : > { %v549_v47 = vld [vmem:[#allocation2 + $0x19] sm:$0xff]  ;;  %501 = vst [vmem:[#allocation2 + $0x58] sm:$0xff] %v485_v55  ;;  %v5773_v38 = vor.u32 %v6851_v35, %v5770_v37  ;;  %v6850_v40 = vld [vmem:[%s10831_s1 + $0x124] sm:$0xf0]  ;;  %v6849_v41 = vld [vmem:[%s10831_s1 + $0x124] sm:$0xf]  ;;  %v544_v50 = vpack.c.bf16 %v7549_v2, %v7533_v56 }
  0x3d   : > { %675 = vmatmul.bf16.vlgmr.msra.gmra.mxu0 %v579_v42  ;;  %724 = vmatmul.bf16.vlgmr.msra.gmra.mxu1 %v579_v42  ;;  %v580_v48 = vpack.c.bf16 %v549_v47, %v548_v46  ;;  %v550_v52 = vld [vmem:[#allocation2 + $0x21] sm:$0xff]  ;;  %502 = vst [vmem:[#allocation2 + $0x60] sm:$0xff] %v7533_v56  ;;  %v5761_v42 = vor.u32 %v6850_v40, %v5760_v39  ;;  %v5762_v43 = vld [vmem:[%s10831_s1 + $0x128] sm:$0xf0]  ;;  %v6848_v46 = vld [vmem:[%s10831_s1 + $0x114] sm:$0xf0] }
  0x3e   : > { %v551_v53 = vld [vmem:[#allocation2 + $0x29] sm:$0xff]  ;;  %503 = vst [vmem:[#allocation2 + $0x68] sm:$0xff] %v7549_v2  ;;  %1065 = vmatpush.bf16.msrb.mxu0 %v5793_v12  ;;  %v5765_v44 = vor.u32 %v6849_v41, %v5762_v43  ;;  %v6847_v47 = vld [vmem:[%s10831_s1 + $0x114] sm:$0xf]  ;;  %v946_v9 = vld [vmem:[#allocation2 + $0x1a] sm:$0xff] }
  0x3f   : > { %v581_v54 = vpack.c.bf16 %v551_v53, %v550_v52  ;;  %v552_v58 = vld [vmem:[#allocation2 + $0x31] sm:$0xff]  ;;  %504 = vst [vmem:[#allocation2 + $0x70] sm:$0xff] %v7552_v3  ;;  %1114 = vmatpush.bf16.msrb.mxu1 %v5797_v16  ;;  %v6846_v55 = vld [vmem:[%s10831_s1 + $0x104] sm:$0xf0] }
  0x40   : > { %v553_v59 = vld [vmem:[#allocation2 + $0x39] sm:$0xff]  ;;  %469 = vst [vmem:[#allocation2 + $0x80] sm:$0xff] %v7193_v26  ;;  %v943_v1 = vld [vmem:[#allocation2 + $0x2] sm:$0xff]  ;;  %v944_v2 = vld [vmem:[#allocation2 + $0xa] sm:$0xff] }
  0x41   : > { %v582_v60 = vpack.c.bf16 %v553_v59, %v552_v58  ;;  %v554_v6 = vld [vmem:[#allocation2 + $0x41] sm:$0xff]  ;;  %505 = vst [vmem:[#allocation2 + $0x78] sm:$0xff] %v7587_v23  ;;  %v5746_v58 = vld [vmem:[%s10831_s1 + $0x108] sm:$0xf0]  ;;  %v976_v4 = vpack.c.bf16 %v944_v2, %v943_v1  ;;  %v945_v3 = vld [vmem:[#allocation2 + $0x12] sm:$0xff] }
  0x42   : > { %v555_v7 = vld [vmem:[#allocation2 + $0x49] sm:$0xff]  ;;  %1066 = vmatpush.bf16.msrb.mxu0 %v5785_v19  ;;  %470 = vst [vmem:[#allocation3 + $0xa0] sm:$0xff] %v7193_v26  ;;  %v977_v10 = vpack.c.bf16 %v946_v9, %v945_v3  ;;  %v949_v22 = vld [vmem:[#allocation2 + $0x32] sm:$0xff]  ;;  %v950_v23 = vld [vmem:[#allocation2 + $0x3a] sm:$0xff] }
  0x43   : > { %v583_v8 = vpack.c.bf16 %v555_v7, %v554_v6  ;;  %1115 = vmatpush.bf16.msrb.mxu1 %v5789_v20  ;;  %471 = vst [vmem:[#allocation3 + $0xc0] sm:$0xff] %v7193_v26  ;;  %v556_v30 = vld [vmem:[#allocation2 + $0x51] sm:$0xff]  ;;  %v947_v15 = vld [vmem:[#allocation2 + $0x22] sm:$0xff]  ;;  %v979_v24 = vpack.c.bf16 %v950_v23, %v949_v22 }
  0x44   : > { %v557_v31 = vld [vmem:[#allocation2 + $0x59] sm:$0xff]  ;;  %472 = vst [vmem:[#allocation4 + $0x70] sm:$0xff] %v7193_v26  ;;  %v948_v16 = vld [vmem:[#allocation2 + $0x2a] sm:$0xff]  ;;  %v6921_v23 = vld [vmem:[%s10833_s3 + $0x1e4] sm:$0xf] }
  0x45   : > { %473 = vst [vmem:[#allocation4 + $0x58] sm:$0xff] %v7193_v26  ;;  %v584_v32 = vpack.c.bf16 %v557_v31, %v556_v30  ;;  %v558_v52 = vld [vmem:[#allocation2 + $0x61] sm:$0xff]  ;;  %v978_v17 = vpack.c.bf16 %v948_v16, %v947_v15  ;;  %v952_v30 = vld [vmem:[#allocation2 + $0x4a] sm:$0xff] }
  0x46   : > { %1067 = vmatpush.bf16.msrb.mxu0 %v5777_v28  ;;  %v559_v53 = vld [vmem:[#allocation2 + $0x69] sm:$0xff]  ;;  %v954_v37 = vld [vmem:[#allocation2 + $0x5a] sm:$0xff]  ;;  %v6905_v15 = vld [vmem:[%s10833_s3 + $0x164] sm:$0xf] }
  0x47   : > { %1116 = vmatpush.bf16.msrb.mxu1 %v5781_v29  ;;  %v585_v59 = vpack.c.bf16 %v559_v53, %v558_v52  ;;  %v951_v29 = vld [vmem:[#allocation2 + $0x42] sm:$0xff]  ;;  %v5960_v52 = vld [vmem:[%s10833_s3 + $0x1f0] sm:$0xf]  ;;  %v5890_v16 = vld [vmem:[%s10833_s3 + $0x168] sm:$0xf0] }
  0x48   : > { %v560_v62 = vld [vmem:[#allocation2 + $0x71] sm:$0xff]  ;;  %v561_v63 = vld [vmem:[#allocation2 + $0x79] sm:$0xff]  ;;  %v980_v31 = vpack.c.bf16 %v952_v30, %v951_v29  ;;  %v955_v43 = vld [vmem:[#allocation2 + $0x62] sm:$0xff]  ;;  %v5893_v22 = vor.u32 %v6905_v15, %v5890_v16 }
  0x49   : > { %v586_v0 = vpack.c.bf16 %v561_v63, %v560_v62  ;;  %v5962_v62 = vld [vmem:[%s10833_s3 + $0x1f8] sm:$0xf0]  ;;  %v5888_v2 = vld [vmem:[%s10833_s3 + $0x160] sm:$0xf]  ;;  %v957_v29 = vld [vmem:[#allocation2 + $0x72] sm:$0xff] }
  0x4a   : > { %858 = vmatmul.bf16.gmra.mxu2 %v539_v45  ;;  %1068 = vmatpush.bf16.msrb.mxu0 %v5769_v36  ;;  %v953_v36 = vld [vmem:[#allocation2 + $0x52] sm:$0xff]  ;;  %v5952_v3 = vld [vmem:[%s10833_s3 + $0x1e0] sm:$0xf]  ;;  %v5874_v15 = vld [vmem:[%s10833_s3 + $0x148] sm:$0xf0] }
  0x4b   : > { %907 = vmatmul.bf16.gmra.mxu3 %v539_v45  ;;  %1117 = vmatpush.bf16.msrb.mxu1 %v5773_v38  ;;  %v5752_v45 = vld [vmem:[%s10831_s1 + $0x110] sm:$0xf]  ;;  %v981_v38 = vpack.c.bf16 %v954_v37, %v953_v36  ;;  %v958_v30 = vld [vmem:[#allocation2 + $0x7a] sm:$0xff] }
  0x4c   : > { %v5753_v49 = vor.u32 %v6848_v46, %v5752_v45  ;;  %v5880_v36 = vld [vmem:[%s10833_s3 + $0x150] sm:$0xf]  ;;  %v6904_v37 = vld [vmem:[%s10833_s3 + $0x154] sm:$0xf0] }
  0x4d   : > { %680 = vmatmul.bf16.gmra.mxu0 %v580_v48  ;;  %729 = vmatmul.bf16.gmra.mxu1 %v580_v48  ;;  %v5754_v48 = vld [vmem:[%s10831_s1 + $0x118] sm:$0xf0] }
  0x4e   : > { %1069 = vmatpush.bf16.msrb.mxu0 %v5761_v42 }
  0x4f   : > { %1118 = vmatpush.bf16.msrb.mxu1 %v5765_v44  ;;  %v956_v44 = vld [vmem:[#allocation2 + $0x6a] sm:$0xff] }
  0x52   : > { %1070 = vmatpush.bf16.msrb.mxu0 %v5753_v49 }
  0x5a   : > { %863 = vmatmul.bf16.gmra.mxu2 %v540_v51 }
  0x5b   : > { %912 = vmatmul.bf16.gmra.mxu3 %v540_v51  ;;  %v5757_v51 = vor.u32 %v6847_v47, %v5754_v48  ;;  %v982_v47 = vpack.c.bf16 %v956_v44, %v955_v43  ;;  %v5881_v43 = vor.u32 %v6904_v37, %v5880_v36  ;;  %v6920_v44 = vld [vmem:[%s10833_s3 + $0x1d4] sm:$0xf0] }
  0x5c   : > { %v6916_v37 = vld [vmem:[%s10833_s3 + $0x1b4] sm:$0xf0] }
  0x5d   : > { %685 = vmatmul.bf16.gmra.mxu0 %v581_v54  ;;  %734 = vmatmul.bf16.gmra.mxu1 %v581_v54  ;;  %v5744_v54 = vld [vmem:[%s10831_s1 + $0x100] sm:$0xf] }
  0x5e   : > { %1119 = vmatpush.bf16.msrb.mxu1 %v5757_v51  ;;  %v5745_v56 = vor.u32 %v6846_v55, %v5744_v54  ;;  %v6908_v51 = vld [vmem:[%s10833_s3 + $0x174] sm:$0xf0]  ;;  %v6907_v55 = vld [vmem:[%s10833_s3 + $0x174] sm:$0xf] }
  0x5f   : > { %v6924_v54 = vld [vmem:[%s10833_s3 + $0x1f4] sm:$0xf0] }
  0x60   : > { %1071 = vmatpush.bf16.msrb.mxu0 %v5745_v56 }
  0x6a   : > { %868 = vmatmul.bf16.gmra.mxu2 %v541_v57 }
  0x6b   : > { %917 = vmatmul.bf16.gmra.mxu3 %v541_v57  ;;  %v6845_v57 = vld [vmem:[%s10831_s1 + $0x104] sm:$0xf] }
  0x6d   : > { %690 = vmatmul.bf16.gmra.mxu0 %v582_v60  ;;  %739 = vmatmul.bf16.gmra.mxu1 %v582_v60  ;;  %v5749_v60 = vor.u32 %v6845_v57, %v5746_v58  ;;  %v5898_v57 = vld [vmem:[%s10833_s3 + $0x178] sm:$0xf0] }
  0x6f   : > { %1120 = vmatpush.bf16.msrb.mxu1 %v5749_v60  ;;  %v5901_v60 = vor.u32 %v6907_v55, %v5898_v57  ;;  %v5946_v55 = vld [vmem:[%s10833_s3 + $0x1d8] sm:$0xf0] }
  0x71   : > { %1872 = vmatpush.bf16.msra.mxu0 %v5901_v60 }
  0x75   : > { %1873 = vmatpush.bf16.msra.mxu0 %v5893_v22  ;;  %v6917_v22 = vld [vmem:[%s10833_s3 + $0x1c4] sm:$0xf] }
  0x7a   : > { %873 = vmatmul.bf16.gmra.mxu2 %v542_v5 }
  0x7b   : > { %922 = vmatmul.bf16.gmra.mxu3 %v542_v5 }
  0x7d   : > { %695 = vmatmul.bf16.gmra.mxu0 %v583_v8  ;;  %744 = vmatmul.bf16.gmra.mxu1 %v583_v8 }
  0x8a   : > { %878 = vmatmul.bf16.gmra.mxu2 %v543_v27 }
  0x8b   : > { %927 = vmatmul.bf16.gmra.mxu3 %v543_v27 }
  0x8d   : > { %700 = vmatmul.bf16.gmra.mxu0 %v584_v32  ;;  %749 = vmatmul.bf16.gmra.mxu1 %v584_v32 }
  0x9a   : > { %883 = vmatmul.bf16.gmra.mxu2 %v544_v50 }
  0x9b   : > { %932 = vmatmul.bf16.gmra.mxu3 %v544_v50  ;;  %v5896_v50 = vld [vmem:[%s10833_s3 + $0x170] sm:$0xf] }
  0x9c   : > { %v5897_v53 = vor.u32 %v6908_v51, %v5896_v50  ;;  %v5882_v50 = vld [vmem:[%s10833_s3 + $0x158] sm:$0xf0]  ;;  %v983_v51 = vpack.c.bf16 %v958_v30, %v957_v29  ;;  %v5864_v29 = vld [vmem:[%s10833_s3 + $0x130] sm:$0xf]  ;;  %v6900_v30 = vld [vmem:[%s10833_s3 + $0x134] sm:$0xf0] }
  0x9d   : > { %705 = vmatmul.bf16.gmra.mxu0 %v585_v59  ;;  %754 = vmatmul.bf16.gmra.mxu1 %v585_v59  ;;  %v5961_v59 = vor.u32 %v6924_v54, %v5960_v52  ;;  %v6919_v54 = vld [vmem:[%s10833_s3 + $0x1d4] sm:$0xf]  ;;  %v5865_v36 = vor.u32 %v6900_v30, %v5864_v29  ;;  %v5848_v30 = vld [vmem:[%s10833_s3 + $0x110] sm:$0xf] }
  0x9e   : > { %1774 = vmatpush.bf16.msrb.mxu2 %v5897_v53  ;;  %v5949_v60 = vor.u32 %v6919_v54, %v5946_v55  ;;  %v5856_v55 = vld [vmem:[%s10833_s3 + $0x120] sm:$0xf] }
  0x9f   : > { %1823 = vmatpush.bf16.msrb.mxu3 %v5961_v59 }
  0xaa   : > { %888 = vmatmul.bf16.gmra.mxu2 %v545_v61 }
  0xab   : > { %937 = vmatmul.bf16.gmra.mxu3 %v545_v61  ;;  %v6923_v61 = vld [vmem:[%s10833_s3 + $0x1f4] sm:$0xf] }
  0xac   : > { %v5965_v1 = vor.u32 %v6923_v61, %v5962_v62 }
  0xad   : > { %710 = vmatmul.bf16.gmra.mxu0 %v586_v0  ;;  %759 = vmatmul.bf16.gmra.mxu1 %v586_v0 }
  0xae   : > { %1921 = vmatpush.bf16.msra.mxu1 %v5965_v1  ;;  %v5872_v1 = vld [vmem:[%s10833_s3 + $0x140] sm:$0xf] }
  0xba   : > { %v7649_v5 = vpop.f32.mrf.mxu0  ;;  %v7651_v6 = vpop.f32.mrf.mxu1 }
  0xbd   : > { %1072 = vmatmul.bf16.vlgmr.msrb.gmra.mxu0 %v976_v4  ;;  %1121 = vmatmul.bf16.vlgmr.msrb.gmra.mxu1 %v976_v4  ;;  %v7697_v45 = vpop.f32.mrf.mxu2  ;;  %v6906_v4 = vld [vmem:[%s10833_s3 + $0x164] sm:$0xf0] }
  0xbe   : > { %v7699_v46 = vpop.f32.mrf.mxu3  ;;  %v5889_v9 = vor.u32 %v6906_v4, %v5888_v2  ;;  %v6902_v2 = vld [vmem:[%s10833_s3 + $0x144] sm:$0xf0]  ;;  %v5936_v4 = vld [vmem:[%s10833_s3 + $0x1c0] sm:$0xf] }
  0xc0   : > { %1775 = vmatpush.bf16.msrb.mxu2 %v5889_v9  ;;  %v6918_v9 = vld [vmem:[%s10833_s3 + $0x1c4] sm:$0xf0] }
  0xc1   : > { %v5937_v16 = vor.u32 %v6918_v9, %v5936_v4  ;;  %v6914_v4 = vld [vmem:[%s10833_s3 + $0x1a4] sm:$0xf0]  ;;  %v5858_v9 = vld [vmem:[%s10833_s3 + $0x128] sm:$0xf0] }
  0xc2   : > { %v7653_v7 = vpop.f32.mrf.mxu0  ;;  %v7655_v8 = vpop.f32.mrf.mxu1 }
  0xc4   : > { %1776 = vmatpush.bf16.msrb.mxu2 %v5881_v43  ;;  %v5866_v43 = vld [vmem:[%s10833_s3 + $0x138] sm:$0xf0] }
  0xc5   : > { %v7723_v56 = vpop.f32.mrf.mxu2 }
  0xc6   : > { %v7725_v58 = vpop.f32.mrf.mxu3 }
  0xca   : > { %v7657_v11 = vpop.f32.mrf.mxu0  ;;  %v7659_v12 = vpop.f32.mrf.mxu1 }
  0xcd   : > { %1077 = vmatmul.bf16.gmra.mxu0 %v977_v10  ;;  %1126 = vmatmul.bf16.gmra.mxu1 %v977_v10  ;;  %v6922_v10 = vld [vmem:[%s10833_s3 + $0x1e4] sm:$0xf0]  ;;  %v7789_v61 = vpop.f32.mrf.mxu2 }
  0xce   : > { %v7791_v62 = vpop.f32.mrf.mxu3 }
  0xd2   : > { %v7661_v13 = vpop.f32.mrf.mxu0  ;;  %v7663_v14 = vpop.f32.mrf.mxu1 }
  0xda   : > { %v7665_v18 = vpop.f32.mrf.mxu0  ;;  %v7667_v19 = vpop.f32.mrf.mxu1 }
  0xdd   : > { %1082 = vmatmul.bf16.gmra.mxu0 %v978_v17  ;;  %1131 = vmatmul.bf16.gmra.mxu1 %v978_v17  ;;  %v5953_v17 = vor.u32 %v6922_v10, %v5952_v3  ;;  %v5873_v3 = vor.u32 %v6902_v2, %v5872_v1  ;;  %v6901_v10 = vld [vmem:[%s10833_s3 + $0x144] sm:$0xf]  ;;  %v5920_v1 = vld [vmem:[%s10833_s3 + $0x1a0] sm:$0xf] }
  0xdf   : > { %1824 = vmatpush.bf16.msrb.mxu3 %v5953_v17  ;;  %v5877_v17 = vor.u32 %v6901_v10, %v5874_v15  ;;  %1777 = vmatpush.bf16.msrb.mxu2 %v5873_v3  ;;  %v6897_v3 = vld [vmem:[%s10833_s3 + $0x124] sm:$0xf]  ;;  %v7863_v10 = vpop.f32.mrf.mxu2  ;;  %v7865_v15 = vpop.f32.mrf.mxu3 }
  0xe2   : > { %v7669_v20 = vpop.f32.mrf.mxu0  ;;  %v7671_v21 = vpop.f32.mrf.mxu1 }
  0xe3   : > { %1778 = vmatpush.bf16.msrb.mxu2 %v5865_v36  ;;  %v5912_v36 = vld [vmem:[%s10833_s3 + $0x190] sm:$0xf] }
  0xea   : > { %v7673_v25 = vpop.f32.mrf.mxu0  ;;  %v7675_v26 = vpop.f32.mrf.mxu1 }
  0xed   : > { %1087 = vmatmul.bf16.gmra.mxu0 %v979_v24  ;;  %1136 = vmatmul.bf16.gmra.mxu1 %v979_v24  ;;  %v5954_v24 = vld [vmem:[%s10833_s3 + $0x1e8] sm:$0xf0] }
  0xf2   : > { %v7677_v27 = vpop.f32.mrf.mxu0  ;;  %v7679_v28 = vpop.f32.mrf.mxu1 }
  0xfa   : > { %v7681_v32 = vpop.f32.mrf.mxu0  ;;  %v7683_v33 = vpop.f32.mrf.mxu1 }
  0xfd   : > { %1092 = vmatmul.bf16.gmra.mxu0 %v980_v31  ;;  %1141 = vmatmul.bf16.gmra.mxu1 %v980_v31  ;;  %v5957_v31 = vor.u32 %v6921_v23, %v5954_v24  ;;  %v5938_v23 = vld [vmem:[%s10833_s3 + $0x1c8] sm:$0xf0] }
  0xfe   : > { %v5941_v24 = vor.u32 %v6917_v22, %v5938_v23  ;;  %v6913_v22 = vld [vmem:[%s10833_s3 + $0x1a4] sm:$0xf]  ;;  %v5922_v23 = vld [vmem:[%s10833_s3 + $0x1a8] sm:$0xf0] }
  0xff   : > { %1922 = vmatpush.bf16.msra.mxu1 %v5957_v31  ;;  %v5928_v31 = vld [vmem:[%s10833_s3 + $0x1b0] sm:$0xf]  ;;  %v5925_v29 = vor.u32 %v6913_v22, %v5922_v23  ;;  %v6910_v22 = vld [vmem:[%s10833_s3 + $0x184] sm:$0xf0]  ;;  %v6893_v23 = vld [vmem:[%s10833_s3 + $0x104] sm:$0xf] }
 0x102   : > { %v7685_v34 = vpop.f32.mrf.mxu0  ;;  %v7687_v35 = vpop.f32.mrf.mxu1 }
 0x103   : > { %1923 = vmatpush.bf16.msra.mxu1 %v5949_v60  ;;  %v6898_v60 = vld [vmem:[%s10833_s3 + $0x124] sm:$0xf0] }
 0x104   : > { %v5857_v2 = vor.u32 %v6898_v60, %v5856_v55 }
 0x106   : > { %1779 = vmatpush.bf16.msrb.mxu2 %v5857_v2 }
 0x107   : > { %1924 = vmatpush.bf16.msra.mxu1 %v5941_v24  ;;  %v1194_v24 = vld [vmem:[%s10832_s2] sm:$0x3] }
 0x10a   : > { %v7689_v39 = vpop.f32.mrf.mxu0  ;;  %v7691_v40 = vpop.f32.mrf.mxu1 }
 0x10d   : > { %1097 = vmatmul.bf16.gmra.mxu0 %v981_v38  ;;  %1146 = vmatmul.bf16.gmra.mxu1 %v981_v38  ;;  %v5944_v38 = vld [vmem:[%s10833_s3 + $0x1d0] sm:$0xf] }
 0x10e   : > { %v5945_v52 = vor.u32 %v6920_v44, %v5944_v38  ;;  %v6899_v38 = vld [vmem:[%s10833_s3 + $0x134] sm:$0xf]  ;;  %v5929_v44 = vor.u32 %v6916_v37, %v5928_v31  ;;  %v6896_v31 = vld [vmem:[%s10833_s3 + $0x114] sm:$0xf0]  ;;  %v855_v37 = vadd.f32 %v7697_v45, %v7649_v5  ;;  %v7900_v5 = vperm.slane %v1194_v24, 1 }
 0x110   : > { %1825 = vmatpush.bf16.msrb.mxu3 %v5945_v52 }
 0x112   : > { %v7693_v41 = vpop.f32.mrf.mxu0  ;;  %v7695_v42 = vpop.f32.mrf.mxu1 }
 0x114   : > { %1826 = vmatpush.bf16.msrb.mxu3 %v5937_v16  ;;  %v5921_v16 = vor.u32 %v6914_v4, %v5920_v1 }
 0x118   : > { %1827 = vmatpush.bf16.msrb.mxu3 %v5929_v44  ;;  %v6912_v44 = vld [vmem:[%s10833_s3 + $0x194] sm:$0xf0] }
 0x119   : > { %v5913_v45 = vor.u32 %v6912_v44, %v5912_v36  ;;  %v864_v44 = vpop.f32.mrf.mxu2 }
 0x11a   : > { %v7701_v48 = vpop.f32.mrf.mxu0  ;;  %v7703_v49 = vpop.f32.mrf.mxu1 }
 0x11c   : > { %1828 = vmatpush.bf16.msrb.mxu3 %v5921_v16  ;;  %v5904_v16 = vld [vmem:[%s10833_s3 + $0x180] sm:$0xf] }
 0x11d   : > { %1102 = vmatmul.bf16.gmra.mxu0 %v982_v47  ;;  %1151 = vmatmul.bf16.gmra.mxu1 %v982_v47  ;;  %v6903_v47 = vld [vmem:[%s10833_s3 + $0x154] sm:$0xf] }
 0x11e   : > { %v5885_v53 = vor.u32 %v6903_v47, %v5882_v50  ;;  %v5869_v47 = vor.u32 %v6899_v38, %v5866_v43  ;;  %v6915_v50 = vld [vmem:[%s10833_s3 + $0x1b4] sm:$0xf]  ;;  %v904_v38 = vadd.f32 %v7699_v46, %v7651_v6  ;;  %v5849_v43 = vor.u32 %v6896_v31, %v5848_v30 }
 0x11f   : > { %v6911_v46 = vld [vmem:[%s10833_s3 + $0x194] sm:$0xf]  ;;  %v5905_v31 = vor.u32 %v6910_v22, %v5904_v16  ;;  %v860_v16 = vadd.f32 %v7789_v61, %v7657_v11 }
 0x120   : > { %1874 = vmatpush.bf16.msra.mxu0 %v5885_v53  ;;  %1780 = vmatpush.bf16.msrb.mxu2 %v5849_v43 }
 0x121   : > { %1829 = vmatpush.bf16.msrb.mxu3 %v5913_v45 }
 0x122   : > { %v7733_v63 = vpop.f32.mrf.mxu0  ;;  %v7735_v0 = vpop.f32.mrf.mxu1 }
 0x124   : > { %1875 = vmatpush.bf16.msra.mxu0 %v5877_v17  ;;  %v5861_v17 = vor.u32 %v6897_v3, %v5858_v9  ;;  %v5840_v3 = vld [vmem:[%s10833_s3 + $0x100] sm:$0xf]  ;;  %v6894_v9 = vld [vmem:[%s10833_s3 + $0x104] sm:$0xf0] }
 0x125   : > { %1830 = vmatpush.bf16.msrb.mxu3 %v5905_v31 }
 0x128   : > { %1876 = vmatpush.bf16.msra.mxu0 %v5869_v47  ;;  %v6895_v47 = vld [vmem:[%s10833_s3 + $0x114] sm:$0xf] }
 0x12a   : > { %v7785_v57 = vpop.f32.mrf.mxu0  ;;  %v7787_v59 = vpop.f32.mrf.mxu1 }
 0x12c   : > { %1877 = vmatpush.bf16.msra.mxu0 %v5861_v17  ;;  %v5841_v17 = vor.u32 %v6894_v9, %v5840_v3 }
 0x12d   : > { %1107 = vmatmul.bf16.gmra.mxu0 %v983_v51  ;;  %1156 = vmatmul.bf16.gmra.mxu1 %v983_v51  ;;  %v5930_v51 = vld [vmem:[%s10833_s3 + $0x1b8] sm:$0xf0] }
 0x12e   : > { %v5933_v54 = vor.u32 %v6915_v50, %v5930_v51  ;;  %v5850_v50 = vld [vmem:[%s10833_s3 + $0x118] sm:$0xf0]  ;;  %v7898_v51 = vperm.slane %v1194_v24, 0  ;;  %v5842_v24 = vld [vmem:[%s10833_s3 + $0x108] sm:$0xf0]  ;;  %1781 = vmatpush.bf16.msrb.mxu2 %v5841_v17 }
 0x12f   : > { %v5853_v6 = vor.u32 %v6895_v47, %v5850_v50  ;;  %v5845_v36 = vor.u32 %v6893_v23, %v5842_v24  ;;  %v913_v47 = vpop.f32.mrf.mxu3 }
 0x130   : > { %1925 = vmatpush.bf16.msra.mxu1 %v5933_v54  ;;  %v5914_v54 = vld [vmem:[%s10833_s3 + $0x198] sm:$0xf0] }
 0x131   : > { %v5917_v1 = vor.u32 %v6911_v46, %v5914_v54  ;;  %1878 = vmatpush.bf16.msra.mxu0 %v5853_v6  ;;  %v857_v6 = vadd.f32 %v7723_v56, %v7653_v7  ;;  %v906_v46 = vadd.f32 %v7725_v58, %v7655_v8  ;;  %v909_v7 = vadd.f32 %v7791_v62, %v7659_v12  ;;  %v7944_v56 = vpop.f32.mrf.mxu2 }
 0x132   : > { %v7841_v52 = vpop.f32.mrf.mxu0  ;;  %v7843_v53 = vpop.f32.mrf.mxu1  ;;  %v862_v12 = vadd.f32 %v7863_v10, %v7661_v13  ;;  %v911_v62 = vadd.f32 %v7865_v15, %v7663_v14 }
 0x134   : > { %1926 = vmatpush.bf16.msra.mxu1 %v5925_v29 }
 0x135   : > { %1879 = vmatpush.bf16.msra.mxu0 %v5845_v36 }
 0x137   : > { %v7946_v8 = vpop.f32.mrf.mxu3 }
 0x138   : > { %1927 = vmatpush.bf16.msra.mxu1 %v5917_v1 }
 0x13a   : > { %v1073_v55 = vpop.f32.mrf.mxu0  ;;  %v1122_v60 = vpop.f32.mrf.mxu1 }
 0x13b   : > { %v1162_v2 = vadd.f32 %v1073_v55, %v855_v37  ;;  %v1163_v4 = vadd.f32 %v1122_v60, %v904_v38  ;;  %v6909_v37 = vld [vmem:[%s10833_s3 + $0x184] sm:$0xf]  ;;  %v5906_v38 = vld [vmem:[%s10833_s3 + $0x188] sm:$0xf0] }
 0x13c   : > { %v5909_v43 = vor.u32 %v6909_v37, %v5906_v38 }
 0x13d   : > { %v1200_v29 = vadd.f32 %v7898_v51, %v1162_v2  ;;  %v1201_v30 = vadd.f32 %v7900_v5, %v1163_v4 }
 0x13e   : > { %1928 = vmatpush.bf16.msra.mxu1 %v5909_v43 }
 0x13f   : > { %v1232_v50 = vmax.f32 %v1200_v29, 0.0  ;;  %v1233_v45 = vmax.f32 %v1201_v30, 0.0 }
 0x141   : > { %1264 = vst [vmem:[#allocation3] sm:$0xff] %v1232_v50  ;;  %v7954_v50 = vpop.f32.mrf.mxu2 }
 0x142   : > { %1265 = vst [vmem:[#allocation3 + $0x38] sm:$0xff] %v1233_v45  ;;  %v1075_v54 = vpop.f32.mrf.mxu0  ;;  %v1124_v55 = vpop.f32.mrf.mxu1 }
 0x143   : > { %v1164_v60 = vadd.f32 %v1075_v54, %v857_v6  ;;  %v1165_v1 = vadd.f32 %v1124_v55, %v906_v46  ;;  %v7956_v45 = vpop.f32.mrf.mxu3 }
 0x145   : > { %v1202_v2 = vadd.f32 %v7898_v51, %v1164_v60  ;;  %v1203_v4 = vadd.f32 %v7900_v5, %v1165_v1 }
 0x147   : > { %v1234_v3 = vmax.f32 %v1202_v2, 0.0  ;;  %v1235_v9 = vmax.f32 %v1203_v4, 0.0 }
 0x148   : > { %v1376_v30 = vld [vmem:[#allocation3] sm:$0xfe] }
 0x149   : > { %1266 = vst [vmem:[#allocation3 + $0xf8] sm:$0xff] %v1234_v3  ;;  %v1377_v31 = vld [vmem:[#allocation3 + $0x38] sm:$0xfe]  ;;  %v1443_v36 = vpack.c.bf16 %v1234_v3, %v1376_v30  ;;  %v2326_v60 = vld [vmem:[#allocation3] sm:$0xfc] }
 0x14a   : > { %1267 = vst [vmem:[#allocation3 + $0x58] sm:$0xff] %v1235_v9  ;;  %v1078_v58 = vpop.f32.mrf.mxu0  ;;  %v1127_v17 = vpop.f32.mrf.mxu1  ;;  %v1444_v37 = vpack.c.bf16 %v1235_v9, %v1377_v31  ;;  %v2327_v14 = vld [vmem:[#allocation3 + $0x38] sm:$0xfc]  ;;  %v2363_v2 = vpack.c.bf16 %v1234_v3, %v2326_v60 }
 0x14b   : > { %v1166_v22 = vadd.f32 %v1078_v58, %v860_v16  ;;  %v1167_v23 = vadd.f32 %v1127_v17, %v909_v7  ;;  %v1465_v13 = vshll.u32 %v1443_v36, 16  ;;  %v2364_v4 = vpack.c.bf16 %v1235_v9, %v2327_v14 }
 0x14c   : > { %v1477_v10 = vshll.u32 %v1444_v37, 16  ;;  %v1463_v30 = vshrl.u32 %v1443_v36, 16  ;;  %v1475_v9 = vshrl.u32 %v1444_v37, 16 }
 0x14d   : > { %v1204_v24 = vadd.f32 %v7898_v51, %v1166_v22  ;;  %v1205_v29 = vadd.f32 %v7900_v5, %v1167_v23  ;;  %v1467_v7 = vrot.slane %v1465_v13, 1  ;;  %v865_v22 = vadd.f32 %v864_v44, %v7665_v18  ;;  %v871_v18 = vpop.f32.mrf.mxu2  ;;  %v920_v44 = vpop.f32.mrf.mxu3 }
 0x14e   : > { %v1479_v17 = vrot.slane %v1477_v10, 1  ;;  %v914_v23 = vadd.f32 %v913_v47, %v7667_v19  ;;  %v867_v13 = vadd.f32 %v7944_v56, %v7669_v20  ;;  %v916_v10 = vadd.f32 %v7946_v8, %v7671_v21 }
 0x14f   : > { %v1236_v11 = vmax.f32 %v1204_v24, 0.0  ;;  %v1237_v61 = vmax.f32 %v1205_v29, 0.0  ;;  %v1468_v19 = vor.u32 %v1467_v7, %v1463_v30 }
 0x151   : > { %1268 = vst [vmem:[#allocation3 + $0x20] sm:$0xff] %v1236_v11 }
 0x152   : > { %1269 = vst [vmem:[#allocation3 + $0x8] sm:$0xff] %v1237_v61  ;;  %v1080_v38 = vpop.f32.mrf.mxu0  ;;  %v1129_v43 = vpop.f32.mrf.mxu1 }
 0x153   : > { %v1168_v6 = vadd.f32 %v1080_v38, %v862_v12  ;;  %v1169_v46 = vadd.f32 %v1129_v43, %v911_v62  ;;  %v2389_v12 = vrot.slane %v2364_v4, 1  ;;  %v1480_v38 = vor.u32 %v1479_v17, %v1475_v9 }
 0x155   : > { %v1206_v54 = vadd.f32 %v7898_v51, %v1168_v6  ;;  %v1207_v55 = vadd.f32 %v7900_v5, %v1169_v46 }
 0x157   : > { %v1238_v15 = vmax.f32 %v1206_v54, 0.0  ;;  %v1239_v1 = vmax.f32 %v1207_v55, 0.0 }
 0x159   : > { %1270 = vst [vmem:[#allocation3 + $0x70] sm:$0xff] %v1238_v15  ;;  %v7960_v16 = vpack.c.bf16 %v1238_v15, %v1236_v11  ;;  %v7962_v58 = vpack.c.bf16 %v1239_v1, %v1237_v61  ;;  %v2386_v11 = vrot.slane %v2363_v2, 1 }
 0x15a   : > { %1271 = vst [vmem:[#allocation3 + $0x78] sm:$0xff] %v1239_v1  ;;  %v1083_v24 = vpop.f32.mrf.mxu0  ;;  %v1132_v29 = vpop.f32.mrf.mxu1 }
 0x15b   : > { %v1470_v3 = vshll.u32 %v7960_v16, 16  ;;  %v1482_v31 = vshll.u32 %v7962_v58, 16  ;;  %v2387_v61 = vrot.slane %v7960_v16, 1  ;;  %v2390_v62 = vrot.slane %v7962_v58, 1 }
 0x15c   : > { %v1170_v6 = vadd.f32 %v1083_v24, %v865_v22  ;;  %v1171_v46 = vadd.f32 %v1132_v29, %v914_v23  ;;  %v874_v22 = vpop.f32.mrf.mxu2  ;;  %v923_v23 = vpop.f32.mrf.mxu3  ;;  %v1486_v9 = vshrl.u32 %v7960_v16, 16 }
 0x15d   : > { %v1472_v47 = vrot.slane %v1470_v3, 1  ;;  %v1484_v43 = vrot.slane %v1482_v31, 1  ;;  %v7973_v36 = vsel %vm2385_vm1, %v2386_v11, %v2387_v61  ;;  %v7978_v37 = vsel %vm2385_vm1, %v2389_v12, %v2390_v62 }
 0x15e   : > { %v1208_v15 = vadd.f32 %v7898_v51, %v1170_v6  ;;  %v1209_v1 = vadd.f32 %v7900_v5, %v1171_v46  ;;  %v1494_v11 = vshrl.u32 %v7962_v58, 16 }
 0x15f   : > { %v1473_v54 = vsel %vm1461_vm0, %v1468_v19, %v1472_v47  ;;  %v1485_v55 = vsel %vm1461_vm0, %v1480_v38, %v1484_v43  ;;  %v870_v19 = vadd.f32 %v7954_v50, %v7673_v25  ;;  %v919_v38 = vadd.f32 %v7956_v45, %v7675_v26 }
 0x160   : > { %1782 = vmatmul.bf16.vlgmr.msrb.gmra.mxu2 %v1473_v54  ;;  %1831 = vmatmul.bf16.vlgmr.msrb.gmra.mxu3 %v1485_v55  ;;  %v1240_v20 = vmax.f32 %v1208_v15, 0.0  ;;  %v1241_v56 = vmax.f32 %v1209_v1, 0.0  ;;  %v1488_v6 = vor.u32 %v1486_v9, %v1472_v47  ;;  %v872_v15 = vadd.f32 %v871_v18, %v7677_v27 }
 0x161   : > { %1880 = vmatmul.bf16.vlgmr.msra.gmra.mxu0 %v1473_v54  ;;  %1929 = vmatmul.bf16.vlgmr.msra.gmra.mxu1 %v1485_v55  ;;  %v1496_v54 = vor.u32 %v1494_v11, %v1484_v43  ;;  %v921_v1 = vadd.f32 %v920_v44, %v7679_v28 }
 0x162   : > { %v1085_v60 = vpop.f32.mrf.mxu0  ;;  %v1134_v14 = vpop.f32.mrf.mxu1 }
 0x163   : > { %v1172_v2 = vadd.f32 %v1085_v60, %v867_v13  ;;  %v1173_v4 = vadd.f32 %v1134_v14, %v916_v10 }
 0x164   : > { %v876_v25 = vpop.f32.mrf.mxu2  ;;  %v925_v50 = vpop.f32.mrf.mxu3 }
 0x165   : > { %v1210_v7 = vadd.f32 %v7898_v51, %v1172_v2  ;;  %v1211_v17 = vadd.f32 %v7900_v5, %v1173_v4 }
 0x167   : > { %v1242_v24 = vmax.f32 %v1210_v7, 0.0  ;;  %v1243_v21 = vmax.f32 %v1211_v17, 0.0 }
 0x169   : > { %v7990_v8 = vpack.c.bf16 %v1242_v24, %v1240_v20  ;;  %v7992_v29 = vpack.c.bf16 %v1243_v21, %v1241_v56 }
 0x16a   : > { %v1088_v30 = vpop.f32.mrf.mxu0  ;;  %v1137_v3 = vpop.f32.mrf.mxu1 }
 0x16b   : > { %v1490_v31 = vshll.u32 %v7990_v8, 16  ;;  %v1498_v12 = vshll.u32 %v7992_v29, 16  ;;  %v1174_v13 = vadd.f32 %v1088_v30, %v870_v19  ;;  %v1175_v10 = vadd.f32 %v1137_v3, %v919_v38 }
 0x16c   : > { %v879_v30 = vpop.f32.mrf.mxu2  ;;  %v928_v3 = vpop.f32.mrf.mxu3  ;;  %v1502_v9 = vshrl.u32 %v7990_v8, 16  ;;  %v1510_v11 = vshrl.u32 %v7992_v29, 16  ;;  %v875_v19 = vadd.f32 %v874_v22, %v7681_v32  ;;  %v924_v38 = vadd.f32 %v923_v23, %v7683_v33 }
 0x16d   : > { %v1492_v46 = vrot.slane %v1490_v31, 1  ;;  %v1500_v55 = vrot.slane %v1498_v12, 1  ;;  %v1212_v47 = vadd.f32 %v7898_v51, %v1174_v13  ;;  %v1213_v43 = vadd.f32 %v7900_v5, %v1175_v10 }
 0x16f   : > { %v1493_v60 = vsel %vm1461_vm0, %v1488_v6, %v1492_v46  ;;  %v1501_v14 = vsel %vm1461_vm0, %v1496_v54, %v1500_v55  ;;  %v1244_v20 = vmax.f32 %v1212_v47, 0.0  ;;  %v1245_v27 = vmax.f32 %v1213_v43, 0.0 }
 0x170   : > { %1787 = vmatmul.bf16.gmra.mxu2 %v1493_v60  ;;  %1836 = vmatmul.bf16.gmra.mxu3 %v1501_v14  ;;  %v1504_v6 = vor.u32 %v1502_v9, %v1492_v46  ;;  %v1512_v13 = vor.u32 %v1510_v11, %v1500_v55  ;;  %v880_v9 = vadd.f32 %v879_v30, %v7689_v39 }
 0x171   : > { %1885 = vmatmul.bf16.gmra.mxu0 %v1493_v60  ;;  %1934 = vmatmul.bf16.gmra.mxu1 %v1501_v14 }
 0x172   : > { %v1090_v26 = vpop.f32.mrf.mxu0  ;;  %v1139_v45 = vpop.f32.mrf.mxu1 }
 0x173   : > { %v1176_v2 = vadd.f32 %v1090_v26, %v872_v15  ;;  %v1177_v4 = vadd.f32 %v1139_v45, %v921_v1  ;;  %v877_v26 = vadd.f32 %v876_v25, %v7685_v34  ;;  %v926_v45 = vadd.f32 %v925_v50, %v7687_v35 }
 0x174   : > { %v881_v47 = vpop.f32.mrf.mxu2  ;;  %v930_v43 = vpop.f32.mrf.mxu3 }
 0x175   : > { %v1214_v7 = vadd.f32 %v7898_v51, %v1176_v2  ;;  %v1215_v17 = vadd.f32 %v7900_v5, %v1177_v4  ;;  %v931_v39 = vadd.f32 %v930_v43, %v7695_v42  ;;  %v6024_v42 = vld [vmem:[%s10833_s3 + $0x70] sm:$0xf] }
 0x177   : > { %v1246_v18 = vmax.f32 %v1214_v7, 0.0  ;;  %v1247_v28 = vmax.f32 %v1215_v17, 0.0 }
 0x179   : > { %v8010_v44 = vpack.c.bf16 %v1246_v18, %v1244_v20  ;;  %v8012_v56 = vpack.c.bf16 %v1247_v28, %v1245_v27 }
 0x17a   : > { %v1093_v24 = vpop.f32.mrf.mxu0  ;;  %v1142_v21 = vpop.f32.mrf.mxu1 }
 0x17b   : > { %v1506_v31 = vshll.u32 %v8010_v44, 16  ;;  %v1514_v12 = vshll.u32 %v8012_v56, 16  ;;  %v1178_v60 = vadd.f32 %v1093_v24, %v875_v19  ;;  %v1179_v14 = vadd.f32 %v1142_v21, %v924_v38 }
 0x17c   : > { %v1518_v18 = vshrl.u32 %v8010_v44, 16  ;;  %v1526_v24 = vshrl.u32 %v8012_v56, 16 }
 0x17d   : > { %v1508_v54 = vrot.slane %v1506_v31, 1  ;;  %v1516_v10 = vrot.slane %v1514_v12, 1  ;;  %v1216_v22 = vadd.f32 %v7898_v51, %v1178_v60  ;;  %v1217_v23 = vadd.f32 %v7900_v5, %v1179_v14  ;;  %v884_v60 = vpop.f32.mrf.mxu2  ;;  %v933_v14 = vpop.f32.mrf.mxu3 }
 0x17e   : > { %v929_v31 = vadd.f32 %v928_v3, %v7691_v40 }
 0x17f   : > { %v1509_v15 = vsel %vm1461_vm0, %v1504_v6, %v1508_v54  ;;  %v1517_v1 = vsel %vm1461_vm0, %v1512_v13, %v1516_v10  ;;  %v1248_v7 = vmax.f32 %v1216_v22, 0.0  ;;  %v1249_v34 = vmax.f32 %v1217_v23, 0.0 }
 0x180   : > { %1792 = vmatmul.bf16.gmra.mxu2 %v1509_v15  ;;  %1841 = vmatmul.bf16.gmra.mxu3 %v1517_v1  ;;  %v1520_v11 = vor.u32 %v1518_v18, %v1508_v54  ;;  %v1528_v19 = vor.u32 %v1526_v24, %v1516_v10 }
 0x181   : > { %1890 = vmatmul.bf16.gmra.mxu0 %v1509_v15  ;;  %1939 = vmatmul.bf16.gmra.mxu1 %v1517_v1 }
 0x182   : > { %v1095_v32 = vpop.f32.mrf.mxu0  ;;  %v1144_v33 = vpop.f32.mrf.mxu1 }
 0x183   : > { %v1180_v46 = vadd.f32 %v1095_v32, %v877_v26  ;;  %v1181_v55 = vadd.f32 %v1144_v33, %v926_v45  ;;  %v882_v26 = vadd.f32 %v881_v47, %v7693_v41  ;;  %v885_v47 = vadd.f32 %v884_v60, %v7701_v48 }
 0x185   : > { %v1218_v2 = vadd.f32 %v7898_v51, %v1180_v46  ;;  %v1219_v4 = vadd.f32 %v7900_v5, %v1181_v55  ;;  %v6876_v55 = vld [vmem:[%s10833_s3 + $0x74] sm:$0xf0] }
 0x186   : > { %v6025_v43 = vor.u32 %v6876_v55, %v6024_v42  ;;  %v6018_v42 = vld [vmem:[%s10833_s3 + $0x68] sm:$0xf0] }
 0x187   : > { %v1250_v25 = vmax.f32 %v1218_v2, 0.0  ;;  %v1251_v35 = vmax.f32 %v1219_v4, 0.0  ;;  %v6088_v2 = vld [vmem:[%s10833_s3 + $0xf0] sm:$0xf]  ;;  %v6892_v4 = vld [vmem:[%s10833_s3 + $0xf4] sm:$0xf0] }
 0x188   : > { %2130 = vmatpush.bf16.msra.mxu2 %v6025_v43 }
 0x189   : > { %v8028_v50 = vpack.c.bf16 %v1250_v25, %v1248_v7  ;;  %v8030_v17 = vpack.c.bf16 %v1251_v35, %v1249_v34  ;;  %v934_v7 = vadd.f32 %v933_v14, %v7703_v49  ;;  %v886_v34 = vpop.f32.mrf.mxu2  ;;  %v935_v25 = vpop.f32.mrf.mxu3 }
 0x18a   : > { %v1098_v20 = vpop.f32.mrf.mxu0  ;;  %v1147_v27 = vpop.f32.mrf.mxu1 }
 0x18b   : > { %v1522_v28 = vshll.u32 %v8028_v50, 16  ;;  %v1530_v21 = vshll.u32 %v8030_v17, 16  ;;  %v1182_v6 = vadd.f32 %v1098_v20, %v880_v9  ;;  %v1183_v13 = vadd.f32 %v1147_v27, %v929_v31 }
 0x18c   : > { %v6089_v27 = vor.u32 %v6892_v4, %v6088_v2  ;;  %v1542_v24 = vshrl.u32 %v8030_v17, 16  ;;  %v6889_v4 = vld [vmem:[%s10833_s3 + $0xe4] sm:$0xf] }
 0x18d   : > { %v1524_v12 = vrot.slane %v1522_v28, 1  ;;  %v1532_v38 = vrot.slane %v1530_v21, 1  ;;  %v1220_v40 = vadd.f32 %v7898_v51, %v1182_v6  ;;  %v1221_v30 = vadd.f32 %v7900_v5, %v1183_v13 }
 0x18e   : > { %v1534_v28 = vshrl.u32 %v8028_v50, 16  ;;  %2179 = vmatpush.bf16.msra.mxu3 %v6089_v27 }
 0x18f   : > { %v1525_v15 = vsel %vm1461_vm0, %v1520_v11, %v1524_v12  ;;  %v1533_v1 = vsel %vm1461_vm0, %v1528_v19, %v1532_v38  ;;  %v1252_v22 = vmax.f32 %v1220_v40, 0.0  ;;  %v1253_v23 = vmax.f32 %v1221_v30, 0.0  ;;  %v6891_v30 = vld [vmem:[%s10833_s3 + $0xf4] sm:$0xf] }
 0x190   : > { %1797 = vmatmul.bf16.gmra.mxu2 %v1525_v15  ;;  %1846 = vmatmul.bf16.gmra.mxu3 %v1533_v1  ;;  %v1536_v11 = vor.u32 %v1534_v28, %v1524_v12  ;;  %v1544_v19 = vor.u32 %v1542_v24, %v1532_v38  ;;  %v6875_v12 = vld [vmem:[%s10833_s3 + $0x74] sm:$0xf]  ;;  %v6026_v38 = vld [vmem:[%s10833_s3 + $0x78] sm:$0xf0]  ;;  %v6072_v28 = vld [vmem:[%s10833_s3 + $0xd0] sm:$0xf] }
 0x191   : > { %1895 = vmatmul.bf16.gmra.mxu0 %v1525_v15  ;;  %1944 = vmatmul.bf16.gmra.mxu1 %v1533_v1  ;;  %v6029_v40 = vor.u32 %v6875_v12, %v6026_v38  ;;  %v938_v27 = vpop.f32.mrf.mxu3  ;;  %v6888_v24 = vld [vmem:[%s10833_s3 + $0xd4] sm:$0xf0]  ;;  %v6870_v12 = vld [vmem:[%s10833_s3 + $0x44] sm:$0xf0] }
 0x192   : > { %v1100_v3 = vpop.f32.mrf.mxu0  ;;  %v1149_v54 = vpop.f32.mrf.mxu1 }
 0x193   : > { %v1184_v10 = vadd.f32 %v1100_v3, %v882_v26  ;;  %v1185_v45 = vadd.f32 %v1149_v54, %v931_v39  ;;  %v6090_v3 = vld [vmem:[%s10833_s3 + $0xf8] sm:$0xf0]  ;;  %v887_v54 = vadd.f32 %v886_v34, %v7733_v63  ;;  %2228 = vmatpush.bf16.msrb.mxu0 %v6029_v40  ;;  %v6008_v34 = vld [vmem:[%s10833_s3 + $0x50] sm:$0xf] }
 0x195   : > { %v1222_v32 = vadd.f32 %v7898_v51, %v1184_v10  ;;  %v1223_v33 = vadd.f32 %v7900_v5, %v1185_v45  ;;  %v936_v10 = vadd.f32 %v935_v25, %v7735_v0  ;;  %v6093_v45 = vor.u32 %v6891_v30, %v6090_v3  ;;  %v6890_v0 = vld [vmem:[%s10833_s3 + $0xe4] sm:$0xf0]  ;;  %v889_v25 = vpop.f32.mrf.mxu2  ;;  %v6064_v3 = vld [vmem:[%s10833_s3 + $0xc0] sm:$0xf] }
 0x197   : > { %v1254_v46 = vmax.f32 %v1222_v32, 0.0  ;;  %v1255_v41 = vmax.f32 %v1223_v33, 0.0  ;;  %v6016_v32 = vld [vmem:[%s10833_s3 + $0x60] sm:$0xf]  ;;  %v6874_v33 = vld [vmem:[%s10833_s3 + $0x64] sm:$0xf0]  ;;  %2277 = vmatpush.bf16.msrb.mxu1 %v6093_v45 }
 0x198   : > { %v6017_v63 = vor.u32 %v6874_v33, %v6016_v32  ;;  %v6869_v45 = vld [vmem:[%s10833_s3 + $0x44] sm:$0xf]  ;;  %v6002_v32 = vld [vmem:[%s10833_s3 + $0x48] sm:$0xf0] }
 0x199   : > { %v8060_v35 = vpack.c.bf16 %v1254_v46, %v1252_v22  ;;  %v8062_v20 = vpack.c.bf16 %v1255_v41, %v1253_v23  ;;  %v6080_v22 = vld [vmem:[%s10833_s3 + $0xe0] sm:$0xf]  ;;  %v6873_v41 = vld [vmem:[%s10833_s3 + $0x64] sm:$0xf] }
 0x19a   : > { %v1103_v18 = vpop.f32.mrf.mxu0  ;;  %v1152_v48 = vpop.f32.mrf.mxu1  ;;  %v6081_v43 = vor.u32 %v6890_v0, %v6080_v22  ;;  %v6021_v2 = vor.u32 %v6873_v41, %v6018_v42  ;;  %2131 = vmatpush.bf16.msra.mxu2 %v6017_v63  ;;  %v6885_v33 = vld [vmem:[%s10833_s3 + $0xc4] sm:$0xf]  ;;  %v890_v22 = vadd.f32 %v889_v25, %v7785_v57  ;;  %v6066_v0 = vld [vmem:[%s10833_s3 + $0xc8] sm:$0xf0] }
 0x19b   : > { %v1186_v21 = vadd.f32 %v1103_v18, %v885_v47  ;;  %v1187_v9 = vadd.f32 %v1152_v48, %v934_v7  ;;  %v1538_v31 = vshll.u32 %v8060_v35, 16  ;;  %v1546_v49 = vshll.u32 %v8062_v20, 16  ;;  %v6082_v7 = vld [vmem:[%s10833_s3 + $0xe8] sm:$0xf0]  ;;  %v6872_v48 = vld [vmem:[%s10833_s3 + $0x54] sm:$0xf0] }
 0x19c   : > { %v6085_v18 = vor.u32 %v6889_v4, %v6082_v7  ;;  %2180 = vmatpush.bf16.msra.mxu3 %v6081_v43  ;;  %2229 = vmatpush.bf16.msrb.mxu0 %v6021_v2  ;;  %v6005_v43 = vor.u32 %v6869_v45, %v6002_v32  ;;  %v939_v4 = vadd.f32 %v938_v27, %v7787_v59  ;;  %v6868_v27 = vld [vmem:[%s10833_s3 + $0x34] sm:$0xf0] }
 0x19d   : > { %v8069_v6 = vadd.f32 %v7898_v51, %v1186_v21  ;;  %v8072_v13 = vadd.f32 %v7900_v5, %v1187_v9  ;;  %v8074_v60 = vrot.slane %v1538_v31, 1  ;;  %v8076_v14 = vrot.slane %v1546_v49, 1 }
 0x19e   : > { %v6009_v31 = vor.u32 %v6872_v48, %v6008_v34  ;;  %v6073_v49 = vor.u32 %v6888_v24, %v6072_v28  ;;  %2278 = vmatpush.bf16.msrb.mxu1 %v6085_v18  ;;  %v891_v28 = vpop.f32.mrf.mxu2  ;;  %v940_v24 = vpop.f32.mrf.mxu3 }
 0x19f   : > { %v1541_v15 = vsel %vm1461_vm0, %v1536_v11, %v8074_v60  ;;  %v1549_v1 = vsel %vm1461_vm0, %v1544_v19, %v8076_v14  ;;  %v1256_v26 = vmax.f32 %v8069_v6, 0.0  ;;  %v1257_v39 = vmax.f32 %v8072_v13, 0.0  ;;  %v6871_v11 = vld [vmem:[%s10833_s3 + $0x54] sm:$0xf]  ;;  %v6010_v19 = vld [vmem:[%s10833_s3 + $0x58] sm:$0xf0] }
 0x1a0   : > { %1802 = vmatmul.bf16.gmra.mxu2 %v1541_v15  ;;  %1851 = vmatmul.bf16.gmra.mxu3 %v1549_v1  ;;  %v6887_v6 = vld [vmem:[%s10833_s3 + $0xd4] sm:$0xf]  ;;  %v6013_v13 = vor.u32 %v6871_v11, %v6010_v19  ;;  %v6884_v11 = vld [vmem:[%s10833_s3 + $0xb4] sm:$0xf0] }
 0x1a1   : > { %1900 = vmatmul.bf16.gmra.mxu0 %v1541_v15  ;;  %1949 = vmatmul.bf16.gmra.mxu1 %v1549_v1  ;;  %v6074_v15 = vld [vmem:[%s10833_s3 + $0xd8] sm:$0xf0]  ;;  %v6000_v1 = vld [vmem:[%s10833_s3 + $0x40] sm:$0xf]  ;;  %v6867_v19 = vld [vmem:[%s10833_s3 + $0x34] sm:$0xf] }
 0x1a2   : > { %v1105_v23 = vpop.f32.mrf.mxu0  ;;  %v1154_v46 = vpop.f32.mrf.mxu1  ;;  %v6077_v30 = vor.u32 %v6887_v6, %v6074_v15  ;;  %2132 = vmatpush.bf16.msra.mxu2 %v6009_v31  ;;  %2181 = vmatpush.bf16.msra.mxu3 %v6073_v49  ;;  %v6056_v49 = vld [vmem:[%s10833_s3 + $0xb0] sm:$0xf]  ;;  %v892_v6 = vadd.f32 %v891_v28, %v7841_v52 }
 0x1a3   : > { %v1188_v55 = vadd.f32 %v1105_v23, %v887_v54  ;;  %v1189_v47 = vadd.f32 %v1154_v46, %v936_v10  ;;  %v6886_v54 = vld [vmem:[%s10833_s3 + $0xc4] sm:$0xf0]  ;;  %v6001_v10 = vor.u32 %v6870_v12, %v6000_v1  ;;  %2230 = vmatpush.bf16.msrb.mxu0 %v6013_v13  ;;  %v941_v13 = vadd.f32 %v940_v24, %v7843_v53  ;;  %v5994_v1 = vld [vmem:[%s10833_s3 + $0x38] sm:$0xf0]  ;;  %v6883_v12 = vld [vmem:[%s10833_s3 + $0xb4] sm:$0xf] }
 0x1a4   : > { %v6065_v63 = vor.u32 %v6886_v54, %v6064_v3  ;;  %2279 = vmatpush.bf16.msrb.mxu1 %v6077_v30  ;;  %v6057_v15 = vor.u32 %v6884_v11, %v6056_v49  ;;  %v5997_v52 = vor.u32 %v6867_v19, %v5994_v1  ;;  %v5984_v3 = vld [vmem:[%s10833_s3 + $0x20] sm:$0xf]  ;;  %v6866_v54 = vld [vmem:[%s10833_s3 + $0x24] sm:$0xf0]  ;;  %v6879_v24 = vld [vmem:[%s10833_s3 + $0x94] sm:$0xf] }
 0x1a5   : > { %v1226_v21 = vadd.f32 %v7898_v51, %v1188_v55  ;;  %v1227_v9 = vadd.f32 %v7900_v5, %v1189_v47  ;;  %v1550_v55 = vshrl.u32 %v8060_v35, 16  ;;  %v1558_v47 = vshrl.u32 %v8062_v20, 16 }
 0x1a6   : > { %2133 = vmatpush.bf16.msra.mxu2 %v6001_v10  ;;  %2182 = vmatpush.bf16.msra.mxu3 %v6065_v63  ;;  %v6048_v10 = vld [vmem:[%s10833_s3 + $0xa0] sm:$0xf]  ;;  %v6882_v63 = vld [vmem:[%s10833_s3 + $0xa4] sm:$0xf0] }
 0x1a7   : > { %v1258_v38 = vmax.f32 %v1226_v21, 0.0  ;;  %v1259_v40 = vmax.f32 %v1227_v9, 0.0  ;;  %v1552_v7 = vor.u32 %v1550_v55, %v8074_v60  ;;  %v1560_v18 = vor.u32 %v1558_v47, %v8076_v14  ;;  %2231 = vmatpush.bf16.msrb.mxu0 %v6005_v43  ;;  %v5992_v14 = vld [vmem:[%s10833_s3 + $0x30] sm:$0xf]  ;;  %v6881_v47 = vld [vmem:[%s10833_s3 + $0xa4] sm:$0xf] }
 0x1a8   : > { %v5993_v31 = vor.u32 %v6868_v27, %v5992_v14  ;;  %v6050_v43 = vld [vmem:[%s10833_s3 + $0xa8] sm:$0xf0]  ;;  %v6042_v27 = vld [vmem:[%s10833_s3 + $0x98] sm:$0xf0] }
 0x1a9   : > { %v8170_v23 = vpack.c.bf16 %v1258_v38, %v1256_v26  ;;  %v8172_v46 = vpack.c.bf16 %v1259_v40, %v1257_v39  ;;  %v6069_v39 = vor.u32 %v6885_v33, %v6066_v0  ;;  %v6058_v38 = vld [vmem:[%s10833_s3 + $0xb8] sm:$0xf0]  ;;  %v6865_v0 = vld [vmem:[%s10833_s3 + $0x24] sm:$0xf]  ;;  %v6045_v49 = vor.u32 %v6879_v24, %v6042_v27  ;;  %v1296_v24 = vld [vmem:[#allocation3] sm:$0xff] }
 0x1aa   : > { %v1108_v41 = vpop.f32.mrf.mxu0  ;;  %v1157_v42 = vpop.f32.mrf.mxu1  ;;  %2134 = vmatpush.bf16.msra.mxu2 %v5993_v31  ;;  %v6061_v53 = vor.u32 %v6883_v12, %v6058_v38  ;;  %2183 = vmatpush.bf16.msra.mxu3 %v6057_v15  ;;  %v5968_v12 = vld [vmem:[%s10833_s3] sm:$0xf] }
 0x1ab   : > { %v1190_v2 = vadd.f32 %v1108_v41, %v890_v22  ;;  %v1554_v57 = vshll.u32 %v8170_v23, 16  ;;  %v1562_v26 = vshll.u32 %v8172_v46, 16  ;;  %v1191_v9 = vadd.f32 %v1157_v42, %v939_v4  ;;  %2280 = vmatpush.bf16.msrb.mxu1 %v6069_v39  ;;  %v5986_v41 = vld [vmem:[%s10833_s3 + $0x28] sm:$0xf0]  ;;  %2232 = vmatpush.bf16.msrb.mxu0 %v5997_v52  ;;  %v6864_v4 = vld [vmem:[%s10833_s3 + $0x14] sm:$0xf0] }
 0x1ac   : > { %v5985_v22 = vor.u32 %v6866_v54, %v5984_v3  ;;  %v6049_v42 = vor.u32 %v6882_v63, %v6048_v10  ;;  %v5989_v55 = vor.u32 %v6865_v0, %v5986_v41  ;;  %v6053_v39 = vor.u32 %v6881_v47, %v6050_v43  ;;  %v6032_v38 = vld [vmem:[%s10833_s3 + $0x80] sm:$0xf]  ;;  %v5970_v54 = vld [vmem:[%s10833_s3 + $0x8] sm:$0xf0]  ;;  %v1408_v63 = vld [vmem:[#allocation3 + $0xa0] sm:$0x1] }
 0x1ad   : > { %v8184_v34 = vadd.f32 %v7898_v51, %v1190_v2  ;;  %v8186_v25 = vrot.slane %v1554_v57, 1  ;;  %v8189_v48 = vrot.slane %v1562_v26, 1  ;;  %v1229_v45 = vadd.f32 %v7900_v5, %v1191_v9  ;;  %v5976_v2 = vld [vmem:[%s10833_s3 + $0x10] sm:$0xf]  ;;  %v1409_v0 = vld [vmem:[#allocation3 + $0xc0] sm:$0x1] }
 0x1ae   : > { %2135 = vmatpush.bf16.msra.mxu2 %v5985_v22  ;;  %v5977_v28 = vor.u32 %v6864_v4, %v5976_v2  ;;  %2184 = vmatpush.bf16.msra.mxu3 %v6049_v42  ;;  %v1574_v15 = vshrl.u32 %v8172_v46, 16  ;;  %v1459_v42 = vpack.c.bf16 %v1408_v63, %v1408_v63 }
 0x1af   : > { %v1260_v21 = vmax.f32 %v8184_v34, 0.0  ;;  %v1557_v59 = vsel %vm1461_vm0, %v1552_v7, %v8186_v25  ;;  %v1565_v60 = vsel %vm1461_vm0, %v1560_v18, %v8189_v48  ;;  %2281 = vmatpush.bf16.msrb.mxu1 %v6061_v53  ;;  %v6040_v7 = vld [vmem:[%s10833_s3 + $0x90] sm:$0xf]  ;;  %v6880_v18 = vld [vmem:[%s10833_s3 + $0x94] sm:$0xf0]  ;;  %v1261_v9 = vmax.f32 %v1229_v45, 0.0  ;;  %2233 = vmatpush.bf16.msrb.mxu0 %v5989_v55 }
 0x1b0   : > { %1807 = vmatmul.bf16.gmra.mxu2 %v1557_v59  ;;  %1856 = vmatmul.bf16.gmra.mxu3 %v1565_v60  ;;  %v6041_v14 = vor.u32 %v6880_v18, %v6040_v7  ;;  %v1576_v52 = vor.u32 %v1574_v15, %v8189_v48  ;;  %v6034_v48 = vld [vmem:[%s10833_s3 + $0x88] sm:$0xf0]  ;;  %v1460_v55 = vpack.c.bf16 %v1409_v0, %v1409_v0  ;;  %v1586_v47 = vshll.u32 %v1459_v42, 16 }
 0x1b1   : > { %1905 = vmatmul.bf16.gmra.mxu0 %v1557_v59  ;;  %1954 = vmatmul.bf16.gmra.mxu1 %v1565_v60 }
 0x1b2   : > { %v1110_v40 = vpop.f32.mrf.mxu0  ;;  %v1159_v30 = vpop.f32.mrf.mxu1  ;;  %2136 = vmatpush.bf16.msra.mxu2 %v5977_v28  ;;  %2185 = vmatpush.bf16.msra.mxu3 %v6041_v14  ;;  %v1594_v43 = vshll.u32 %v1460_v55, 16 }
 0x1b3   : > { %v1192_v32 = vadd.f32 %v1110_v40, %v892_v6  ;;  %v1193_v33 = vadd.f32 %v1159_v30, %v941_v13  ;;  %2282 = vmatpush.bf16.msrb.mxu1 %v6053_v39  ;;  %v1566_v6 = vshrl.u32 %v8170_v23, 16  ;;  %v6878_v40 = vld [vmem:[%s10833_s3 + $0x84] sm:$0xf0]  ;;  %v1588_v39 = vrot.slane %v1586_v47, 1 }
 0x1b4   : > { %v6033_v10 = vor.u32 %v6878_v40, %v6032_v38  ;;  %v1596_v7 = vrot.slane %v1594_v43, 1  ;;  %v1302_v38 = vld [vmem:[#allocation3 + $0x70] sm:$0xff]  ;;  %v1303_v40 = vld [vmem:[#allocation3 + $0x78] sm:$0xff] }
 0x1b5   : > { %v1230_v57 = vadd.f32 %v7898_v51, %v1192_v32  ;;  %v1231_v26 = vadd.f32 %v7900_v5, %v1193_v33  ;;  %v6863_v51 = vld [vmem:[%s10833_s3 + $0x14] sm:$0xf]  ;;  %v5978_v5 = vld [vmem:[%s10833_s3 + $0x18] sm:$0xf0]  ;;  %v1568_v34 = vor.u32 %v1566_v6, %v8186_v25  ;;  %v6861_v25 = vld [vmem:[%s10833_s3 + $0x4] sm:$0xf] }
 0x1b6   : > { %v5981_v31 = vor.u32 %v6863_v51, %v5978_v5  ;;  %v5973_v45 = vor.u32 %v6861_v25, %v5970_v54  ;;  %v6877_v32 = vld [vmem:[%s10833_s3 + $0x84] sm:$0xf]  ;;  %2186 = vmatpush.bf16.msra.mxu3 %v6033_v10 }
 0x1b7   : > { %v1262_v59 = vmax.f32 %v1230_v57, 0.0  ;;  %v1263_v60 = vmax.f32 %v1231_v26, 0.0  ;;  %2283 = vmatpush.bf16.msrb.mxu1 %v6045_v49  ;;  %v6037_v41 = vor.u32 %v6877_v32, %v6034_v48  ;;  %v1298_v51 = vld [vmem:[#allocation3 + $0xf8] sm:$0xff] }
 0x1b8   : > { %2234 = vmatpush.bf16.msrb.mxu0 %v5981_v31  ;;  %v1299_v5 = vld [vmem:[#allocation3 + $0x58] sm:$0xff]  ;;  %v1360_v14 = vpack.c.bf16 %v1298_v51, %v1296_v24 }
 0x1b9   : > { %v8275_v11 = vpack.c.bf16 %v1262_v59, %v1260_v21  ;;  %v8277_v19 = vpack.c.bf16 %v1263_v60, %v1261_v9  ;;  %v6862_v21 = vld [vmem:[%s10833_s3 + $0x4] sm:$0xf0]  ;;  %v1297_v9 = vld [vmem:[#allocation3 + $0x38] sm:$0xff] }
 0x1ba   : > { %v5969_v3 = vor.u32 %v6862_v21, %v5968_v12  ;;  %v1361_v27 = vpack.c.bf16 %v1299_v5, %v1297_v9 }
 0x1bb   : > { %v1570_v13 = vshll.u32 %v8275_v11, 16  ;;  %v1578_v1 = vshll.u32 %v8277_v19, 16  ;;  %2284 = vmatpush.bf16.msrb.mxu1 %v6037_v41  ;;  %v1582_v2 = vshrl.u32 %v8275_v11, 16  ;;  %v1590_v57 = vshrl.u32 %v8277_v19, 16 }
 0x1bc   : > { %2137 = vmatpush.bf16.msra.mxu2 %v5969_v3  ;;  %2235 = vmatpush.bf16.msrb.mxu0 %v5973_v45 }
 0x1bd   : > { %v1572_v30 = vrot.slane %v1570_v13, 1  ;;  %v1580_v53 = vrot.slane %v1578_v1, 1 }
 0x1bf   : > { %v1573_v33 = vsel %vm1461_vm0, %v1568_v34, %v1572_v30  ;;  %v1581_v22 = vsel %vm1461_vm0, %v1576_v52, %v1580_v53  ;;  %v1584_v26 = vor.u32 %v1582_v2, %v1572_v30  ;;  %v1592_v4 = vor.u32 %v1590_v57, %v1580_v53  ;;  %v1300_v52 = vld [vmem:[#allocation3 + $0x20] sm:$0xff]  ;;  %v1301_v53 = vld [vmem:[#allocation3 + $0x8] sm:$0xff] }
 0x1c0   : > { %1812 = vmatmul.bf16.gmra.mxu2 %v1573_v33  ;;  %1861 = vmatmul.bf16.gmra.mxu3 %v1581_v22  ;;  %v1362_v54 = vpack.c.bf16 %v1302_v38, %v1300_v52  ;;  %v1363_v10 = vpack.c.bf16 %v1303_v40, %v1301_v53  ;;  %v6184_v53 = vld [vmem:[%s10833_s3 + $0x270] sm:$0xf] }
 0x1c1   : > { %1910 = vmatmul.bf16.gmra.mxu0 %v1573_v33  ;;  %1959 = vmatmul.bf16.gmra.mxu1 %v1581_v22  ;;  %v1589_v18 = vsel %vm1461_vm0, %v1584_v26, %v1588_v39  ;;  %v1597_v28 = vsel %vm1461_vm0, %v1592_v4, %v1596_v7 }
 0x1d0   : > { %1817 = vmatmul.bf16.gmra.mxu2 %v1589_v18  ;;  %1866 = vmatmul.bf16.gmra.mxu3 %v1597_v28 }
 0x1d1   : > { %1915 = vmatmul.bf16.gmra.mxu0 %v1589_v18  ;;  %1964 = vmatmul.bf16.gmra.mxu1 %v1597_v28 }
 0x1de   : > { %v1881_v59 = vpop.f32.mrf.mxu0  ;;  %v1930_v60 = vpop.f32.mrf.mxu1 }
 0x1df   : > { %v8315_v31 = vadd.f32 %v1930_v60, %v1881_v59 }
 0x1e0   : > { %2138 = vmatmul.bf16.vlgmr.msra.gmra.mxu2 %v1360_v14  ;;  %2187 = vmatmul.bf16.vlgmr.msra.gmra.mxu3 %v1361_v27 }
 0x1e1   : > { %2236 = vmatmul.bf16.vlgmr.msrb.gmra.mxu0 %v1360_v14  ;;  %2285 = vmatmul.bf16.vlgmr.msrb.gmra.mxu1 %v1361_v27 }
 0x1e3   : > { %v1783_v49 = vpop.f32.mrf.mxu2  ;;  %v1832_v6 = vpop.f32.mrf.mxu3 }
 0x1e4   : > { %v8317_v13 = vadd.f32 %v1832_v6, %v1783_v49 }
 0x1e6   : > { %v1883_v15 = vpop.f32.mrf.mxu0  ;;  %v1932_v1 = vpop.f32.mrf.mxu1 }
 0x1e7   : > { %v8319_v12 = vadd.f32 %v1932_v1, %v1883_v15 }
 0x1eb   : > { %v1785_v34 = vpop.f32.mrf.mxu2  ;;  %v1834_v21 = vpop.f32.mrf.mxu3 }
 0x1ec   : > { %v8321_v30 = vadd.f32 %v1834_v21, %v1785_v34 }
 0x1ee   : > { %v1886_v3 = vpop.f32.mrf.mxu0  ;;  %v1935_v25 = vpop.f32.mrf.mxu1 }
 0x1ef   : > { %v8323_v45 = vadd.f32 %v1935_v25, %v1886_v3  ;;  %v6940_v3 = vld [vmem:[%s10833_s3 + $0x274] sm:$0xf0]  ;;  %v6248_v25 = vld [vmem:[%s10833_s3 + $0x2f0] sm:$0xf] }
 0x1f0   : > { %2143 = vmatmul.bf16.gmra.mxu2 %v1362_v54  ;;  %2192 = vmatmul.bf16.gmra.mxu3 %v1363_v10 }
 0x1f1   : > { %2241 = vmatmul.bf16.gmra.mxu0 %v1362_v54  ;;  %2290 = vmatmul.bf16.gmra.mxu1 %v1363_v10  ;;  %v6185_v54 = vor.u32 %v6940_v3, %v6184_v53  ;;  %v6956_v10 = vld [vmem:[%s10833_s3 + $0x2f4] sm:$0xf0]  ;;  %v6168_v3 = vld [vmem:[%s10833_s3 + $0x250] sm:$0xf] }
 0x1f3   : > { %v1788_v32 = vpop.f32.mrf.mxu2  ;;  %v1837_v48 = vpop.f32.mrf.mxu3  ;;  %2596 = vmatpush.bf16.msrb.mxu2 %v6185_v54  ;;  %v6232_v54 = vld [vmem:[%s10833_s3 + $0x2d0] sm:$0xf] }
 0x1f4   : > { %v8325_v33 = vadd.f32 %v1837_v48, %v1788_v32  ;;  %v6939_v32 = vld [vmem:[%s10833_s3 + $0x274] sm:$0xf]  ;;  %v6186_v48 = vld [vmem:[%s10833_s3 + $0x278] sm:$0xf0] }
 0x1f6   : > { %v1888_v22 = vpop.f32.mrf.mxu0  ;;  %v1937_v63 = vpop.f32.mrf.mxu1 }
 0x1f7   : > { %v8327_v0 = vadd.f32 %v1937_v63, %v1888_v22  ;;  %v6249_v22 = vor.u32 %v6956_v10, %v6248_v25  ;;  %v6189_v63 = vor.u32 %v6939_v32, %v6186_v48  ;;  %v6936_v25 = vld [vmem:[%s10833_s3 + $0x254] sm:$0xf0]  ;;  %v6935_v48 = vld [vmem:[%s10833_s3 + $0x254] sm:$0xf] }
 0x1f8   : > { %v6169_v10 = vor.u32 %v6936_v25, %v6168_v3  ;;  %v6952_v32 = vld [vmem:[%s10833_s3 + $0x2d4] sm:$0xf0] }
 0x1f9   : > { %2645 = vmatpush.bf16.msrb.mxu3 %v6249_v22  ;;  %2694 = vmatpush.bf16.msra.mxu0 %v6189_v63  ;;  %v6170_v22 = vld [vmem:[%s10833_s3 + $0x258] sm:$0xf0]  ;;  %v6233_v63 = vor.u32 %v6952_v32, %v6232_v54  ;;  %v6932_v32 = vld [vmem:[%s10833_s3 + $0x234] sm:$0xf0] }
 0x1fb   : > { %v1790_v41 = vpop.f32.mrf.mxu2  ;;  %v1839_v42 = vpop.f32.mrf.mxu3 }
 0x1fc   : > { %v8329_v55 = vadd.f32 %v1839_v42, %v1790_v41  ;;  %v6955_v41 = vld [vmem:[%s10833_s3 + $0x2f4] sm:$0xf]  ;;  %v6250_v42 = vld [vmem:[%s10833_s3 + $0x2f8] sm:$0xf0] }
 0x1fe   : > { %v1891_v47 = vpop.f32.mrf.mxu0  ;;  %v1940_v43 = vpop.f32.mrf.mxu1 }
 0x1ff   : > { %v8331_v2 = vadd.f32 %v1940_v43, %v1891_v47  ;;  %v6253_v47 = vor.u32 %v6955_v41, %v6250_v42  ;;  %v6173_v41 = vor.u32 %v6935_v48, %v6170_v22  ;;  %v6951_v42 = vld [vmem:[%s10833_s3 + $0x2d4] sm:$0xf]  ;;  %v6216_v48 = vld [vmem:[%s10833_s3 + $0x2b0] sm:$0xf] }
 0x200   : > { %2148 = vmatmul.bf16.gmra.mxu2 %v7990_v8  ;;  %2197 = vmatmul.bf16.gmra.mxu3 %v7992_v29 }
 0x201   : > { %2246 = vmatmul.bf16.gmra.mxu0 %v7990_v8  ;;  %2295 = vmatmul.bf16.gmra.mxu1 %v7992_v29 }
 0x202   : > { %2743 = vmatpush.bf16.msra.mxu1 %v6253_v47  ;;  %v6234_v47 = vld [vmem:[%s10833_s3 + $0x2d8] sm:$0xf0] }
 0x203   : > { %v1793_v57 = vpop.f32.mrf.mxu2  ;;  %v1842_v26 = vpop.f32.mrf.mxu3 }
 0x204   : > { %v8337_v39 = vadd.f32 %v1842_v26, %v1793_v57  ;;  %v6176_v26 = vld [vmem:[%s10833_s3 + $0x260] sm:$0xf] }
 0x206   : > { %v1893_v4 = vpop.f32.mrf.mxu0  ;;  %v1942_v7 = vpop.f32.mrf.mxu1 }
 0x207   : > { %v8339_v18 = vadd.f32 %v1942_v7, %v1893_v4  ;;  %v6938_v4 = vld [vmem:[%s10833_s3 + $0x264] sm:$0xf0]  ;;  %v6240_v7 = vld [vmem:[%s10833_s3 + $0x2e0] sm:$0xf] }
 0x20b   : > { %v1795_v28 = vpop.f32.mrf.mxu2  ;;  %v1844_v51 = vpop.f32.mrf.mxu3 }
 0x20c   : > { %v8341_v5 = vadd.f32 %v1844_v51, %v1795_v28  ;;  %v6177_v51 = vor.u32 %v6938_v4, %v6176_v26  ;;  %v6160_v4 = vld [vmem:[%s10833_s3 + $0x240] sm:$0xf] }
 0x20e   : > { %v1896_v24 = vpop.f32.mrf.mxu0  ;;  %v1945_v9 = vpop.f32.mrf.mxu1  ;;  %2597 = vmatpush.bf16.msrb.mxu2 %v6177_v51  ;;  %v6224_v51 = vld [vmem:[%s10833_s3 + $0x2c0] sm:$0xf] }
 0x20f   : > { %v8343_v59 = vadd.f32 %v1945_v9, %v1896_v24  ;;  %v6954_v24 = vld [vmem:[%s10833_s3 + $0x2e4] sm:$0xf0]  ;;  %v6937_v9 = vld [vmem:[%s10833_s3 + $0x264] sm:$0xf] }
 0x210   : > { %2153 = vmatmul.bf16.gmra.mxu2 %v8010_v44  ;;  %2202 = vmatmul.bf16.gmra.mxu3 %v8012_v56 }
 0x211   : > { %2251 = vmatmul.bf16.gmra.mxu0 %v8010_v44  ;;  %2300 = vmatmul.bf16.gmra.mxu1 %v8012_v56 }
 0x212   : > { %2598 = vmatpush.bf16.msrb.mxu2 %v6169_v10  ;;  %v6152_v10 = vld [vmem:[%s10833_s3 + $0x230] sm:$0xf] }
 0x213   : > { %v1798_v60 = vpop.f32.mrf.mxu2  ;;  %v1847_v14 = vpop.f32.mrf.mxu3  ;;  %v6153_v22 = vor.u32 %v6932_v32, %v6152_v10  ;;  %v6210_v10 = vld [vmem:[%s10833_s3 + $0x2a8] sm:$0xf0] }
 0x214   : > { %v8349_v27 = vadd.f32 %v1847_v14, %v1798_v60  ;;  %v6178_v60 = vld [vmem:[%s10833_s3 + $0x268] sm:$0xf0]  ;;  %v6241_v14 = vor.u32 %v6954_v24, %v6240_v7  ;;  %v6934_v7 = vld [vmem:[%s10833_s3 + $0x244] sm:$0xf0] }
 0x216   : > { %v1898_v49 = vpop.f32.mrf.mxu0  ;;  %v1947_v6 = vpop.f32.mrf.mxu1  ;;  %2646 = vmatpush.bf16.msrb.mxu3 %v6241_v14  ;;  %v6933_v14 = vld [vmem:[%s10833_s3 + $0x244] sm:$0xf] }
 0x217   : > { %v8351_v15 = vadd.f32 %v1947_v6, %v1898_v49  ;;  %v6181_v49 = vor.u32 %v6937_v9, %v6178_v60  ;;  %v6953_v6 = vld [vmem:[%s10833_s3 + $0x2e4] sm:$0xf]  ;;  %v6161_v9 = vor.u32 %v6934_v7, %v6160_v4  ;;  %v6950_v60 = vld [vmem:[%s10833_s3 + $0x2c4] sm:$0xf0] }
 0x219   : > { %2695 = vmatpush.bf16.msra.mxu0 %v6181_v49  ;;  %v6162_v49 = vld [vmem:[%s10833_s3 + $0x248] sm:$0xf0]  ;;  %2599 = vmatpush.bf16.msrb.mxu2 %v6161_v9  ;;  %v6144_v9 = vld [vmem:[%s10833_s3 + $0x220] sm:$0xf] }
 0x21a   : > { %2647 = vmatpush.bf16.msrb.mxu3 %v6233_v63  ;;  %v6948_v63 = vld [vmem:[%s10833_s3 + $0x2b4] sm:$0xf0] }
 0x21b   : > { %v1800_v1 = vpop.f32.mrf.mxu2  ;;  %v1849_v34 = vpop.f32.mrf.mxu3 }
 0x21c   : > { %v8353_v21 = vadd.f32 %v1849_v34, %v1800_v1  ;;  %v6242_v1 = vld [vmem:[%s10833_s3 + $0x2e8] sm:$0xf0] }
 0x21d   : > { %2696 = vmatpush.bf16.msra.mxu0 %v6173_v41  ;;  %v6931_v41 = vld [vmem:[%s10833_s3 + $0x234] sm:$0xf]  ;;  %2600 = vmatpush.bf16.msrb.mxu2 %v6153_v22 }
 0x21e   : > { %v1901_v38 = vpop.f32.mrf.mxu0  ;;  %v1950_v40 = vpop.f32.mrf.mxu1 }
 0x21f   : > { %v8355_v52 = vadd.f32 %v1950_v40, %v1901_v38  ;;  %v6245_v40 = vor.u32 %v6953_v6, %v6242_v1  ;;  %v6225_v6 = vor.u32 %v6950_v60, %v6224_v51  ;;  %v6165_v1 = vor.u32 %v6933_v14, %v6162_v49  ;;  %v6930_v60 = vld [vmem:[%s10833_s3 + $0x224] sm:$0xf0]  ;;  %v6208_v14 = vld [vmem:[%s10833_s3 + $0x2a0] sm:$0xf] }
 0x220   : > { %2158 = vmatmul.bf16.gmra.mxu2 %v8028_v50  ;;  %2207 = vmatmul.bf16.gmra.mxu3 %v8030_v17 }
 0x221   : > { %2256 = vmatmul.bf16.gmra.mxu0 %v8028_v50  ;;  %2305 = vmatmul.bf16.gmra.mxu1 %v8030_v17 }
 0x222   : > { %2744 = vmatpush.bf16.msra.mxu1 %v6245_v40  ;;  %2648 = vmatpush.bf16.msrb.mxu3 %v6225_v6  ;;  %v6145_v6 = vor.u32 %v6930_v60, %v6144_v9  ;;  %v6943_v9 = vld [vmem:[%s10833_s3 + $0x294] sm:$0xf]  ;;  %v6202_v60 = vld [vmem:[%s10833_s3 + $0x298] sm:$0xf0] }
 0x223   : > { %v1803_v43 = vpop.f32.mrf.mxu2  ;;  %v1852_v57 = vpop.f32.mrf.mxu3  ;;  %2697 = vmatpush.bf16.msra.mxu0 %v6165_v1  ;;  %v6946_v1 = vld [vmem:[%s10833_s3 + $0x2a4] sm:$0xf0] }
 0x224   : > { %v8394_v28 = vadd.f32 %v1852_v57, %v1803_v43  ;;  %v6237_v43 = vor.u32 %v6951_v42, %v6234_v47  ;;  %v6154_v42 = vld [vmem:[%s10833_s3 + $0x238] sm:$0xf0]  ;;  %v6217_v47 = vor.u32 %v6948_v63, %v6216_v48  ;;  %2601 = vmatpush.bf16.msrb.mxu2 %v6145_v6 }
 0x226   : > { %v1903_v34 = vpop.f32.mrf.mxu0  ;;  %v1952_v38 = vpop.f32.mrf.mxu1  ;;  %2745 = vmatpush.bf16.msra.mxu1 %v6237_v43  ;;  %v6157_v43 = vor.u32 %v6931_v41, %v6154_v42  ;;  %2649 = vmatpush.bf16.msrb.mxu3 %v6217_v47  ;;  %v6136_v41 = vld [vmem:[%s10833_s3 + $0x210] sm:$0xf]  ;;  %v6928_v42 = vld [vmem:[%s10833_s3 + $0x214] sm:$0xf0] }
 0x227   : > { %v8411_v53 = vadd.f32 %v1952_v38, %v1903_v34  ;;  %v6949_v34 = vld [vmem:[%s10833_s3 + $0x2c4] sm:$0xf]  ;;  %v6226_v38 = vld [vmem:[%s10833_s3 + $0x2c8] sm:$0xf0]  ;;  %v6200_v47 = vld [vmem:[%s10833_s3 + $0x290] sm:$0xf] }
 0x228   : > { %v6229_v25 = vor.u32 %v6949_v34, %v6226_v38  ;;  %2698 = vmatpush.bf16.msra.mxu0 %v6157_v43  ;;  %v6929_v34 = vld [vmem:[%s10833_s3 + $0x224] sm:$0xf]  ;;  %v6146_v38 = vld [vmem:[%s10833_s3 + $0x228] sm:$0xf0]  ;;  %v6137_v43 = vor.u32 %v6928_v42, %v6136_v41 }
 0x229   : > { %v6941_v42 = vld [vmem:[%s10833_s3 + $0x284] sm:$0xf] }
 0x22a   : > { %2746 = vmatpush.bf16.msra.mxu1 %v6229_v25  ;;  %v6945_v25 = vld [vmem:[%s10833_s3 + $0x2a4] sm:$0xf]  ;;  %2602 = vmatpush.bf16.msrb.mxu2 %v6137_v43 }
 0x22b   : > { %v1805_v57 = vpop.f32.mrf.mxu2  ;;  %v1854_v26 = vpop.f32.mrf.mxu3  ;;  %v6213_v22 = vor.u32 %v6945_v25, %v6210_v10  ;;  %v6942_v10 = vld [vmem:[%s10833_s3 + $0x284] sm:$0xf0] }
 0x22c   : > { %v8446_v24 = vadd.f32 %v1854_v26, %v1805_v57  ;;  %v6947_v57 = vld [vmem:[%s10833_s3 + $0x2b4] sm:$0xf]  ;;  %v6218_v26 = vld [vmem:[%s10833_s3 + $0x2b8] sm:$0xf0] }
 0x22d   : > { %v6221_v4 = vor.u32 %v6947_v57, %v6218_v26  ;;  %v6944_v57 = vld [vmem:[%s10833_s3 + $0x294] sm:$0xf0]  ;;  %v6927_v26 = vld [vmem:[%s10833_s3 + $0x214] sm:$0xf] }
 0x22e   : > { %v1906_v40 = vpop.f32.mrf.mxu0  ;;  %v1955_v3 = vpop.f32.mrf.mxu1 }
 0x22f   : > { %v8463_v54 = vadd.f32 %v1955_v3, %v1906_v40  ;;  %v6209_v40 = vor.u32 %v6946_v1, %v6208_v14  ;;  %v6149_v3 = vor.u32 %v6929_v34, %v6146_v38  ;;  %2747 = vmatpush.bf16.msra.mxu1 %v6221_v4  ;;  %v6138_v4 = vld [vmem:[%s10833_s3 + $0x218] sm:$0xf0]  ;;  %v6205_v14 = vor.u32 %v6943_v9, %v6202_v60  ;;  %v6128_v34 = vld [vmem:[%s10833_s3 + $0x200] sm:$0xf]  ;;  %v6926_v38 = vld [vmem:[%s10833_s3 + $0x204] sm:$0xf0] }
 0x230   : > { %2163 = vmatmul.bf16.gmra.mxu2 %v8060_v35  ;;  %2212 = vmatmul.bf16.gmra.mxu3 %v8062_v20  ;;  %v6129_v25 = vor.u32 %v6926_v38, %v6128_v34 }
 0x231   : > { %2261 = vmatmul.bf16.gmra.mxu0 %v8060_v35  ;;  %2310 = vmatmul.bf16.gmra.mxu1 %v8062_v20 }
 0x232   : > { %2650 = vmatpush.bf16.msrb.mxu3 %v6209_v40  ;;  %2699 = vmatpush.bf16.msra.mxu0 %v6149_v3  ;;  %v6192_v40 = vld [vmem:[%s10833_s3 + $0x280] sm:$0xf] }
 0x233   : > { %v1808_v7 = vpop.f32.mrf.mxu2  ;;  %v1857_v51 = vpop.f32.mrf.mxu3  ;;  %2748 = vmatpush.bf16.msra.mxu1 %v6213_v22  ;;  %v6193_v22 = vor.u32 %v6942_v10, %v6192_v40  ;;  %2603 = vmatpush.bf16.msrb.mxu2 %v6129_v25 }
 0x234   : > { %v8502_v49 = vadd.f32 %v1857_v51, %v1808_v7  ;;  %v6201_v7 = vor.u32 %v6944_v57, %v6200_v47  ;;  %v6141_v51 = vor.u32 %v6927_v26, %v6138_v4  ;;  %v6194_v47 = vld [vmem:[%s10833_s3 + $0x288] sm:$0xf0] }
 0x235   : > { %v6197_v26 = vor.u32 %v6941_v42, %v6194_v47 }
 0x236   : > { %v1908_v32 = vpop.f32.mrf.mxu0  ;;  %v1957_v48 = vpop.f32.mrf.mxu1  ;;  %2651 = vmatpush.bf16.msrb.mxu3 %v6201_v7  ;;  %2700 = vmatpush.bf16.msra.mxu0 %v6141_v51 }
 0x237   : > { %v8519_v63 = vadd.f32 %v1957_v48, %v1908_v32  ;;  %v6925_v32 = vld [vmem:[%s10833_s3 + $0x204] sm:$0xf]  ;;  %v6130_v48 = vld [vmem:[%s10833_s3 + $0x208] sm:$0xf0]  ;;  %2749 = vmatpush.bf16.msra.mxu1 %v6205_v14 }
 0x238   : > { %v6133_v41 = vor.u32 %v6925_v32, %v6130_v48 }
 0x23a   : > { %2652 = vmatpush.bf16.msrb.mxu3 %v6193_v22  ;;  %2701 = vmatpush.bf16.msra.mxu0 %v6133_v41 }
 0x23b   : > { %v1810_v6 = vpop.f32.mrf.mxu2  ;;  %v1859_v1 = vpop.f32.mrf.mxu3  ;;  %2750 = vmatpush.bf16.msra.mxu1 %v6197_v26 }
 0x23c   : > { %v8554_v3 = vadd.f32 %v1859_v1, %v1810_v6 }
 0x23e   : > { %v1911_v43 = vpop.f32.mrf.mxu0  ;;  %v1960_v57 = vpop.f32.mrf.mxu1 }
 0x23f   : > { %v8571_v4 = vadd.f32 %v1960_v57, %v1911_v43 }
 0x240   : > { %2168 = vmatmul.bf16.gmra.mxu2 %v8170_v23  ;;  %2217 = vmatmul.bf16.gmra.mxu3 %v8172_v46 }
 0x241   : > { %2266 = vmatmul.bf16.gmra.mxu0 %v8170_v23  ;;  %2315 = vmatmul.bf16.gmra.mxu1 %v8172_v46 }
 0x243   : > { %v1813_v7 = vpop.f32.mrf.mxu2  ;;  %v1862_v51 = vpop.f32.mrf.mxu3 }
 0x244   : > { %v8577_v9 = vadd.f32 %v1862_v51, %v1813_v7 }
 0x246   : > { %v1913_v60 = vpop.f32.mrf.mxu0  ;;  %v1962_v14 = vpop.f32.mrf.mxu1 }
 0x247   : > { %v8579_v6 = vadd.f32 %v1962_v14, %v1913_v60 }
 0x24b   : > { %v1815_v1 = vpop.f32.mrf.mxu2  ;;  %v1864_v34 = vpop.f32.mrf.mxu3 }
 0x24c   : > { %v8581_v38 = vadd.f32 %v1864_v34, %v1815_v1 }
 0x24e   : > { %v1916_v40 = vpop.f32.mrf.mxu0  ;;  %v1965_v25 = vpop.f32.mrf.mxu1 }
 0x24f   : > { %v8583_v10 = vadd.f32 %v1965_v25, %v1916_v40 }
 0x250   : > { %2173 = vmatmul.bf16.gmra.mxu2 %v8275_v11  ;;  %2222 = vmatmul.bf16.gmra.mxu3 %v8277_v19 }
 0x251   : > { %2271 = vmatmul.bf16.gmra.mxu0 %v8275_v11  ;;  %2320 = vmatmul.bf16.gmra.mxu1 %v8277_v19 }
 0x253   : > { %v1818_v32 = vpop.f32.mrf.mxu2  ;;  %v1867_v48 = vpop.f32.mrf.mxu3 }
 0x254   : > { %v8589_v22 = vadd.f32 %v1867_v48, %v1818_v32 }
 0x256   : > { %v1918_v41 = vpop.f32.mrf.mxu0  ;;  %v1967_v42 = vpop.f32.mrf.mxu1 }
 0x257   : > { %v8591_v47 = vadd.f32 %v1967_v42, %v1918_v41 }
 0x25b   : > { %v1820_v43 = vpop.f32.mrf.mxu2  ;;  %v1869_v57 = vpop.f32.mrf.mxu3 }
 0x25c   : > { %v8593_v26 = vadd.f32 %v1869_v57, %v1820_v43  ;;  %v2392_v57 = vrot.slane %v7990_v8, 1 }
 0x25e   : > { %v2237_v7 = vpop.f32.mrf.mxu0  ;;  %v2286_v51 = vpop.f32.mrf.mxu1 }
 0x25f   : > { %v2238_v60 = vadd.f32 %v2237_v7, %v8315_v31 }
 0x260   : > { %2604 = vmatmul.bf16.vlgmr.msrb.gmra.mxu2 %v7973_v36  ;;  %2653 = vmatmul.bf16.vlgmr.msrb.gmra.mxu3 %v7978_v37 }
 0x261   : > { %v8598_v14 = vadd.f32 %v2286_v51, %v2238_v60  ;;  %2702 = vmatmul.bf16.vlgmr.msra.gmra.mxu0 %v7973_v36  ;;  %2751 = vmatmul.bf16.vlgmr.msra.gmra.mxu1 %v7978_v37  ;;  %v2394_v36 = vrot.slane %v7992_v29, 1 }
 0x263   : > { %v2139_v1 = vpop.f32.mrf.mxu2  ;;  %v2188_v34 = vpop.f32.mrf.mxu3 }
 0x264   : > { %v2140_v40 = vadd.f32 %v2139_v1, %v8317_v13  ;;  %v2395_v1 = vsel %vm2385_vm1, %v2390_v62, %v2394_v36 }
 0x266   : > { %v8603_v25 = vadd.f32 %v2188_v34, %v2140_v40  ;;  %v2239_v32 = vpop.f32.mrf.mxu0  ;;  %v2288_v48 = vpop.f32.mrf.mxu1 }
 0x267   : > { %v2240_v31 = vadd.f32 %v2239_v32, %v8319_v12  ;;  %v2393_v12 = vsel %vm2385_vm1, %v2387_v61, %v2392_v57 }
 0x269   : > { %v8606_v41 = vadd.f32 %v2288_v48, %v2240_v31  ;;  %v2396_v48 = vrot.slane %v8010_v44, 1  ;;  %v2398_v31 = vrot.slane %v8012_v56, 1 }
 0x26b   : > { %10883 = vst [vmem:[#allocation13_spill] sm:$0xff] %v8606_v41  ;;  %v2141_v42 = vpop.f32.mrf.mxu2  ;;  %v2190_v43 = vpop.f32.mrf.mxu3 }
 0x26c   : > { %v2142_v37 = vadd.f32 %v2141_v42, %v8321_v30 }
 0x26e   : > { %v8611_v7 = vadd.f32 %v2190_v43, %v2142_v37  ;;  %v2242_v51 = vpop.f32.mrf.mxu0  ;;  %v2291_v13 = vpop.f32.mrf.mxu1 }
 0x26f   : > { %v2243_v60 = vadd.f32 %v2242_v51, %v8323_v45 }
 0x270   : > { %2609 = vmatmul.bf16.gmra.mxu2 %v2393_v12  ;;  %2658 = vmatmul.bf16.gmra.mxu3 %v2395_v1 }
 0x271   : > { %v8620_v8 = vadd.f32 %v2291_v13, %v2243_v60  ;;  %2707 = vmatmul.bf16.gmra.mxu0 %v2393_v12  ;;  %2756 = vmatmul.bf16.gmra.mxu1 %v2395_v1  ;;  %v2397_v13 = vsel %vm2385_vm1, %v2392_v57, %v2396_v48 }
 0x273   : > { %v2144_v29 = vpop.f32.mrf.mxu2  ;;  %v2193_v30 = vpop.f32.mrf.mxu3 }
 0x274   : > { %v2145_v34 = vadd.f32 %v2144_v29, %v8325_v33 }
 0x276   : > { %v8623_v40 = vadd.f32 %v2193_v30, %v2145_v34  ;;  %v2244_v45 = vpop.f32.mrf.mxu0  ;;  %v2293_v16 = vpop.f32.mrf.mxu1  ;;  %v2400_v34 = vrot.slane %v8028_v50, 1 }
 0x277   : > { %v2245_v61 = vadd.f32 %v2244_v45, %v8327_v0  ;;  %v2399_v0 = vsel %vm2385_vm1, %v2394_v36, %v2398_v31  ;;  %v2402_v45 = vrot.slane %v8030_v17, 1 }
 0x279   : > { %v8626_v32 = vadd.f32 %v2293_v16, %v2245_v61 }
 0x27b   : > { %v2146_v58 = vpop.f32.mrf.mxu2  ;;  %v2195_v62 = vpop.f32.mrf.mxu3 }
 0x27c   : > { %v2147_v42 = vadd.f32 %v2146_v58, %v8329_v55 }
 0x27e   : > { %v8631_v43 = vadd.f32 %v2195_v62, %v2147_v42  ;;  %v2247_v37 = vpop.f32.mrf.mxu0  ;;  %v2296_v33 = vpop.f32.mrf.mxu1  ;;  %v2401_v42 = vsel %vm2385_vm1, %v2396_v48, %v2400_v34 }
 0x27f   : > { %v2248_v51 = vadd.f32 %v2247_v37, %v8331_v2 }
 0x280   : > { %2614 = vmatmul.bf16.gmra.mxu2 %v2397_v13  ;;  %2663 = vmatmul.bf16.gmra.mxu3 %v2399_v0 }
 0x281   : > { %v8636_v60 = vadd.f32 %v2296_v33, %v2248_v51  ;;  %2712 = vmatmul.bf16.gmra.mxu0 %v2397_v13  ;;  %2761 = vmatmul.bf16.gmra.mxu1 %v2399_v0 }
 0x283   : > { %v2149_v44 = vpop.f32.mrf.mxu2  ;;  %v2198_v56 = vpop.f32.mrf.mxu3 }
 0x284   : > { %v2150_v55 = vadd.f32 %v2149_v44, %v8337_v39  ;;  %v2404_v44 = vrot.slane %v8060_v35, 1 }
 0x286   : > { %v8639_v12 = vadd.f32 %v2198_v56, %v2150_v55  ;;  %v2249_v1 = vpop.f32.mrf.mxu0  ;;  %v2298_v29 = vpop.f32.mrf.mxu1  ;;  %v2406_v56 = vrot.slane %v8062_v20, 1 }
 0x287   : > { %v2250_v2 = vadd.f32 %v2249_v1, %v8339_v18  ;;  %v2403_v18 = vsel %vm2385_vm1, %v2398_v31, %v2402_v45 }
 0x289   : > { %v8642_v30 = vadd.f32 %v2298_v29, %v2250_v2 }
 0x28b   : > { %v2151_v57 = vpop.f32.mrf.mxu2  ;;  %v2200_v36 = vpop.f32.mrf.mxu3 }
 0x28c   : > { %v2152_v16 = vadd.f32 %v2151_v57, %v8341_v5  ;;  %v2405_v57 = vsel %vm2385_vm1, %v2400_v34, %v2404_v44 }
 0x28e   : > { %v8647_v61 = vadd.f32 %v2200_v36, %v2152_v16  ;;  %v2252_v58 = vpop.f32.mrf.mxu0  ;;  %v2301_v39 = vpop.f32.mrf.mxu1 }
 0x28f   : > { %v2253_v62 = vadd.f32 %v2252_v58, %v8343_v59 }
 0x290   : > { %2619 = vmatmul.bf16.gmra.mxu2 %v2401_v42  ;;  %2668 = vmatmul.bf16.gmra.mxu3 %v2403_v18 }
 0x291   : > { %v8652_v37 = vadd.f32 %v2301_v39, %v2253_v62  ;;  %2717 = vmatmul.bf16.gmra.mxu0 %v2401_v42  ;;  %2766 = vmatmul.bf16.gmra.mxu1 %v2403_v18  ;;  %v2410_v62 = vrot.slane %v8172_v46, 1 }
 0x293   : > { %v2154_v50 = vpop.f32.mrf.mxu2  ;;  %v2203_v17 = vpop.f32.mrf.mxu3 }
 0x294   : > { %v2155_v5 = vadd.f32 %v2154_v50, %v8349_v27 }
 0x296   : > { %v8655_v33 = vadd.f32 %v2203_v17, %v2155_v5  ;;  %v2254_v51 = vpop.f32.mrf.mxu0  ;;  %v2303_v13 = vpop.f32.mrf.mxu1  ;;  %v2411_v17 = vsel %vm2385_vm1, %v2406_v56, %v2410_v62 }
 0x297   : > { %v2255_v59 = vadd.f32 %v2254_v51, %v8351_v15  ;;  %v2407_v15 = vsel %vm2385_vm1, %v2402_v45, %v2406_v56  ;;  %v2408_v45 = vrot.slane %v8170_v23, 1  ;;  %v2414_v56 = vrot.slane %v8277_v19, 1  ;;  %v2329_v19 = vld [vmem:[#allocation3 + $0xc0] sm:$0x3] }
 0x299   : > { %v8658_v0 = vadd.f32 %v2303_v13, %v2255_v59 }
 0x29b   : > { %v2156_v48 = vpop.f32.mrf.mxu2  ;;  %v2205_v31 = vpop.f32.mrf.mxu3 }
 0x29c   : > { %v2157_v55 = vadd.f32 %v2156_v48, %v8353_v21 }
 0x29e   : > { %v8663_v1 = vadd.f32 %v2205_v31, %v2157_v55  ;;  %v2257_v29 = vpop.f32.mrf.mxu0  ;;  %v2306_v27 = vpop.f32.mrf.mxu1 }
 0x29f   : > { %v2258_v2 = vadd.f32 %v2257_v29, %v8355_v52 }
 0x2a0   : > { %2624 = vmatmul.bf16.gmra.mxu2 %v2405_v57  ;;  %2673 = vmatmul.bf16.gmra.mxu3 %v2407_v15 }
 0x2a1   : > { %v8668_v36 = vadd.f32 %v2306_v27, %v2258_v2  ;;  %2722 = vmatmul.bf16.gmra.mxu0 %v2405_v57  ;;  %2771 = vmatmul.bf16.gmra.mxu1 %v2407_v15  ;;  %v2415_v2 = vsel %vm2385_vm1, %v2410_v62, %v2414_v56  ;;  %v2366_v62 = vpack.c.bf16 %v2329_v19, %v2329_v19 }
 0x2a3   : > { %v2159_v35 = vpop.f32.mrf.mxu2  ;;  %v2208_v20 = vpop.f32.mrf.mxu3 }
 0x2a4   : > { %v2160_v21 = vadd.f32 %v2159_v35, %v8394_v28  ;;  %v2409_v28 = vsel %vm2385_vm1, %v2404_v44, %v2408_v45  ;;  %v2412_v44 = vrot.slane %v8275_v11, 1 }
 0x2a6   : > { %v8671_v16 = vadd.f32 %v2208_v20, %v2160_v21  ;;  %v8673_v58 = vpop.f32.mrf.mxu0  ;;  %v8675_v39 = vpop.f32.mrf.mxu1  ;;  %v2328_v20 = vld [vmem:[#allocation3 + $0xa0] sm:$0x3] }
 0x2ab   : > { %v8677_v52 = vpop.f32.mrf.mxu2  ;;  %v8679_v34 = vpop.f32.mrf.mxu3 }
 0x2ae   : > { %v2262_v42 = vpop.f32.mrf.mxu0  ;;  %v2311_v18 = vpop.f32.mrf.mxu1 }
 0x2af   : > { %v2263_v50 = vadd.f32 %v2262_v42, %v8463_v54 }
 0x2b0   : > { %2629 = vmatmul.bf16.gmra.mxu2 %v2409_v28  ;;  %2678 = vmatmul.bf16.gmra.mxu3 %v2411_v17 }
 0x2b1   : > { %v8686_v5 = vadd.f32 %v2311_v18, %v2263_v50  ;;  %2727 = vmatmul.bf16.gmra.mxu0 %v2409_v28  ;;  %2776 = vmatmul.bf16.gmra.mxu1 %v2411_v17  ;;  %v2418_v17 = vrot.slane %v2366_v62, 1 }
 0x2b3   : > { %v2164_v51 = vpop.f32.mrf.mxu2  ;;  %v2213_v13 = vpop.f32.mrf.mxu3 }
 0x2b4   : > { %v2165_v23 = vadd.f32 %v2164_v51, %v8502_v49  ;;  %v2413_v49 = vsel %vm2385_vm1, %v2408_v45, %v2412_v44  ;;  %v2365_v45 = vpack.c.bf16 %v2328_v20, %v2328_v20 }
 0x2b6   : > { %v8689_v59 = vadd.f32 %v2213_v13, %v2165_v23  ;;  %v8691_v46 = vpop.f32.mrf.mxu0  ;;  %v8693_v48 = vpop.f32.mrf.mxu1  ;;  %v2416_v28 = vrot.slane %v2365_v45, 1 }
 0x2b8   : > { %v2417_v23 = vsel %vm2385_vm1, %v2412_v44, %v2416_v28 }
 0x2bb   : > { %v8695_v54 = vpop.f32.mrf.mxu2  ;;  %v8697_v31 = vpop.f32.mrf.mxu3 }
 0x2be   : > { %v2267_v55 = vpop.f32.mrf.mxu0  ;;  %v2316_v29 = vpop.f32.mrf.mxu1 }
 0x2bf   : > { %v2268_v27 = vadd.f32 %v2267_v55, %v8571_v4  ;;  %v2419_v55 = vsel %vm2385_vm1, %v2414_v56, %v2418_v17 }
 0x2c0   : > { %2634 = vmatmul.bf16.gmra.mxu2 %v2413_v49  ;;  %2683 = vmatmul.bf16.gmra.mxu3 %v2415_v2 }
 0x2c1   : > { %v8704_v57 = vadd.f32 %v2316_v29, %v2268_v27  ;;  %2732 = vmatmul.bf16.gmra.mxu0 %v2413_v49  ;;  %2781 = vmatmul.bf16.gmra.mxu1 %v2415_v2 }
 0x2c3   : > { %v2169_v15 = vpop.f32.mrf.mxu2  ;;  %v2218_v35 = vpop.f32.mrf.mxu3 }
 0x2c4   : > { %v2170_v11 = vadd.f32 %v2169_v15, %v8577_v9 }
 0x2c6   : > { %v8707_v21 = vadd.f32 %v2218_v35, %v2170_v11  ;;  %v8709_v42 = vpop.f32.mrf.mxu0  ;;  %v8711_v4 = vpop.f32.mrf.mxu1 }
 0x2cb   : > { %v8713_v18 = vpop.f32.mrf.mxu2  ;;  %v8715_v50 = vpop.f32.mrf.mxu3 }
 0x2ce   : > { %v2272_v51 = vpop.f32.mrf.mxu0  ;;  %v2321_v13 = vpop.f32.mrf.mxu1 }
 0x2cf   : > { %v2273_v9 = vadd.f32 %v2272_v51, %v8583_v10 }
 0x2d0   : > { %2639 = vmatmul.bf16.gmra.mxu2 %v2417_v23  ;;  %2688 = vmatmul.bf16.gmra.mxu3 %v2419_v55 }
 0x2d1   : > { %v8720_v29 = vadd.f32 %v2321_v13, %v2273_v9  ;;  %2737 = vmatmul.bf16.gmra.mxu0 %v2417_v23  ;;  %2786 = vmatmul.bf16.gmra.mxu1 %v2419_v55 }
 0x2d3   : > { %v2174_v27 = vpop.f32.mrf.mxu2  ;;  %v2223_v49 = vpop.f32.mrf.mxu3 }
 0x2d4   : > { %v2175_v2 = vadd.f32 %v2174_v27, %v8589_v22 }
 0x2d6   : > { %v8723_v15 = vadd.f32 %v2223_v49, %v2175_v2  ;;  %v8725_v35 = vpop.f32.mrf.mxu0  ;;  %v8727_v11 = vpop.f32.mrf.mxu1 }
 0x2db   : > { %v8729_v10 = vpop.f32.mrf.mxu2  ;;  %v8731_v44 = vpop.f32.mrf.mxu3 }
 0x2de   : > { %v2703_v56 = vpop.f32.mrf.mxu0  ;;  %v2752_v20 = vpop.f32.mrf.mxu1 }
 0x2df   : > { %v2753_v19 = vadd.f32 %v2752_v20, %v2703_v56 }
 0x2e1   : > { %v8734_v45 = vadd.f32 %v2753_v19, %v8598_v14  ;;  %v2824_v14 = vld [vmem:[%s10834_s4] sm:$0x3] }
 0x2e2   : > { %v8751_v56 = vperm.slane %v2824_v14, 1 }
 0x2e3   : > { %10884 = vst [vmem:[#allocation14_spill] sm:$0xff] %v8734_v45  ;;  %v2605_v62 = vpop.f32.mrf.mxu2  ;;  %v2654_v28 = vpop.f32.mrf.mxu3 }
 0x2e4   : > { %v2655_v17 = vadd.f32 %v2654_v28, %v2605_v62 }
 0x2e6   : > { %v8737_v22 = vadd.f32 %v2655_v17, %v8603_v25  ;;  %v8739_v51 = vpop.f32.mrf.mxu0  ;;  %v8741_v13 = vpop.f32.mrf.mxu1 }
 0x2e7   : > { %10886 = vst [vmem:[#allocation16_spill] sm:$0xff] %v8741_v13 }
 0x2e8   : > { %10885 = vst [vmem:[#allocation15_spill] sm:$0xff] %v8737_v22  ;;  %v8757_v22 = vperm.slane %v2824_v14, 0 }
 0x2eb   : > { %v8743_v9 = vpop.f32.mrf.mxu2  ;;  %v8745_v23 = vpop.f32.mrf.mxu3 }
 0x2ee   : > { %v2708_v55 = vpop.f32.mrf.mxu0  ;;  %v2757_v27 = vpop.f32.mrf.mxu1 }
 0x2ef   : > { %v2758_v49 = vadd.f32 %v2757_v27, %v2708_v55 }
 0x2f1   : > { %v2797_v2 = vadd.f32 %v2758_v49, %v8620_v8 }
 0x2f3   : > { %v2610_v25 = vpop.f32.mrf.mxu2  ;;  %v2659_v20 = vpop.f32.mrf.mxu3  ;;  %v2835_v19 = vadd.f32 %v8751_v56, %v2797_v2 }
 0x2f4   : > { %v2660_v62 = vadd.f32 %v2659_v20, %v2610_v25 }
 0x2f5   : > { %v8754_v28 = vmax.f32 %v2835_v19, 0.0 }
 0x2f6   : > { %v2796_v17 = vadd.f32 %v2660_v62, %v8623_v40  ;;  %v2710_v45 = vpop.f32.mrf.mxu0  ;;  %v2759_v41 = vpop.f32.mrf.mxu1 }
 0x2f7   : > { %v2760_v13 = vadd.f32 %v2759_v41, %v2710_v45  ;;  %2930 = vrot.lane.b32.xlu2 %v8754_v28, %s10870_s26 }
 0x2f8   : > { %v2834_v8 = vadd.f32 %v8757_v22, %v2796_v17 }
 0x2f9   : > { %v2799_v55 = vadd.f32 %v2760_v13, %v8626_v32 }
 0x2fa   : > { %v8763_v27 = vmax.f32 %v2834_v8, 0.0 }
 0x2fb   : > { %v2612_v49 = vpop.f32.mrf.mxu2  ;;  %v2661_v2 = vpop.f32.mrf.mxu3  ;;  %v2837_v45 = vadd.f32 %v8751_v56, %v2799_v55 }
 0x2fc   : > { %v2662_v25 = vadd.f32 %v2661_v2, %v2612_v49  ;;  %2898 = vrot.lane.b32.xlu0 %v8763_v27, %s10870_s26 }
 0x2fd   : > { %v8773_v13 = vmax.f32 %v2837_v45, 0.0 }
 0x2fe   : > { %v2798_v40 = vadd.f32 %v2662_v25, %v8631_v43  ;;  %v2713_v14 = vpop.f32.mrf.mxu0  ;;  %v2762_v41 = vpop.f32.mrf.mxu1 }
 0x2ff   : > { %v2763_v20 = vadd.f32 %v2762_v41, %v2713_v14 }
 0x300   : > { %v2836_v19 = vadd.f32 %v8757_v22, %v2798_v40 }
 0x301   : > { %v2801_v62 = vadd.f32 %v2763_v20, %v8636_v60 }
 0x302   : > { %v8771_v32 = vmax.f32 %v2836_v19, 0.0 }
 0x303   : > { %v2615_v17 = vpop.f32.mrf.mxu2  ;;  %v2664_v8 = vpop.f32.mrf.mxu3  ;;  %v2839_v25 = vadd.f32 %v8751_v56, %v2801_v62 }
 0x304   : > { %v2665_v49 = vadd.f32 %v2664_v8, %v2615_v17  ;;  %2900 = vrot.lane.b32.xlu1 %v8771_v32, %s10870_s26  ;;  %2932 = vrot.lane.b32.xlu0 %v8773_v13, %s10870_s26 }
 0x305   : > { %v8785_v45 = vmax.f32 %v2839_v25, 0.0 }
 0x306   : > { %v2800_v43 = vadd.f32 %v2665_v49, %v8639_v12  ;;  %v2715_v55 = vpop.f32.mrf.mxu0  ;;  %v2764_v2 = vpop.f32.mrf.mxu1 }
 0x307   : > { %v2765_v60 = vadd.f32 %v2764_v2, %v2715_v55 }
 0x308   : > { %v2838_v40 = vadd.f32 %v8757_v22, %v2800_v43 }
 0x309   : > { %v2803_v14 = vadd.f32 %v2765_v60, %v8642_v30 }
 0x30a   : > { %v8783_v41 = vmax.f32 %v2838_v40, 0.0 }
 0x30b   : > { %v2617_v20 = vpop.f32.mrf.mxu2  ;;  %v2666_v19 = vpop.f32.mrf.mxu3  ;;  %v2841_v8 = vadd.f32 %v8751_v56, %v2803_v14 }
 0x30c   : > { %v2667_v17 = vadd.f32 %v2666_v19, %v2617_v20  ;;  %3033 = vrot.lane.b32.xlu2 %v8783_v41, %s10868_s25  ;;  %3065 = vrot.lane.b32.xlu1 %v8785_v45, %s10868_s25 }
 0x30d   : > { %2934 = vrot.lane.b32.xlu0 %v8785_v45, %s10870_s26  ;;  %v8796_v43 = vmax.f32 %v2841_v8, 0.0 }
 0x30e   : > { %v2802_v12 = vadd.f32 %v2667_v17, %v8647_v61  ;;  %v2718_v30 = vpop.f32.mrf.mxu0  ;;  %v2767_v62 = vpop.f32.mrf.mxu1 }
 0x30f   : > { %v2768_v61 = vadd.f32 %v2767_v62, %v2718_v30 }
 0x310   : > { %v2840_v49 = vadd.f32 %v8757_v22, %v2802_v12 }
 0x311   : > { %v2805_v12 = vadd.f32 %v2768_v61, %v8652_v37 }
 0x312   : > { %v8798_v55 = vmax.f32 %v2840_v49, 0.0 }
 0x313   : > { %v2620_v2 = vpop.f32.mrf.mxu2  ;;  %v2669_v25 = vpop.f32.mrf.mxu3  ;;  %v2843_v30 = vadd.f32 %v8751_v56, %v2805_v12 }
 0x314   : > { %v2670_v60 = vadd.f32 %v2669_v25, %v2620_v2  ;;  %3067 = vrot.lane.b32.xlu2 %v8796_v43, %s10868_s25  ;;  %2902 = vrot.lane.b32.xlu1 %v8783_v41, %s10870_s26 }
 0x315   : > { %3035 = vrot.lane.b32.xlu0 %v8798_v55, %s10868_s25  ;;  %v8821_v61 = vmax.f32 %v2843_v30, 0.0  ;;  %v2260_v30 = vadd.f32 %v8673_v58, %v8411_v53 }
 0x316   : > { %v2804_v40 = vadd.f32 %v2670_v60, %v8655_v33  ;;  %v2720_v14 = vpop.f32.mrf.mxu0  ;;  %v2769_v20 = vpop.f32.mrf.mxu1 }
 0x317   : > { %v2770_v19 = vadd.f32 %v2769_v20, %v2720_v14 }
 0x318   : > { %v2842_v17 = vadd.f32 %v8757_v22, %v2804_v40 }
 0x319   : > { %v2807_v49 = vadd.f32 %v2770_v19, %v8658_v0 }
 0x31a   : > { %v8809_v8 = vmax.f32 %v2842_v17, 0.0 }
 0x31b   : > { %v2622_v2 = vpop.f32.mrf.mxu2  ;;  %v2671_v25 = vpop.f32.mrf.mxu3  ;;  %v2845_v37 = vadd.f32 %v8751_v56, %v2807_v49 }
 0x31c   : > { %2904 = vrot.lane.b32.xlu2 %v8798_v55, %s10870_s26  ;;  %2936 = vrot.lane.b32.xlu1 %v8796_v43, %s10870_s26  ;;  %v2672_v33 = vadd.f32 %v2671_v25, %v2622_v2 }
 0x31d   : > { %3037 = vrot.lane.b32.xlu0 %v8809_v8, %s10868_s25  ;;  %v8823_v20 = vmax.f32 %v2845_v37, 0.0 }
 0x31e   : > { %v2723_v62 = vpop.f32.mrf.mxu0  ;;  %v2772_v60 = vpop.f32.mrf.mxu1  ;;  %v2806_v0 = vadd.f32 %v2672_v33, %v8663_v1 }
 0x31f   : > { %v2773_v12 = vadd.f32 %v2772_v60, %v2723_v62 }
 0x320   : > { %v2844_v17 = vadd.f32 %v8757_v22, %v2806_v0  ;;  %v2309_v0 = vadd.f32 %v8675_v39, %v2260_v30 }
 0x321   : > { %v2809_v2 = vadd.f32 %v2773_v12, %v8668_v36 }
 0x322   : > { %v8833_v49 = vmax.f32 %v2844_v17, 0.0 }
 0x323   : > { %v2625_v40 = vpop.f32.mrf.mxu2  ;;  %v2674_v14 = vpop.f32.mrf.mxu3  ;;  %v2847_v36 = vadd.f32 %v8751_v56, %v2809_v2 }
 0x324   : > { %3069 = vrot.lane.b32.xlu2 %v8821_v61, %s10868_s25  ;;  %2938 = vrot.lane.b32.xlu1 %v8821_v61, %s10870_s26  ;;  %v2675_v19 = vadd.f32 %v2674_v14, %v2625_v40  ;;  %v2162_v14 = vadd.f32 %v8677_v52, %v8446_v24 }
 0x325   : > { %3071 = vrot.lane.b32.xlu0 %v8823_v20, %s10868_s25  ;;  %v8849_v58 = vmax.f32 %v2847_v36, 0.0 }
 0x326   : > { %v2808_v1 = vadd.f32 %v2675_v19, %v8671_v16  ;;  %v2725_v25 = vpop.f32.mrf.mxu0  ;;  %v2774_v33 = vpop.f32.mrf.mxu1 }
 0x327   : > { %v2775_v37 = vadd.f32 %v2774_v33, %v2725_v25 }
 0x328   : > { %v2846_v60 = vadd.f32 %v8757_v22, %v2808_v1  ;;  %v2211_v1 = vadd.f32 %v8679_v34, %v2162_v14  ;;  %v2265_v14 = vadd.f32 %v8691_v46, %v8519_v63 }
 0x329   : > { %v2811_v40 = vadd.f32 %v2775_v37, %v2309_v0 }
 0x32a   : > { %v8847_v53 = vmax.f32 %v2846_v60, 0.0  ;;  %v2314_v63 = vadd.f32 %v8693_v48, %v2265_v14 }
 0x32b   : > { %v2627_v16 = vpop.f32.mrf.mxu2  ;;  %v2676_v62 = vpop.f32.mrf.mxu3  ;;  %v2849_v12 = vadd.f32 %v8751_v56, %v2811_v40 }
 0x32c   : > { %2906 = vrot.lane.b32.xlu2 %v8809_v8, %s10870_s26  ;;  %3039 = vrot.lane.b32.xlu1 %v8833_v49, %s10868_s25  ;;  %v2677_v19 = vadd.f32 %v2676_v62, %v2627_v16 }
 0x32d   : > { %2908 = vrot.lane.b32.xlu0 %v8833_v49, %s10870_s26  ;;  %v8861_v24 = vmax.f32 %v2849_v12, 0.0 }
 0x32e   : > { %v2728_v17 = vpop.f32.mrf.mxu0  ;;  %v2777_v39 = vpop.f32.mrf.mxu1  ;;  %v2810_v33 = vadd.f32 %v2677_v19, %v2211_v1  ;;  %v2167_v19 = vadd.f32 %v8695_v54, %v8554_v3 }
 0x32f   : > { %v2778_v52 = vadd.f32 %v2777_v39, %v2728_v17 }
 0x330   : > { %v2848_v37 = vadd.f32 %v8757_v22, %v2810_v33  ;;  %v2216_v46 = vadd.f32 %v8697_v31, %v2167_v19 }
 0x331   : > { %v2813_v62 = vadd.f32 %v2778_v52, %v8686_v5 }
 0x332   : > { %v8872_v40 = vmax.f32 %v2848_v37, 0.0 }
 0x333   : > { %v2630_v2 = vpop.f32.mrf.mxu2  ;;  %v2679_v25 = vpop.f32.mrf.mxu3  ;;  %v2851_v17 = vadd.f32 %v8751_v56, %v2813_v62 }
 0x334   : > { %2940 = vrot.lane.b32.xlu2 %v8823_v20, %s10870_s26  ;;  %3041 = vrot.lane.b32.xlu1 %v8847_v53, %s10868_s25  ;;  %v2680_v30 = vadd.f32 %v2679_v25, %v2630_v2 }
 0x335   : > { %3073 = vrot.lane.b32.xlu0 %v8849_v58, %s10868_s25  ;;  %v8890_v33 = vmax.f32 %v2851_v17, 0.0 }
 0x336   : > { %v2730_v16 = vpop.f32.mrf.mxu0  ;;  %v2779_v34 = vpop.f32.mrf.mxu1  ;;  %v2812_v60 = vadd.f32 %v2680_v30, %v8689_v59 }
 0x337   : > { %v2780_v5 = vadd.f32 %v2779_v34, %v2730_v16 }
 0x338   : > { %v2850_v59 = vadd.f32 %v8757_v22, %v2812_v60 }
 0x339   : > { %v2815_v12 = vadd.f32 %v2780_v5, %v2314_v63 }
 0x33a   : > { %v8888_v25 = vmax.f32 %v2850_v59, 0.0 }
 0x33b   : > { %v2632_v36 = vpop.f32.mrf.mxu2  ;;  %v2681_v0 = vpop.f32.mrf.mxu3  ;;  %v2853_v48 = vadd.f32 %v8751_v56, %v2815_v12 }
 0x33c   : > { %2942 = vrot.lane.b32.xlu2 %v8849_v58, %s10870_s26  ;;  %3075 = vrot.lane.b32.xlu1 %v8861_v24, %s10868_s25  ;;  %v2682_v39 = vadd.f32 %v2681_v0, %v2632_v36  ;;  %v2270_v36 = vadd.f32 %v8709_v42, %v8579_v6 }
 0x33d   : > { %2910 = vrot.lane.b32.xlu0 %v8847_v53, %s10870_s26  ;;  %v8900_v37 = vmax.f32 %v2853_v48, 0.0 }
 0x33e   : > { %v2733_v1 = vpop.f32.mrf.mxu0  ;;  %v2782_v2 = vpop.f32.mrf.mxu1  ;;  %v2814_v3 = vadd.f32 %v2682_v39, %v2216_v46  ;;  %v2319_v19 = vadd.f32 %v8711_v4, %v2270_v36  ;;  %v2172_v46 = vadd.f32 %v8713_v18, %v8581_v38 }
 0x33f   : > { %v2783_v0 = vadd.f32 %v2782_v2, %v2733_v1 }
 0x340   : > { %v2852_v30 = vadd.f32 %v8757_v22, %v2814_v3  ;;  %v2221_v12 = vadd.f32 %v8715_v50, %v2172_v46 }
 0x341   : > { %v2817_v5 = vadd.f32 %v2783_v0, %v8704_v57 }
 0x342   : > { %v8903_v34 = vmax.f32 %v2852_v30, 0.0 }
 0x343   : > { %v2635_v54 = vpop.f32.mrf.mxu2  ;;  %v2684_v52 = vpop.f32.mrf.mxu3  ;;  %v2855_v57 = vadd.f32 %v8751_v56, %v2817_v5 }
 0x344   : > { %3043 = vrot.lane.b32.xlu2 %v8872_v40, %s10868_s25  ;;  %2912 = vrot.lane.b32.xlu1 %v8872_v40, %s10870_s26  ;;  %v2685_v31 = vadd.f32 %v2684_v52, %v2635_v54  ;;  %v2958_v54 = vlaneseq }
 0x345   : > { %2944 = vrot.lane.b32.xlu0 %v8861_v24, %s10870_s26  ;;  %v8929_v18 = vmax.f32 %v2855_v57, 0.0 }
 0x346   : > { %v2816_v16 = vadd.f32 %v2685_v31, %v8707_v21  ;;  %v2735_v62 = vpop.f32.mrf.mxu0  ;;  %v2784_v60 = vpop.f32.mrf.mxu1  ;;  %v8942_v31 = vand.u32 127, %v2958_v54 }
 0x347   : > { %v2785_v14 = vadd.f32 %v2784_v60, %v2735_v62 }
 0x348   : > { %v2854_v21 = vadd.f32 %v8757_v22, %v2816_v16  ;;  %vm2960_vm2 = vcmp.lt.s32.totalorder %v8942_v31, 1  ;;  %vm3089_vm3 = vcmp.lt.s32.totalorder %v8942_v31, 127 }
 0x349   : > { %v2819_v59 = vadd.f32 %v2785_v14, %v2319_v19  ;;  %v2275_v14 = vadd.f32 %v8725_v35, %v8591_v47 }
 0x34a   : > { %v8916_v63 = vmax.f32 %v2854_v21, 0.0 }
 0x34b   : > { %v2637_v17 = vpop.f32.mrf.mxu2  ;;  %v2686_v39 = vpop.f32.mrf.mxu3  ;;  %v2857_v4 = vadd.f32 %v8751_v56, %v2819_v59 }
 0x34c   : > { %3045 = vrot.lane.b32.xlu2 %v8888_v25, %s10868_s25  ;;  %3077 = vrot.lane.b32.xlu1 %v8890_v33, %s10868_s25  ;;  %v2687_v6 = vadd.f32 %v2686_v39, %v2637_v17  ;;  %v2324_v17 = vadd.f32 %v8727_v11, %v2275_v14  ;;  %v2657_v14 = vadd.f32 %v8745_v23, %v8743_v9 }
 0x34d   : > { %2946 = vrot.lane.b32.xlu0 %v8890_v33, %s10870_s26  ;;  %v8931_v3 = vmax.f32 %v2857_v4, 0.0 }
 0x34e   : > { %v2738_v1 = vpop.f32.mrf.mxu0  ;;  %v2787_v2 = vpop.f32.mrf.mxu1  ;;  %v2818_v38 = vadd.f32 %v2687_v6, %v2221_v12  ;;  %v2177_v12 = vadd.f32 %v8729_v10, %v8593_v26  ;;  %v2794_v23 = vadd.f32 %v2657_v14, %v8611_v7 }
 0x34f   : > { %v2788_v52 = vadd.f32 %v2787_v2, %v2738_v1 }
 0x350   : > { %v2856_v50 = vadd.f32 %v8757_v22, %v2818_v38  ;;  %v2226_v54 = vadd.f32 %v8731_v44, %v2177_v12 }
 0x351   : > { %v2931_v42 = vpop.permute.xlu2 %2930  ;;  %v2821_v62 = vadd.f32 %v2788_v52, %v8720_v29 }
 0x352   : > { %v8945_v60 = vmax.f32 %v2856_v50, 0.0 }
 0x353   : > { %v2640_v30 = vpop.f32.mrf.mxu2  ;;  %v2689_v16 = vpop.f32.mrf.mxu3  ;;  %v2859_v59 = vadd.f32 %v8751_v56, %v2821_v62 }
 0x354   : > { %3079 = vrot.lane.b32.xlu2 %v8900_v37, %s10868_s25  ;;  %2914 = vrot.lane.b32.xlu1 %v8888_v25, %s10870_s26  ;;  %v2690_v21 = vadd.f32 %v2689_v16, %v2640_v30 }
 0x355   : > { %3047 = vrot.lane.b32.xlu0 %v8903_v34, %s10868_s25  ;;  %v8969_v6 = vmax.f32 %v2859_v59, 0.0 }
 0x356   : > { %v2740_v36 = vpop.f32.mrf.mxu0  ;;  %v2789_v0 = vpop.f32.mrf.mxu1  ;;  %v2820_v39 = vadd.f32 %v2690_v21, %v8723_v15 }
 0x357   : > { %v2790_v29 = vadd.f32 %v2789_v0, %v2740_v36 }
 0x358   : > { %v2858_v1 = vadd.f32 %v8757_v22, %v2820_v39 }
 0x359   : > { %v2823_v46 = vadd.f32 %v2790_v29, %v2324_v17 }
 0x35a   : > { %v8990_v50 = vmax.f32 %v2858_v1, 0.0  ;;  %v2832_v1 = vadd.f32 %v8757_v22, %v2794_v23 }
 0x35b   : > { %v2642_v57 = vpop.f32.mrf.mxu2  ;;  %v2691_v4 = vpop.f32.mrf.mxu3  ;;  %v2861_v2 = vadd.f32 %v8751_v56, %v2823_v46 }
 0x35c   : > { %2916 = vrot.lane.b32.xlu2 %v8903_v34, %s10870_s26  ;;  %2948 = vrot.lane.b32.xlu1 %v8900_v37, %s10870_s26  ;;  %v2692_v11 = vadd.f32 %v2691_v4, %v2642_v57 }
 0x35d   : > { %3049 = vrot.lane.b32.xlu0 %v8916_v63, %s10868_s25  ;;  %v8992_v30 = vmax.f32 %v2861_v2, 0.0 }
 0x35e   : > { %v2822_v52 = vadd.f32 %v2692_v11, %v2226_v54  ;;  %v10888_v11 = vld [vmem:[#allocation15_spill] sm:$0xff] }
 0x360   : > { %v2860_v62 = vadd.f32 %v8757_v22, %v2822_v52 }
 0x362   : > { %v9003_v0 = vmax.f32 %v2860_v62, 0.0 }
 0x364   : > { %3081 = vrot.lane.b32.xlu2 %v8929_v18, %s10868_s25  ;;  %2950 = vrot.lane.b32.xlu1 %v8929_v18, %s10870_s26 }
 0x365   : > { %3083 = vrot.lane.b32.xlu0 %v8931_v3, %s10868_s25 }
 0x366   : > { %v8939_v48 = vpop.permute.xlu2 %3033 }
 0x36c   : > { %2918 = vrot.lane.b32.xlu2 %v8916_v63, %s10870_s26  ;;  %3051 = vrot.lane.b32.xlu1 %v8945_v60, %s10868_s25 }
 0x36d   : > { %2920 = vrot.lane.b32.xlu0 %v8945_v60, %s10870_s26 }
 0x36e   : > { %v8956_v19 = vpop.permute.xlu2 %3067  ;;  %v2899_v5 = vpop.permute.xlu0 %2898 }
 0x36f   : > { %v8961_v47 = vsel %vm2960_vm2, %v2899_v5, %v2931_v42  ;;  %v8965_v35 = vsel %vm2960_vm2, %v2931_v42, %v2899_v5 }
 0x374   : > { %2952 = vrot.lane.b32.xlu2 %v8931_v3, %s10870_s26  ;;  %2954 = vrot.lane.b32.xlu1 %v8969_v6, %s10870_s26 }
 0x375   : > { %3085 = vrot.lane.b32.xlu0 %v8969_v6, %s10868_s25 }
 0x376   : > { %v2905_v42 = vpop.permute.xlu2 %2904  ;;  %v2901_v15 = vpop.permute.xlu1 %2900 }
 0x377   : > { %v2933_v38 = vpop.permute.xlu0 %2932 }
 0x378   : > { %v8984_v26 = vsel %vm2960_vm2, %v2901_v15, %v2933_v38  ;;  %v8988_v10 = vsel %vm2960_vm2, %v2933_v38, %v2901_v15 }
 0x37c   : > { %3053 = vrot.lane.b32.xlu2 %v8990_v50, %s10868_s25  ;;  %2956 = vrot.lane.b32.xlu1 %v8992_v30, %s10870_s26 }
 0x37d   : > { %2922 = vrot.lane.b32.xlu0 %v8990_v50, %s10870_s26 }
 0x37e   : > { %v9000_v44 = vpop.permute.xlu2 %3069  ;;  %v3066_v16 = vpop.permute.xlu1 %3065 }
 0x37f   : > { %v2935_v36 = vpop.permute.xlu0 %2934  ;;  %v3094_v57 = vsel %vm3089_vm3, %v8939_v48, %v3066_v16  ;;  %v3110_v9 = vsel %vm3089_vm3, %v3066_v16, %v8939_v48  ;;  %v2830_v48 = vadd.f32 %v8757_v22, %v10888_v11  ;;  %v10889_v16 = vld [vmem:[#allocation13_spill] sm:$0xff] }
 0x381   : > { %v9057_v14 = vmax.f32 %v2830_v48, 0.0 }
 0x384   : > { %3055 = vrot.lane.b32.xlu2 %v9003_v0, %s10868_s25  ;;  %3087 = vrot.lane.b32.xlu1 %v8992_v30, %s10868_s25 }
 0x385   : > { %2924 = vrot.lane.b32.xlu0 %v9003_v0, %s10870_s26 }
 0x386   : > { %v2907_v21 = vpop.permute.xlu2 %2906  ;;  %v2903_v29 = vpop.permute.xlu1 %2902 }
 0x387   : > { %v2965_v5 = vsel %vm2960_vm2, %v2903_v29, %v2935_v36  ;;  %v2981_v59 = vsel %vm2960_vm2, %v2935_v36, %v2903_v29  ;;  %v3036_v17 = vpop.permute.xlu0 %3035 }
 0x388   : > { %v3001_v39 = vmax.f32 %v2981_v59, %v8783_v41  ;;  %v3002_v46 = vmax.f32 %v2965_v5, %v8785_v45  ;;  %v10887_v41 = vld [vmem:[#allocation16_spill] sm:$0xff]  ;;  %v3095_v36 = vsel %vm3089_vm3, %v3036_v17, %v8956_v19  ;;  %v3111_v22 = vsel %vm3089_vm3, %v8956_v19, %v3036_v17 }
 0x389   : > { %v2755_v45 = vadd.f32 %v10887_v41, %v8739_v51 }
 0x38a   : > { %v9027_v4 = vmax.f32 %v3001_v39, %v3094_v57  ;;  %v9029_v12 = vmax.f32 %v3002_v46, %v3110_v9  ;;  %v10891_v9 = vld [vmem:[#allocation14_spill] sm:$0xff] }
 0x38b   : > { %v2795_v62 = vadd.f32 %v2755_v45, %v10889_v16  ;;  %v2831_v23 = vadd.f32 %v8751_v56, %v10891_v9 }
 0x38c   : > { %3031 = vrot.lane.b32.xlu2 %v8771_v32, %s10868_s25  ;;  %3029 = vrot.lane.b32.xlu1 %v8763_v27, %s10868_s25  ;;  %v10851_v59 = vrot.slane %v9029_v12, 1  ;;  %v10850_v39 = vrot.slane %v9029_v12, 2 }
 0x38d   : > { %3061 = vrot.lane.b32.xlu0 %v8754_v28, %s10868_s25  ;;  %v2833_v41 = vadd.f32 %v8751_v56, %v2795_v62 }
 0x38e   : > { %v9041_v7 = vpop.permute.xlu2 %2940  ;;  %v2937_v15 = vpop.permute.xlu1 %2936 }
 0x38f   : > { %v2966_v2 = vsel %vm2960_vm2, %v2905_v42, %v2937_v15  ;;  %v2982_v38 = vsel %vm2960_vm2, %v2937_v15, %v2905_v42  ;;  %v3038_v54 = vpop.permute.xlu0 %3037  ;;  %v9059_v42 = vmax.f32 %v2832_v1, 0.0 }
 0x390   : > { %v3003_v51 = vmax.f32 %v2982_v38, %v8798_v55  ;;  %v3004_v52 = vmax.f32 %v2966_v2, %v8796_v43  ;;  %v10853_v55 = vrot.slane %v9027_v4, 1  ;;  %v10852_v43 = vrot.slane %v9027_v4, 2 }
 0x391   : > { %10890 = vst [vmem:[#allocation16_spill] sm:$0xff] %v9059_v42  ;;  %v3112_v9 = vsel %vm3089_vm3, %v9000_v44, %v3038_v54 }
 0x392   : > { %v3132_v29 = vmax.f32 %v3003_v51, %v3095_v36  ;;  %v3133_v5 = vmax.f32 %v3004_v52, %v3111_v22  ;;  %v3096_v22 = vsel %vm3089_vm3, %v3038_v54, %v9000_v44 }
 0x394   : > { %3063 = vrot.lane.b32.xlu1 %v8773_v13, %s10868_s25  ;;  %2894 = vrot.lane.b32.xlu2 %v9057_v14, %s10870_s26  ;;  %v3313_v19 = vrot.slane %v3132_v29, 1  ;;  %v3452_v17 = vrot.slane %v3132_v29, 2  ;;  %v3315_v46 = vrot.slane %v3133_v5, 1  ;;  %v3454_v57 = vrot.slane %v3133_v5, 2 }
 0x395   : > { %2896 = vrot.lane.b32.xlu0 %v9059_v42, %s10870_s26 }
 0x396   : > { %v9074_v45 = vpop.permute.xlu2 %2942  ;;  %v2939_v11 = vpop.permute.xlu1 %2938  ;;  %v3314_v48 = vsel %vm2385_vm1, %v10853_v55, %v3313_v19  ;;  %v3453_v15 = vsel %vm3433_vm4, %v10852_v43, %v3452_v17  ;;  %v3316_v1 = vsel %vm2385_vm1, %v10851_v59, %v3315_v46  ;;  %v3455_v2 = vsel %vm3433_vm4, %v10850_v39, %v3454_v57 }
 0x397   : > { %v2967_v56 = vsel %vm2960_vm2, %v2907_v21, %v2939_v11  ;;  %v2983_v38 = vsel %vm2960_vm2, %v2939_v11, %v2907_v21  ;;  %v3072_v51 = vpop.permute.xlu0 %3071  ;;  %v3401_v52 = vmax.f32 %v9027_v4, %v3314_v48  ;;  %v3402_v16 = vmax.f32 %v9029_v12, %v3316_v1 }
 0x398   : > { %v3005_v62 = vmax.f32 %v2983_v38, %v8809_v8  ;;  %v3006_v36 = vmax.f32 %v2967_v56, %v8821_v61  ;;  %v9106_v59 = vmax.f32 %v2831_v23, 0.0  ;;  %v9108_v1 = vmax.f32 %v2833_v41, 0.0 }
 0x399   : > { %v9102_v39 = vmax.f32 %v3401_v52, %v3453_v15  ;;  %v9104_v21 = vmax.f32 %v3402_v16, %v3455_v2 }
 0x39a   : > { %v3134_v11 = vmax.f32 %v3005_v62, %v3096_v22  ;;  %v3135_v48 = vmax.f32 %v3006_v36, %v3112_v9  ;;  %10894 = vst [vmem:[#allocation14_spill] sm:$0xff] %v9108_v1 }
 0x39b   : > { %10892 = vst [vmem:[#allocation15_spill] sm:$0xff] %v9102_v39 }
 0x39c   : > { %10893 = vst [vmem:[#allocation13_spill] sm:$0xff] %v9104_v21  ;;  %2926 = vrot.lane.b32.xlu1 %v9106_v59, %s10870_s26  ;;  %2928 = vrot.lane.b32.xlu2 %v9108_v1, %s10870_s26  ;;  %v3317_v8 = vrot.slane %v3134_v11, 1  ;;  %v3456_v61 = vrot.slane %v3134_v11, 2  ;;  %v3319_v56 = vrot.slane %v3135_v48, 1  ;;  %v3458_v44 = vrot.slane %v3135_v48, 2  ;;  %s5579_s26 = sshll.u32 %s459_s28, 2 }
 0x39d   : > { %3025 = vrot.lane.b32.xlu0 %v9057_v14, %s10868_s25  ;;  %s461_s21 = scalar_lea.vmem [#allocation5], %s5579_s26 }
 0x39e   : > { %v9116_v54 = vpop.permute.xlu2 %3043  ;;  %v3040_v15 = vpop.permute.xlu1 %3039  ;;  %v3318_v23 = vsel %vm2385_vm1, %v3313_v19, %v3317_v8  ;;  %v3457_v41 = vsel %vm3433_vm4, %v3452_v17, %v3456_v61  ;;  %v3320_v2 = vsel %vm2385_vm1, %v3315_v46, %v3319_v56  ;;  %v3459_v38 = vsel %vm3433_vm4, %v3454_v57, %v3458_v44  ;;  %s5513_s29 = sshll.u32 %s461_s21, 4  ;;  %s5514_s29 = int_to_ptr.vmem [resolvable:$true] %s5513_s29 }
 0x39f   : > { %v2909_v52 = vpop.permute.xlu0 %2908  ;;  %v3403_v16 = vmax.f32 %v3132_v29, %v3318_v23  ;;  %v3404_v62 = vmax.f32 %v3133_v5, %v3320_v2  ;;  %v3097_v29 = vsel %vm3089_vm3, %v3040_v15, %v3072_v51  ;;  %v3113_v5 = vsel %vm3089_vm3, %v3072_v51, %v3040_v15 }
 0x3a0   : > { %v2968_v36 = vsel %vm2960_vm2, %v2909_v52, %v9041_v7  ;;  %v2984_v22 = vsel %vm2960_vm2, %v9041_v7, %v2909_v52 }
 0x3a1   : > { %v3007_v9 = vmax.f32 %v2984_v22, %v8833_v49  ;;  %v3008_v19 = vmax.f32 %v2968_v36, %v8823_v20  ;;  %v9130_v17 = vmax.f32 %v3403_v16, %v3457_v41  ;;  %v9132_v46 = vmax.f32 %v3404_v62, %v3459_v38 }
 0x3a3   : > { %10895 = vst [vmem:[#allocation17_spill] sm:$0xff] %v9130_v17  ;;  %v3136_v57 = vmax.f32 %v3007_v9, %v3097_v29  ;;  %v3137_v23 = vmax.f32 %v3008_v19, %v3113_v5 }
 0x3a4   : > { %10896 = vst [vmem:[#allocation18_spill] sm:$0xff] %v9132_v46  ;;  %3027 = vrot.lane.b32.xlu1 %v9059_v42, %s10868_s25  ;;  %3057 = vrot.lane.b32.xlu2 %v9106_v59, %s10868_s25 }
 0x3a5   : > { %3059 = vrot.lane.b32.xlu0 %v9108_v1, %s10868_s25  ;;  %v3321_v20 = vrot.slane %v3136_v57, 1  ;;  %v3460_v7 = vrot.slane %v3136_v57, 2  ;;  %v3323_v51 = vrot.slane %v3137_v23, 1  ;;  %v3462_v15 = vrot.slane %v3137_v23, 2 }
 0x3a6   : > { %v9148_v41 = vpop.permute.xlu2 %3045  ;;  %v3042_v38 = vpop.permute.xlu1 %3041 }
 0x3a7   : > { %v3074_v52 = vpop.permute.xlu0 %3073  ;;  %v3322_v16 = vsel %vm2385_vm1, %v3317_v8, %v3321_v20  ;;  %v3461_v62 = vsel %vm3433_vm4, %v3456_v61, %v3460_v7  ;;  %v3324_v36 = vsel %vm2385_vm1, %v3319_v56, %v3323_v51  ;;  %v3463_v22 = vsel %vm3433_vm4, %v3458_v44, %v3462_v15 }
 0x3a8   : > { %v3405_v9 = vmax.f32 %v3134_v11, %v3322_v16  ;;  %v3406_v19 = vmax.f32 %v3135_v48, %v3324_v36  ;;  %v3098_v48 = vsel %vm3089_vm3, %v3042_v38, %v3074_v52  ;;  %v3114_v44 = vsel %vm3089_vm3, %v3074_v52, %v3042_v38 }
 0x3aa   : > { %v9154_v29 = vmax.f32 %v3405_v9, %v3461_v62  ;;  %v9156_v5 = vmax.f32 %v3406_v19, %v3463_v22 }
 0x3ac   : > { %10897 = vst [vmem:[#allocation19_spill] sm:$0xff] %v9154_v29 }
 0x3ad   : > { %10898 = vst [vmem:[#allocation20_spill] sm:$0xff] %v9156_v5 }
 0x3ae   : > { %v9158_v49 = vpop.permute.xlu2 %3079  ;;  %v3076_v2 = vpop.permute.xlu1 %3075 }
 0x3af   : > { %v2911_v43 = vpop.permute.xlu0 %2910 }
 0x3b0   : > { %v2969_v8 = vsel %vm2960_vm2, %v2911_v43, %v9074_v45  ;;  %v2985_v61 = vsel %vm2960_vm2, %v9074_v45, %v2911_v43 }
 0x3b1   : > { %v3009_v56 = vmax.f32 %v2985_v61, %v8847_v53  ;;  %v3010_v11 = vmax.f32 %v2969_v8, %v8849_v58 }
 0x3b3   : > { %v3138_v16 = vmax.f32 %v3009_v56, %v3098_v48  ;;  %v3139_v62 = vmax.f32 %v3010_v11, %v3114_v44 }
 0x3b5   : > { %v3325_v36 = vrot.slane %v3138_v16, 1  ;;  %v3464_v22 = vrot.slane %v3138_v16, 2  ;;  %v3327_v9 = vrot.slane %v3139_v62, 1  ;;  %v3466_v19 = vrot.slane %v3139_v62, 2 }
 0x3b6   : > { %v2917_v55 = vpop.permute.xlu2 %2916  ;;  %v2913_v21 = vpop.permute.xlu1 %2912 }
 0x3b7   : > { %v2945_v46 = vpop.permute.xlu0 %2944  ;;  %v3326_v43 = vsel %vm2385_vm1, %v3321_v20, %v3325_v36  ;;  %v3465_v53 = vsel %vm3433_vm4, %v3460_v7, %v3464_v22  ;;  %v3328_v58 = vsel %vm2385_vm1, %v3323_v51, %v3327_v9  ;;  %v3467_v45 = vsel %vm3433_vm4, %v3462_v15, %v3466_v19 }
 0x3b8   : > { %v2970_v38 = vsel %vm2960_vm2, %v2913_v21, %v2945_v46  ;;  %v2986_v52 = vsel %vm2960_vm2, %v2945_v46, %v2913_v21  ;;  %v3407_v8 = vmax.f32 %v3136_v57, %v3326_v43  ;;  %v3408_v61 = vmax.f32 %v3137_v23, %v3328_v58 }
 0x3b9   : > { %v3011_v56 = vmax.f32 %v2986_v52, %v8872_v40  ;;  %v3012_v11 = vmax.f32 %v2970_v38, %v8861_v24  ;;  %v3099_v20 = vsel %vm3089_vm3, %v9116_v54, %v3076_v2  ;;  %v3115_v7 = vsel %vm3089_vm3, %v3076_v2, %v9116_v54 }
 0x3ba   : > { %v9188_v51 = vmax.f32 %v3407_v8, %v3465_v53  ;;  %v9190_v15 = vmax.f32 %v3408_v61, %v3467_v45 }
 0x3bb   : > { %v3140_v48 = vmax.f32 %v3011_v56, %v3099_v20  ;;  %v3141_v21 = vmax.f32 %v3012_v11, %v3115_v7 }
 0x3bc   : > { %10899 = vst [vmem:[#allocation21_spill] sm:$0xff] %v9188_v51 }
 0x3bd   : > { %10900 = vst [vmem:[#allocation22_spill] sm:$0xff] %v9190_v15  ;;  %v3329_v40 = vrot.slane %v3140_v48, 1  ;;  %v3468_v57 = vrot.slane %v3140_v48, 2  ;;  %v3331_v23 = vrot.slane %v3141_v21, 1  ;;  %v3470_v44 = vrot.slane %v3141_v21, 2 }
 0x3be   : > { %v3078_v43 = vpop.permute.xlu1 %3077  ;;  %v3082_v58 = vpop.permute.xlu2 %3081 }
 0x3bf   : > { %v2947_v38 = vpop.permute.xlu0 %2946  ;;  %v3330_v54 = vsel %vm2385_vm1, %v3325_v36, %v3329_v40  ;;  %v3469_v2 = vsel %vm3433_vm4, %v3464_v22, %v3468_v57  ;;  %v3332_v45 = vsel %vm2385_vm1, %v3327_v9, %v3331_v23  ;;  %v3471_v52 = vsel %vm3433_vm4, %v3466_v19, %v3470_v44 }
 0x3c0   : > { %v3409_v53 = vmax.f32 %v3138_v16, %v3330_v54  ;;  %v3410_v8 = vmax.f32 %v3139_v62, %v3332_v45  ;;  %v3100_v62 = vsel %vm3089_vm3, %v9148_v41, %v3078_v43  ;;  %v3116_v9 = vsel %vm3089_vm3, %v3078_v43, %v9148_v41 }
 0x3c2   : > { %v9200_v61 = vmax.f32 %v3409_v53, %v3469_v2  ;;  %v9202_v56 = vmax.f32 %v3410_v8, %v3471_v52 }
 0x3c4   : > { %10901 = vst [vmem:[#allocation23_spill] sm:$0xff] %v9202_v56 }
 0x3c6   : > { %v2915_v11 = vpop.permute.xlu1 %2914  ;;  %v2919_v19 = vpop.permute.xlu2 %2918 }
 0x3c7   : > { %v2971_v20 = vsel %vm2960_vm2, %v2915_v11, %v2947_v38  ;;  %v2987_v7 = vsel %vm2960_vm2, %v2947_v38, %v2915_v11  ;;  %v3048_v36 = vpop.permute.xlu0 %3047 }
 0x3c8   : > { %v3013_v22 = vmax.f32 %v2987_v7, %v8888_v25  ;;  %v3014_v16 = vmax.f32 %v2971_v20, %v8890_v33 }
 0x3ca   : > { %v9216_v54 = vmax.f32 %v3013_v22, %v3100_v62  ;;  %v9218_v2 = vmax.f32 %v3014_v16, %v3116_v9  ;;  %v3101_v62 = vsel %vm3089_vm3, %v3048_v36, %v9158_v49 }
 0x3cc   : > { %v3333_v38 = vrot.slane %v9216_v54, 1  ;;  %v3472_v53 = vrot.slane %v9216_v54, 2  ;;  %v3335_v25 = vrot.slane %v9218_v2, 1  ;;  %v3474_v33 = vrot.slane %v9218_v2, 2 }
 0x3ce   : > { %v2949_v45 = vpop.permute.xlu1 %2948  ;;  %v3334_v52 = vsel %vm2385_vm1, %v3329_v40, %v3333_v38  ;;  %v3336_v41 = vsel %vm2385_vm1, %v3331_v23, %v3335_v25  ;;  %v3473_v40 = vsel %vm3433_vm4, %v3468_v57, %v3472_v53  ;;  %v3475_v23 = vsel %vm3433_vm4, %v3470_v44, %v3474_v33  ;;  %v2953_v57 = vpop.permute.xlu2 %2952 }
 0x3cf   : > { %v2972_v43 = vsel %vm2960_vm2, %v2917_v55, %v2949_v45  ;;  %v2988_v8 = vsel %vm2960_vm2, %v2949_v45, %v2917_v55  ;;  %v3050_v11 = vpop.permute.xlu0 %3049  ;;  %v3411_v20 = vmax.f32 %v3140_v48, %v3334_v52  ;;  %v3412_v7 = vmax.f32 %v3141_v21, %v3336_v41 }
 0x3d0   : > { %v3015_v22 = vmax.f32 %v2988_v8, %v8903_v34  ;;  %v3016_v16 = vmax.f32 %v2972_v43, %v8900_v37  ;;  %v3117_v55 = vsel %vm3089_vm3, %v9158_v49, %v3048_v36  ;;  %v3102_v8 = vsel %vm3089_vm3, %v3050_v11, %v3082_v58 }
 0x3d1   : > { %v9248_v48 = vmax.f32 %v3411_v20, %v3473_v40  ;;  %v9250_v34 = vmax.f32 %v3412_v7, %v3475_v23  ;;  %v3118_v20 = vsel %vm3089_vm3, %v3082_v58, %v3050_v11 }
 0x3d2   : > { %v9252_v37 = vmax.f32 %v3015_v22, %v3101_v62  ;;  %v9254_v21 = vmax.f32 %v3016_v16, %v3117_v55 }
 0x3d3   : > { %10902 = vst [vmem:[#allocation24_spill] sm:$0xff] %v9250_v34 }
 0x3d6   : > { %v2951_v45 = vpop.permute.xlu1 %2950  ;;  %v3054_v16 = vpop.permute.xlu2 %3053 }
 0x3d7   : > { %v2973_v52 = vsel %vm2960_vm2, %v2919_v19, %v2951_v45  ;;  %v2989_v49 = vsel %vm2960_vm2, %v2951_v45, %v2919_v19  ;;  %v3084_v36 = vpop.permute.xlu0 %3083 }
 0x3d8   : > { %v3017_v41 = vmax.f32 %v2989_v49, %v8916_v63  ;;  %v3018_v43 = vmax.f32 %v2973_v52, %v8929_v18 }
 0x3da   : > { %v9270_v7 = vmax.f32 %v3017_v41, %v3102_v8  ;;  %v9272_v22 = vmax.f32 %v3018_v43, %v3118_v20 }
 0x3de   : > { %v3052_v40 = vpop.permute.xlu1 %3051  ;;  %v3056_v49 = vpop.permute.xlu2 %3055 }
 0x3df   : > { %v2921_v23 = vpop.permute.xlu0 %2920  ;;  %v3103_v58 = vsel %vm3089_vm3, %v3052_v40, %v3084_v36  ;;  %v3119_v11 = vsel %vm3089_vm3, %v3084_v36, %v3052_v40  ;;  %v3341_v36 = vrot.slane %v9270_v7, 1  ;;  %v3343_v40 = vrot.slane %v9272_v22, 1 }
 0x3e0   : > { %v2974_v19 = vsel %vm2960_vm2, %v2921_v23, %v2953_v57  ;;  %v2990_v63 = vsel %vm2960_vm2, %v2953_v57, %v2921_v23  ;;  %v3337_v57 = vrot.slane %v9252_v37, 1 }
 0x3e1   : > { %v3019_v18 = vmax.f32 %v2990_v63, %v8945_v60  ;;  %v3020_v62 = vmax.f32 %v2974_v19, %v8931_v3  ;;  %v3339_v60 = vrot.slane %v9254_v21, 1 }
 0x3e3   : > { %v9284_v55 = vmax.f32 %v3019_v18, %v3103_v58  ;;  %v9286_v45 = vmax.f32 %v3020_v62, %v3119_v11  ;;  %v10856_v18 = vrot.slane %v9252_v37, 2  ;;  %v10857_v62 = vrot.slane %v9254_v21, 2  ;;  %v3428_v58 = vld [vmem:[#allocation3 + $0xc0] sm:$0x3] }
 0x3e4   : > { %v3498_v42 = vrot.slane %v3428_v58, 2 }
 0x3e6   : > { %v2955_v52 = vpop.permute.xlu1 %2954  ;;  %v9296_v23 = vpop.permute.xlu2 %3031 }
 0x3e7   : > { %v3086_v41 = vpop.permute.xlu0 %3085 }
 0x3ee   : > { %v2957_v43 = vpop.permute.xlu1 %2956 }
 0x3ef   : > { %v2923_v8 = vpop.permute.xlu0 %2922 }
 0x3f0   : > { %v2975_v3 = vsel %vm2960_vm2, %v2923_v8, %v2955_v52  ;;  %v2991_v20 = vsel %vm2960_vm2, %v2955_v52, %v2923_v8  ;;  %v3104_v52 = vsel %vm3089_vm3, %v3054_v16, %v3086_v41  ;;  %v3120_v8 = vsel %vm3089_vm3, %v3086_v41, %v3054_v16  ;;  %v3258_v41 = vld [vmem:[#allocation3 + $0xa0] sm:$0x1] }
 0x3f1   : > { %v3021_v19 = vmax.f32 %v2991_v20, %v8990_v50  ;;  %v3022_v63 = vmax.f32 %v2975_v3, %v8969_v6  ;;  %v9317_v6 = vsel %vm2385_vm1, %v3333_v38, %v3337_v57  ;;  %v9322_v3 = vsel %vm2385_vm1, %v3335_v25, %v3339_v60  ;;  %v3427_v38 = vld [vmem:[#allocation3 + $0xa0] sm:$0x3] }
 0x3f2   : > { %v9341_v25 = vsel %vm3433_vm4, %v3472_v53, %v10856_v18  ;;  %v3259_v18 = vld [vmem:[#allocation3 + $0xc0] sm:$0x1]  ;;  %v3357_v16 = vrot.slane %v3258_v41, 1  ;;  %v3496_v46 = vrot.slane %v3427_v38, 2 }
 0x3f3   : > { %v9310_v24 = vmax.f32 %v3021_v19, %v3104_v52  ;;  %v9312_v50 = vmax.f32 %v3022_v63, %v3120_v8  ;;  %v9329_v19 = vsel %vm2385_vm1, %v3337_v57, %v3341_v36  ;;  %v9332_v63 = vsel %vm2385_vm1, %v3339_v60, %v3343_v40 }
 0x3f4   : > { %v3345_v52 = vrot.slane %v9284_v55, 1  ;;  %v3347_v8 = vrot.slane %v9286_v45, 1  ;;  %v9348_v57 = vsel %vm3433_vm4, %v3474_v33, %v10857_v62  ;;  %v3359_v1 = vrot.slane %v3259_v18, 1 }
 0x3f5   : > { %v3349_v20 = vrot.slane %v9310_v24, 1  ;;  %v3351_v11 = vrot.slane %v9312_v50, 1  ;;  %v3488_v18 = vrot.slane %v9310_v24, 2 }
 0x3f6   : > { %v3088_v60 = vpop.permute.xlu1 %3087  ;;  %v3346_v5 = vsel %vm2385_vm1, %v3341_v36, %v3345_v52  ;;  %v9370_v15 = vsel %vm2385_vm1, %v3343_v40, %v3347_v8  ;;  %v3486_v40 = vrot.slane %v9286_v45, 2 }
 0x3f7   : > { %v2925_v53 = vpop.permute.xlu0 %2924  ;;  %v3105_v62 = vsel %vm3089_vm3, %v3056_v49, %v3088_v60  ;;  %v3121_v33 = vsel %vm3089_vm3, %v3088_v60, %v3056_v49  ;;  %v3418_v36 = vmax.f32 %v9272_v22, %v9370_v15 }
 0x3f8   : > { %v2976_v9 = vsel %vm2960_vm2, %v2925_v53, %v2957_v43  ;;  %v2992_v44 = vsel %vm2960_vm2, %v2957_v43, %v2925_v53  ;;  %v9376_v43 = vpop.permute.xlu2 %2894 }
 0x3f9   : > { %v3023_v39 = vmax.f32 %v2992_v44, %v9003_v0  ;;  %v3024_v17 = vmax.f32 %v2976_v9, %v8992_v30  ;;  %v3350_v0 = vsel %vm2385_vm1, %v3345_v52, %v3349_v20  ;;  %v3352_v30 = vsel %vm2385_vm1, %v3347_v8, %v3351_v11 }
 0x3fa   : > { %v3417_v44 = vmax.f32 %v9270_v7, %v3346_v5  ;;  %v3484_v9 = vrot.slane %v9284_v55, 2  ;;  %v3419_v52 = vmax.f32 %v9284_v55, %v3350_v0  ;;  %v3420_v5 = vmax.f32 %v9286_v45, %v3352_v30 }
 0x3fb   : > { %v3152_v41 = vmax.f32 %v3023_v39, %v3105_v62  ;;  %v3153_v38 = vmax.f32 %v3024_v17, %v3121_v33  ;;  %v3490_v17 = vrot.slane %v9312_v50, 2  ;;  %v10903_v45 = vmax.f32 %v8965_v35, %v8763_v27 }
 0x3fd   : > { %v3353_v49 = vrot.slane %v3152_v41, 1  ;;  %v3492_v58 = vrot.slane %v3152_v41, 2  ;;  %v3355_v60 = vrot.slane %v3153_v38, 1  ;;  %v3494_v62 = vrot.slane %v3153_v38, 2 }
 0x3fe   : > { %v3030_v39 = vpop.permute.xlu1 %3029 }
 0x3ff   : > { %v3062_v8 = vpop.permute.xlu0 %3061  ;;  %v3354_v53 = vsel %vm2385_vm1, %v3349_v20, %v3353_v49  ;;  %v3358_v15 = vsel %vm2385_vm1, %v3353_v49, %v3357_v16  ;;  %v3493_v33 = vsel %vm3433_vm4, %v3488_v18, %v3492_v58  ;;  %v3497_v29 = vsel %vm3433_vm4, %v3492_v58, %v3496_v46 }
 0x400   : > { %v3092_v51 = vsel %vm3089_vm3, %v3030_v39, %v3062_v8  ;;  %v3108_v56 = vsel %vm3089_vm3, %v3062_v8, %v3030_v39  ;;  %v3421_v34 = vmax.f32 %v9310_v24, %v3354_v53  ;;  %v3423_v55 = vmax.f32 %v3152_v41, %v3358_v15 }
 0x401   : > { %v9401_v0 = vmax.f32 %v10903_v45, %v3092_v51  ;;  %v10904_v20 = vmax.f32 %v8961_v47, %v8754_v28  ;;  %v3356_v46 = vsel %vm2385_vm1, %v3351_v11, %v3355_v60  ;;  %v3360_v30 = vsel %vm2385_vm1, %v3355_v60, %v3359_v1 }
 0x402   : > { %v3560_v49 = vmax.f32 %v3421_v34, %v3493_v33  ;;  %v3562_v58 = vmax.f32 %v3423_v55, %v3497_v29  ;;  %v3422_v39 = vmax.f32 %v9312_v50, %v3356_v46  ;;  %v3424_v24 = vmax.f32 %v3153_v38, %v3360_v30  ;;  %v9417_v29 = vpop.permute.xlu2 %2928 }
 0x403   : > { %v9406_v16 = vmax.f32 %v10904_v20, %v3108_v56  ;;  %3158 = vst [vmem:[#allocation3 + $0x20] sm:$0xff] %v9401_v0  ;;  %v3495_v27 = vsel %vm3433_vm4, %v3490_v17, %v3494_v62  ;;  %v3499_v35 = vsel %vm3433_vm4, %v3494_v62, %v3498_v42  ;;  %v3489_v51 = vsel %vm3433_vm4, %v3484_v9, %v3488_v18 }
 0x404   : > { %v3491_v28 = vsel %vm3433_vm4, %v3486_v40, %v3490_v17  ;;  %v3578_v47 = vpack.c.bf16 %v3562_v58, %v3560_v49  ;;  %v3561_v56 = vmax.f32 %v3422_v39, %v3495_v27  ;;  %v3563_v1 = vmax.f32 %v3424_v24, %v3499_v35 }
 0x405   : > { %3159 = vst [vmem:[#allocation3 + $0x8] sm:$0xff] %v9406_v16  ;;  %v3558_v34 = vmax.f32 %v3419_v52, %v3489_v51  ;;  %v10905_v11 = vrot.slane %v9270_v7, 2  ;;  %v3559_v41 = vmax.f32 %v3420_v5, %v3491_v28  ;;  %v10907_v42 = vrot.slane %v9252_v37, 2 }
 0x406   : > { %v10908_v60 = vrot.slane %v9272_v22, 2  ;;  %v10909_v17 = vrot.slane %v9254_v21, 2  ;;  %v3064_v52 = vpop.permute.xlu1 %3063  ;;  %3604 = vmatpush.bf16.msra.mxu2 %v3578_v47  ;;  %v3579_v8 = vpack.c.bf16 %v3563_v1, %v3561_v56  ;;  %v10911_v7 = vmax.f32 %v9252_v37, %v9329_v19 }
 0x407   : > { %v3485_v50 = vsel %vm3433_vm4, %v10905_v11, %v3484_v9  ;;  %v10906_v38 = vmov %v10905_v11  ;;  %v3093_v33 = vsel %vm3089_vm3, %v9296_v23, %v3064_v52  ;;  %v3109_v55 = vsel %vm3089_vm3, %v3064_v52, %v9296_v23  ;;  %v2897_v45 = vpop.permute.xlu0 %2896 }
 0x408   : > { %v3481_v18 = vsel %vm3433_vm4, %v10907_v42, %v10906_v38  ;;  %v3483_v62 = vsel %vm3433_vm4, %v10909_v17, %v10908_v60  ;;  %v3556_v53 = vmax.f32 %v3417_v44, %v3485_v50  ;;  %v10910_v15 = vmov %v10908_v60  ;;  %3633 = vmatpush.bf16.msra.mxu3 %v3579_v8 }
 0x409   : > { %v3487_v9 = vsel %vm3433_vm4, %v10910_v15, %v3486_v40  ;;  %v3554_v5 = vmax.f32 %v10911_v7, %v3481_v18  ;;  %v10912_v44 = vmax.f32 %v9254_v21, %v9332_v63  ;;  %v10913_v40 = vmax.f32 %v8988_v10, %v8771_v32 }
 0x40a   : > { %v3557_v20 = vmax.f32 %v3418_v36, %v3487_v9  ;;  %v10914_v37 = vmax.f32 %v8984_v26, %v8773_v13  ;;  %v3576_v30 = vpack.c.bf16 %v3558_v34, %v3556_v53  ;;  %v10915_v23 = vmax.f32 %v9216_v54, %v9317_v6  ;;  %v3058_v18 = vpop.permute.xlu2 %3057 }
 0x40b   : > { %v3555_v22 = vmax.f32 %v10912_v44, %v3483_v62  ;;  %v3128_v46 = vmax.f32 %v10913_v40, %v3093_v33  ;;  %v10916_v21 = vmax.f32 %v9218_v2, %v9322_v3  ;;  %v3301_v32 = vrot.slane %v9401_v0, 1  ;;  %v10923_v40 = vld [vmem:[#allocation23_spill] sm:$0xff] }
 0x40c   : > { %v3129_v19 = vmax.f32 %v10914_v37, %v3109_v55  ;;  %v3552_v49 = vmax.f32 %v10915_v23, %v9341_v25  ;;  %v3577_v36 = vpack.c.bf16 %v3559_v41, %v3557_v20  ;;  %v3440_v10 = vrot.slane %v9401_v0, 2  ;;  %3605 = vmatpush.bf16.msra.mxu2 %v3576_v30  ;;  %v10926_v30 = vld [vmem:[#allocation19_spill] sm:$0xff] }
 0x40d   : > { %v3553_v63 = vmax.f32 %v10916_v21, %v9348_v57  ;;  %3160 = vst [vmem:[#allocation3 + $0x70] sm:$0xff] %v3128_v46  ;;  %v3305_v13 = vrot.slane %v3128_v46, 1  ;;  %v3444_v26 = vrot.slane %v3128_v46, 2  ;;  %v3303_v6 = vrot.slane %v9406_v16, 1 }
 0x40e   : > { %v3307_v58 = vrot.slane %v3129_v19, 1  ;;  %v3446_v39 = vrot.slane %v3129_v19, 2  ;;  %3161 = vst [vmem:[#allocation3 + $0x78] sm:$0xff] %v3129_v19  ;;  %v3574_v24 = vpack.c.bf16 %v3554_v5, %v3552_v49  ;;  %v3442_v25 = vrot.slane %v9406_v16, 2  ;;  %3634 = vmatpush.bf16.msra.mxu3 %v3577_v36  ;;  %v2927_v11 = vpop.permute.xlu1 %2926  ;;  %v10929_v49 = vld [vmem:[#allocation14_spill] sm:$0xff] }
 0x40f   : > { %v3575_v54 = vpack.c.bf16 %v3555_v22, %v3553_v63  ;;  %v3306_v2 = vsel %vm2385_vm1, %v3301_v32, %v3305_v13  ;;  %v10917_v3 = vrot.slane %v9027_v4, 1  ;;  %v3445_v27 = vsel %vm3433_vm4, %v3440_v10, %v3444_v26  ;;  %v3026_v62 = vpop.permute.xlu0 %3025  ;;  %v10922_v22 = vld [vmem:[#allocation24_spill] sm:$0xff] }
 0x410   : > { %v10918_v35 = vrot.slane %v9027_v4, 2  ;;  %v3397_v28 = vmax.f32 %v9401_v0, %v3306_v2  ;;  %v3308_v56 = vsel %vm2385_vm1, %v3303_v6, %v3307_v58  ;;  %v10919_v1 = vrot.slane %v9029_v12, 1  ;;  %3606 = vmatpush.bf16.msra.mxu2 %v3574_v24  ;;  %v10933_v24 = vld [vmem:[#allocation17_spill] sm:$0xff]  ;;  %v6957_v0 = vld [vmem:[%s10835_s5] sm:$0xff] }
 0x411   : > { %v3310_v57 = vsel %vm2385_vm1, %v3305_v13, %v10917_v3  ;;  %v3398_v50 = vmax.f32 %v9406_v16, %v3308_v56  ;;  %v3447_v4 = vsel %vm3433_vm4, %v3442_v25, %v3446_v39  ;;  %v10920_v38 = vrot.slane %v9029_v12, 2  ;;  %v10931_v13 = vld [vmem:[#allocation20_spill] sm:$0xff]  ;;  %v6959_v16 = vld [vmem:[%s10835_s5 + $0x10] sm:$0xff] }
 0x412   : > { %v3449_v51 = vsel %vm3433_vm4, %v3444_v26, %v10918_v35  ;;  %v3399_v47 = vmax.f32 %v3128_v46, %v3310_v57  ;;  %v3312_v34 = vsel %vm2385_vm1, %v3307_v58, %v10919_v1  ;;  %v2961_v60 = vsel %vm2960_vm2, %v9376_v43, %v2927_v11  ;;  %3635 = vmatpush.bf16.msra.mxu3 %v3575_v54  ;;  %v10934_v54 = vld [vmem:[#allocation15_spill] sm:$0xff]  ;;  %v10936_v35 = vld [vmem:[#allocation18_spill] sm:$0xff] }
 0x413   : > { %v3400_v41 = vmax.f32 %v3129_v19, %v3312_v34  ;;  %v3451_v42 = vsel %vm3433_vm4, %v3446_v39, %v10920_v38  ;;  %v2977_v17 = vsel %vm2960_vm2, %v2927_v11, %v9376_v43  ;;  %v3536_v52 = vmax.f32 %v3397_v28, %v3445_v27  ;;  %v10925_v19 = vld [vmem:[#allocation21_spill] sm:$0xff] }
 0x414   : > { %v3538_v8 = vmax.f32 %v3399_v47, %v3449_v51  ;;  %v2993_v53 = vmax.f32 %v2977_v17, %v9057_v14  ;;  %v2994_v15 = vmax.f32 %v2961_v60, %v9106_v59  ;;  %v3090_v12 = vsel %vm3089_vm3, %v3026_v62, %v3058_v18  ;;  %v10937_v51 = vld [vmem:[#allocation13_spill] sm:$0xff] }
 0x415   : > { %v3106_v9 = vsel %vm3089_vm3, %v3058_v18, %v3026_v62  ;;  %v3537_v5 = vmax.f32 %v3398_v50, %v3447_v4  ;;  %v3539_v33 = vmax.f32 %v3400_v41, %v3451_v42  ;;  %v10921_v43 = vpack.c.bf16 %v9248_v48, %v9200_v61  ;;  %v10928_v48 = vld [vmem:[#allocation16_spill] sm:$0xff] }
 0x416   : > { %v3566_v7 = vpack.c.bf16 %v3538_v8, %v3536_v52  ;;  %v3122_v55 = vmax.f32 %v2993_v53, %v3090_v12  ;;  %v3123_v20 = vmax.f32 %v2994_v15, %v3106_v9  ;;  %v2962_v14 = vsel %vm2960_vm2, %v2897_v45, %v9417_v29  ;;  %v3028_v37 = vpop.permute.xlu1 %3027 }
 0x417   : > { %3607 = vmatpush.bf16.msra.mxu2 %v10921_v43  ;;  %v3567_v44 = vpack.c.bf16 %v3539_v33, %v3537_v5  ;;  %v2978_v59 = vsel %vm2960_vm2, %v9417_v29, %v2897_v45  ;;  %v10924_v46 = vpack.c.bf16 %v10922_v22, %v10923_v40  ;;  %v10927_v61 = vpack.c.bf16 %v10925_v19, %v10926_v30  ;;  %v3060_v21 = vpop.permute.xlu0 %3059  ;;  %v10930_v45 = vld [vmem:[#allocation22_spill] sm:$0xff]  ;;  %v7007_v40 = vld [vmem:[%s10836_s6 + $0x174] sm:$0xf] }
 0x418   : > { %3154 = vst [vmem:[#allocation3] sm:$0xff] %v3122_v55  ;;  %v2995_v23 = vmax.f32 %v2978_v59, %v10928_v48  ;;  %v2996_v36 = vmax.f32 %v2962_v14, %v10929_v49  ;;  %v3091_v63 = vsel %vm3089_vm3, %v3028_v37, %v3060_v21  ;;  %v3107_v29 = vsel %vm3089_vm3, %v3060_v21, %v3028_v37  ;;  %v6424_v14 = vld [vmem:[%s10836_s6 + $0x1f0] sm:$0xf]  ;;  %v7024_v22 = vld [vmem:[%s10836_s6 + $0x1f4] sm:$0xf0] }
 0x419   : > { %3636 = vmatpush.bf16.msra.mxu3 %v10924_v46  ;;  %3155 = vst [vmem:[#allocation3 + $0x38] sm:$0xff] %v3123_v20  ;;  %v10932_v26 = vpack.c.bf16 %v10930_v45, %v10931_v13  ;;  %v10935_v2 = vpack.c.bf16 %v10933_v24, %v10934_v54  ;;  %v10938_v28 = vpack.c.bf16 %v10936_v35, %v10937_v51  ;;  %v6362_v46 = vld [vmem:[%s10836_s6 + $0x178] sm:$0xf0]  ;;  %v7023_v30 = vld [vmem:[%s10836_s6 + $0x1f4] sm:$0xf] }
 0x41a   : > { %v3124_v58 = vmax.f32 %v2995_v23, %v3091_v63  ;;  %v3125_v39 = vmax.f32 %v2996_v36, %v3107_v29  ;;  %v6425_v37 = vor.u32 %v7024_v22, %v6424_v14  ;;  %v6365_v19 = vor.u32 %v7007_v40, %v6362_v46  ;;  %v6352_v23 = vld [vmem:[%s10836_s6 + $0x160] sm:$0xf]  ;;  %v7006_v49 = vld [vmem:[%s10836_s6 + $0x164] sm:$0xf0]  ;;  %v7005_v29 = vld [vmem:[%s10836_s6 + $0x164] sm:$0xf] }
 0x41b   : > { %3608 = vmatpush.bf16.msra.mxu2 %v10927_v61  ;;  %v6426_v61 = vld [vmem:[%s10836_s6 + $0x1f8] sm:$0xf0]  ;;  %v6416_v36 = vld [vmem:[%s10836_s6 + $0x1e0] sm:$0xf]  ;;  %v6353_v21 = vor.u32 %v7006_v49, %v6352_v23  ;;  %v7022_v63 = vld [vmem:[%s10836_s6 + $0x1e4] sm:$0xf0] }
 0x41c   : > { %3156 = vst [vmem:[#allocation3 + $0xf8] sm:$0xff] %v3124_v58  ;;  %v3296_v57 = vrot.slane %v3124_v58, 1  ;;  %v3435_v1 = vrot.slane %v3124_v58, 2  ;;  %v3299_v41 = vrot.slane %v3125_v39, 1  ;;  %v3438_v38 = vrot.slane %v3125_v39, 2  ;;  %4093 = vmatpush.bf16.msrb.mxu0 %v6365_v19 }
 0x41d   : > { %3637 = vmatpush.bf16.msra.mxu3 %v10932_v26  ;;  %3157 = vst [vmem:[#allocation3 + $0x58] sm:$0xff] %v3125_v39  ;;  %v6429_v48 = vor.u32 %v7023_v30, %v6426_v61  ;;  %v6354_v45 = vld [vmem:[%s10836_s6 + $0x168] sm:$0xf0]  ;;  %v6417_v13 = vor.u32 %v7022_v63, %v6416_v36  ;;  %v6344_v54 = vld [vmem:[%s10836_s6 + $0x150] sm:$0xf] }
 0x41e   : > { %v3302_v11 = vsel %vm2385_vm1, %v3296_v57, %v3301_v32  ;;  %v3304_v62 = vsel %vm2385_vm1, %v3299_v41, %v3303_v6  ;;  %v3441_v32 = vsel %vm3433_vm4, %v3435_v1, %v3440_v10  ;;  %v3443_v5 = vsel %vm3433_vm4, %v3438_v38, %v3442_v25  ;;  %v6958_v10 = vld [vmem:[%s10835_s5 + $0x8] sm:$0xff]  ;;  %v6960_v25 = vld [vmem:[%s10835_s5 + $0x18] sm:$0xff]  ;;  %v7003_v35 = vld [vmem:[%s10836_s6 + $0x154] sm:$0xf] }
 0x41f   : > { %3609 = vmatpush.bf16.msra.mxu2 %v10935_v2  ;;  %v3226_v3 = vld [vmem:[#allocation3] sm:$0xfe]  ;;  %v3395_v18 = vmax.f32 %v3124_v58, %v3302_v11  ;;  %v3396_v15 = vmax.f32 %v3125_v39, %v3304_v62  ;;  %4122 = vmatpush.bf16.msrb.mxu1 %v6429_v48  ;;  %v6357_v26 = vor.u32 %v7005_v29, %v6354_v45  ;;  %v7021_v58 = vld [vmem:[%s10836_s6 + $0x1e4] sm:$0xf]  ;;  %v7004_v2 = vld [vmem:[%s10836_s6 + $0x154] sm:$0xf0] }
 0x420   : > { %v3425_v27 = vld [vmem:[#allocation3] sm:$0xfc]  ;;  %v3295_v47 = vrot.slane %v3226_v3, 1  ;;  %v3227_v34 = vld [vmem:[#allocation3 + $0x38] sm:$0xfe] }
 0x421   : > { %3638 = vmatpush.bf16.msra.mxu3 %v10938_v28  ;;  %v3434_v56 = vrot.slane %v3425_v27, 2  ;;  %v3298_v50 = vrot.slane %v3227_v34, 1  ;;  %v3426_v4 = vld [vmem:[#allocation3 + $0x38] sm:$0xfc]  ;;  %v3534_v9 = vmax.f32 %v3395_v18, %v3441_v32  ;;  %v3535_v6 = vmax.f32 %v3396_v15, %v3443_v5  ;;  %v6418_v39 = vld [vmem:[%s10836_s6 + $0x1e8] sm:$0xf0]  ;;  %4094 = vmatpush.bf16.msrb.mxu0 %v6357_v26 }
 0x422   : > { %v3297_v42 = vsel %vm2385_vm1, %v3295_v47, %v3296_v57  ;;  %v3437_v52 = vrot.slane %v3426_v4, 2  ;;  %v6421_v24 = vor.u32 %v7021_v58, %v6418_v39  ;;  %v6408_v3 = vld [vmem:[%s10836_s6 + $0x1d0] sm:$0xf]  ;;  %v6345_v57 = vor.u32 %v7004_v2, %v6344_v54  ;;  %v7020_v27 = vld [vmem:[%s10836_s6 + $0x1d4] sm:$0xf0] }
 0x423   : > { %3610 = vmatpush.bf16.msra.mxu2 %v3566_v7  ;;  %v3393_v60 = vmax.f32 %v3122_v55, %v3297_v42  ;;  %v3300_v17 = vsel %vm2385_vm1, %v3298_v50, %v3299_v41  ;;  %v3436_v8 = vsel %vm3433_vm4, %v3434_v56, %v3435_v1  ;;  %v6346_v51 = vld [vmem:[%s10836_s6 + $0x158] sm:$0xf0]  ;;  %v6409_v28 = vor.u32 %v7020_v27, %v6408_v3  ;;  %v7019_v56 = vld [vmem:[%s10836_s6 + $0x1d4] sm:$0xf]  ;;  %v6336_v11 = vld [vmem:[%s10836_s6 + $0x140] sm:$0xf] }
 0x424   : > { %v3394_v53 = vmax.f32 %v3123_v20, %v3300_v17  ;;  %v3439_v7 = vsel %vm3433_vm4, %v3437_v52, %v3438_v38  ;;  %v6360_v20 = vld [vmem:[%s10836_s6 + $0x170] sm:$0xf]  ;;  %4123 = vmatpush.bf16.msrb.mxu1 %v6421_v24  ;;  %v6349_v47 = vor.u32 %v7003_v35, %v6346_v51  ;;  %v6410_v1 = vld [vmem:[%s10836_s6 + $0x1d8] sm:$0xf0]  ;;  %v7002_v50 = vld [vmem:[%s10836_s6 + $0x144] sm:$0xf0] }
 0x425   : > { %3639 = vmatpush.bf16.msra.mxu3 %v3567_v44  ;;  %v3532_v12 = vmax.f32 %v3393_v60, %v3436_v8  ;;  %v7008_v44 = vld [vmem:[%s10836_s6 + $0x174] sm:$0xf0]  ;;  %v6413_v34 = vor.u32 %v7019_v56, %v6410_v1  ;;  %v6400_v41 = vld [vmem:[%s10836_s6 + $0x1c0] sm:$0xf]  ;;  %v6337_v4 = vor.u32 %v7002_v50, %v6336_v11  ;;  %v7018_v38 = vld [vmem:[%s10836_s6 + $0x1c4] sm:$0xf0] }
 0x426   : > { %v3533_v33 = vmax.f32 %v3394_v53, %v3439_v7  ;;  %v6361_v59 = vor.u32 %v7008_v44, %v6360_v20  ;;  %4095 = vmatpush.bf16.msrb.mxu0 %v6349_v47  ;;  %v7001_v42 = vld [vmem:[%s10836_s6 + $0x144] sm:$0xf]  ;;  %v6338_v18 = vld [vmem:[%s10836_s6 + $0x148] sm:$0xf0]  ;;  %v6401_v60 = vor.u32 %v7018_v38, %v6400_v41  ;;  %v6328_v32 = vld [vmem:[%s10836_s6 + $0x130] sm:$0xf] }
 0x427   : > { %v3564_v55 = vpack.c.bf16 %v3534_v9, %v3532_v12  ;;  %v6341_v17 = vor.u32 %v7001_v42, %v6338_v18  ;;  %v7017_v62 = vld [vmem:[%s10836_s6 + $0x1c4] sm:$0xf]  ;;  %v6402_v52 = vld [vmem:[%s10836_s6 + $0x1c8] sm:$0xf0]  ;;  %v7000_v53 = vld [vmem:[%s10836_s6 + $0x134] sm:$0xf0] }
 0x428   : > { %v3565_v43 = vpack.c.bf16 %v3535_v6, %v3533_v33  ;;  %4124 = vmatpush.bf16.msrb.mxu1 %v6413_v34  ;;  %v6405_v8 = vor.u32 %v7017_v62, %v6402_v52  ;;  %v6392_v15 = vld [vmem:[%s10836_s6 + $0x1b0] sm:$0xf]  ;;  %v6329_v12 = vor.u32 %v7000_v53, %v6328_v32  ;;  %v7016_v9 = vld [vmem:[%s10836_s6 + $0x1b4] sm:$0xf0]  ;;  %v6999_v7 = vld [vmem:[%s10836_s6 + $0x134] sm:$0xf] }
 0x429   : > { %3611 = vmatpush.bf16.msra.mxu2 %v3564_v55  ;;  %v6330_v5 = vld [vmem:[%s10836_s6 + $0x138] sm:$0xf0]  ;;  %v6393_v33 = vor.u32 %v7016_v9, %v6392_v15  ;;  %v7015_v55 = vld [vmem:[%s10836_s6 + $0x1b4] sm:$0xf]  ;;  %v7014_v44 = vld [vmem:[%s10836_s6 + $0x1a4] sm:$0xf0] }
 0x42a   : > { %3640 = vmatpush.bf16.msra.mxu3 %v3565_v43  ;;  %4096 = vmatpush.bf16.msrb.mxu0 %v6341_v17  ;;  %v6333_v6 = vor.u32 %v6999_v7, %v6330_v5  ;;  %v6394_v43 = vld [vmem:[%s10836_s6 + $0x1b8] sm:$0xf0]  ;;  %v6997_v14 = vld [vmem:[%s10836_s6 + $0x124] sm:$0xf]  ;;  %v6312_v30 = vld [vmem:[%s10836_s6 + $0x110] sm:$0xf] }
 0x42b   : > { %v7013_v46 = vld [vmem:[%s10836_s6 + $0x1a4] sm:$0xf]  ;;  %v6996_v61 = vld [vmem:[%s10836_s6 + $0x114] sm:$0xf0]  ;;  %v6376_v48 = vld [vmem:[%s10836_s6 + $0x190] sm:$0xf] }
 0x42c   : > { %3612 = vmatmul.bf16.vlgmr.msra.gmra.mxu2 %v6957_v0  ;;  %4125 = vmatpush.bf16.msrb.mxu1 %v6405_v8  ;;  %v6313_v23 = vor.u32 %v6996_v61, %v6312_v30  ;;  %v7012_v49 = vld [vmem:[%s10836_s6 + $0x194] sm:$0xf0]  ;;  %v6995_v36 = vld [vmem:[%s10836_s6 + $0x114] sm:$0xf]  ;;  %v6304_v58 = vld [vmem:[%s10836_s6 + $0x100] sm:$0xf] }
 0x42d   : > { %3641 = vmatmul.bf16.vlgmr.msra.gmra.mxu3 %v6957_v0  ;;  %4035 = vmatpush.bf16.msrb.mxu2 %v6361_v59  ;;  %v6397_v0 = vor.u32 %v7015_v55, %v6394_v43  ;;  %v6322_v59 = vld [vmem:[%s10836_s6 + $0x128] sm:$0xf0]  ;;  %v6377_v63 = vor.u32 %v7012_v49, %v6376_v48  ;;  %v7011_v45 = vld [vmem:[%s10836_s6 + $0x194] sm:$0xf]  ;;  %v6994_v39 = vld [vmem:[%s10836_s6 + $0x104] sm:$0xf0] }
 0x42e   : > { %4064 = vmatpush.bf16.msrb.mxu3 %v6425_v37  ;;  %4097 = vmatpush.bf16.msrb.mxu0 %v6333_v6  ;;  %v6325_v40 = vor.u32 %v6997_v14, %v6322_v59  ;;  %v6386_v37 = vld [vmem:[%s10836_s6 + $0x1a8] sm:$0xf0]  ;;  %v6368_v24 = vld [vmem:[%s10836_s6 + $0x180] sm:$0xf]  ;;  %v6305_v2 = vor.u32 %v6994_v39, %v6304_v58  ;;  %v7010_v3 = vld [vmem:[%s10836_s6 + $0x184] sm:$0xf0] }
 0x42f   : > { %v6389_v19 = vor.u32 %v7013_v46, %v6386_v37  ;;  %v6306_v27 = vld [vmem:[%s10836_s6 + $0x108] sm:$0xf0]  ;;  %v6369_v51 = vor.u32 %v7010_v3, %v6368_v24  ;;  %v7009_v47 = vld [vmem:[%s10836_s6 + $0x184] sm:$0xf]  ;;  %v6552_v14 = vld [vmem:[%s10836_s6 + $0xf0] sm:$0xf] }
 0x430   : > { %4126 = vmatpush.bf16.msrb.mxu1 %v6397_v0  ;;  %v6370_v56 = vld [vmem:[%s10836_s6 + $0x188] sm:$0xf0]  ;;  %v6490_v46 = vld [vmem:[%s10836_s6 + $0x78] sm:$0xf0]  ;;  %v6991_v30 = vld [vmem:[%s10836_s6 + $0xf4] sm:$0xf] }
 0x431   : > { %4036 = vmatpush.bf16.msrb.mxu2 %v6353_v21  ;;  %v6314_v21 = vld [vmem:[%s10836_s6 + $0x118] sm:$0xf0]  ;;  %v6373_v1 = vor.u32 %v7009_v47, %v6370_v56  ;;  %v6480_v48 = vld [vmem:[%s10836_s6 + $0x60] sm:$0xf]  ;;  %v6974_v49 = vld [vmem:[%s10836_s6 + $0x64] sm:$0xf0] }
 0x432   : > { %4065 = vmatpush.bf16.msrb.mxu3 %v6417_v13  ;;  %4098 = vmatpush.bf16.msrb.mxu0 %v6325_v40  ;;  %v6317_v29 = vor.u32 %v6995_v36, %v6314_v21  ;;  %v6378_v13 = vld [vmem:[%s10836_s6 + $0x198] sm:$0xf0]  ;;  %v6975_v40 = vld [vmem:[%s10836_s6 + $0x74] sm:$0xf]  ;;  %v6544_v36 = vld [vmem:[%s10836_s6 + $0xe0] sm:$0xf] }
 0x433   : > { %v6381_v26 = vor.u32 %v7011_v45, %v6378_v13  ;;  %v6554_v61 = vld [vmem:[%s10836_s6 + $0xf8] sm:$0xf0]  ;;  %v6990_v21 = vld [vmem:[%s10836_s6 + $0xe4] sm:$0xf0]  ;;  %v6973_v45 = vld [vmem:[%s10836_s6 + $0x64] sm:$0xf] }
 0x434   : > { %4127 = vmatpush.bf16.msrb.mxu1 %v6389_v19  ;;  %v6493_v19 = vor.u32 %v6975_v40, %v6490_v46  ;;  %v6482_v13 = vld [vmem:[%s10836_s6 + $0x68] sm:$0xf0]  ;;  %v6472_v24 = vld [vmem:[%s10836_s6 + $0x50] sm:$0xf]  ;;  %v6474_v56 = vld [vmem:[%s10836_s6 + $0x58] sm:$0xf0] }
 0x435   : > { %4037 = vmatpush.bf16.msrb.mxu2 %v6345_v57  ;;  %v6993_v57 = vld [vmem:[%s10836_s6 + $0x104] sm:$0xf]  ;;  %v6485_v58 = vor.u32 %v6973_v45, %v6482_v13  ;;  %v6546_v39 = vld [vmem:[%s10836_s6 + $0xe8] sm:$0xf0]  ;;  %v6448_v45 = vld [vmem:[%s10836_s6 + $0x20] sm:$0xf] }
 0x436   : > { %4066 = vmatpush.bf16.msrb.mxu3 %v6409_v28  ;;  %4099 = vmatpush.bf16.msrb.mxu0 %v6317_v29  ;;  %v6309_v28 = vor.u32 %v6993_v57, %v6306_v27  ;;  %v6545_v29 = vor.u32 %v6990_v21, %v6544_v36  ;;  %v6536_v57 = vld [vmem:[%s10836_s6 + $0xd0] sm:$0xf]  ;;  %v6988_v27 = vld [vmem:[%s10836_s6 + $0xd4] sm:$0xf0] }
 0x438   : > { %4128 = vmatpush.bf16.msrb.mxu1 %v6381_v26  ;;  %v6989_v26 = vld [vmem:[%s10836_s6 + $0xe4] sm:$0xf] }
 0x439   : > { %4038 = vmatpush.bf16.msrb.mxu2 %v6337_v4  ;;  %v6549_v3 = vor.u32 %v6989_v26, %v6546_v39  ;;  %v6966_v26 = vld [vmem:[%s10836_s6 + $0x24] sm:$0xf0] }
 0x43a   : > { %4067 = vmatpush.bf16.msrb.mxu3 %v6401_v60  ;;  %4100 = vmatpush.bf16.msrb.mxu0 %v6309_v28  ;;  %v6982_v39 = vld [vmem:[%s10836_s6 + $0xa4] sm:$0xf0] }
 0x43c   : > { %3617 = vmatmul.bf16.gmra.mxu2 %v6958_v10  ;;  %4129 = vmatpush.bf16.msrb.mxu1 %v6373_v1  ;;  %v6987_v1 = vld [vmem:[%s10836_s6 + $0xd4] sm:$0xf] }
 0x43d   : > { %3646 = vmatmul.bf16.gmra.mxu3 %v6958_v10  ;;  %4039 = vmatpush.bf16.msrb.mxu2 %v6329_v12  ;;  %v6320_v10 = vld [vmem:[%s10836_s6 + $0x120] sm:$0xf] }
 0x43e   : > { %4068 = vmatpush.bf16.msrb.mxu3 %v6393_v33  ;;  %4369 = vmatpush.bf16.msra.mxu0 %v6493_v19  ;;  %v6968_v19 = vld [vmem:[%s10836_s6 + $0x34] sm:$0xf0] }
 0x442   : > { %4370 = vmatpush.bf16.msra.mxu0 %v6485_v58  ;;  %v6512_v58 = vld [vmem:[%s10836_s6 + $0xa0] sm:$0xf] }
 0x44c   : > { %3622 = vmatmul.bf16.gmra.mxu2 %v6959_v16 }
 0x44d   : > { %3651 = vmatmul.bf16.gmra.mxu3 %v6959_v16  ;;  %v6998_v16 = vld [vmem:[%s10836_s6 + $0x124] sm:$0xf0] }
 0x44e   : > { %v6321_v20 = vor.u32 %v6998_v16, %v6320_v10 }
 0x450   : > { %4040 = vmatpush.bf16.msrb.mxu2 %v6321_v20  ;;  %v6488_v20 = vld [vmem:[%s10836_s6 + $0x70] sm:$0xf] }
 0x454   : > { %4041 = vmatpush.bf16.msrb.mxu2 %v6313_v23  ;;  %v6557_v23 = vor.u32 %v6991_v30, %v6554_v61  ;;  %v6520_v30 = vld [vmem:[%s10836_s6 + $0xb0] sm:$0xf] }
 0x456   : > { %4398 = vmatpush.bf16.msra.mxu1 %v6557_v23  ;;  %v6967_v23 = vld [vmem:[%s10836_s6 + $0x34] sm:$0xf] }
 0x458   : > { %4042 = vmatpush.bf16.msrb.mxu2 %v6305_v2  ;;  %v6972_v2 = vld [vmem:[%s10836_s6 + $0x54] sm:$0xf0] }
 0x459   : > { %v6473_v47 = vor.u32 %v6972_v2, %v6472_v24  ;;  %v6965_v24 = vld [vmem:[%s10836_s6 + $0x24] sm:$0xf]  ;;  %v6450_v2 = vld [vmem:[%s10836_s6 + $0x28] sm:$0xf0] }
 0x45a   : > { %4399 = vmatpush.bf16.msra.mxu1 %v6549_v3  ;;  %v6981_v3 = vld [vmem:[%s10836_s6 + $0xa4] sm:$0xf] }
 0x45c   : > { %3627 = vmatmul.bf16.gmra.mxu2 %v6960_v25 }
 0x45d   : > { %3656 = vmatmul.bf16.gmra.mxu3 %v6960_v25  ;;  %v6384_v25 = vld [vmem:[%s10836_s6 + $0x1a0] sm:$0xf] }
 0x45e   : > { %v6385_v22 = vor.u32 %v7014_v44, %v6384_v25  ;;  %v6976_v44 = vld [vmem:[%s10836_s6 + $0x74] sm:$0xf0] }
 0x45f   : > { %v6489_v59 = vor.u32 %v6976_v44, %v6488_v20 }
 0x460   : > { %4069 = vmatpush.bf16.msrb.mxu3 %v6385_v22  ;;  %v6992_v22 = vld [vmem:[%s10836_s6 + $0xf4] sm:$0xf0] }
 0x461   : > { %v6553_v37 = vor.u32 %v6992_v22, %v6552_v14  ;;  %4311 = vmatpush.bf16.msra.mxu2 %v6489_v59 }
 0x464   : > { %4070 = vmatpush.bf16.msrb.mxu3 %v6377_v63  ;;  %v6481_v63 = vor.u32 %v6974_v49, %v6480_v48  ;;  %v6984_v48 = vld [vmem:[%s10836_s6 + $0xb4] sm:$0xf0]  ;;  %v6458_v49 = vld [vmem:[%s10836_s6 + $0x38] sm:$0xf0] }
 0x465   : > { %v6521_v36 = vor.u32 %v6984_v48, %v6520_v30  ;;  %v6461_v21 = vor.u32 %v6967_v23, %v6458_v49 }
 0x466   : > { %4312 = vmatpush.bf16.msra.mxu2 %v6481_v63  ;;  %v6983_v63 = vld [vmem:[%s10836_s6 + $0xb4] sm:$0xf] }
 0x468   : > { %4071 = vmatpush.bf16.msrb.mxu3 %v6369_v51  ;;  %v6971_v51 = vld [vmem:[%s10836_s6 + $0x54] sm:$0xf] }
 0x46a   : > { %4313 = vmatpush.bf16.msra.mxu2 %v6473_v47  ;;  %v6964_v47 = vld [vmem:[%s10836_s6 + $0x14] sm:$0xf0] }
 0x46c   : > { %4340 = vmatpush.bf16.msra.mxu3 %v6553_v37 }
 0x470   : > { %4341 = vmatpush.bf16.msra.mxu3 %v6545_v29  ;;  %v6522_v29 = vld [vmem:[%s10836_s6 + $0xb8] sm:$0xf0] }
 0x471   : > { %v6525_v13 = vor.u32 %v6983_v63, %v6522_v29  ;;  %v3750_v63 = vld [vmem:[#allocation4 + $0x70] sm:$0x1] }
 0x4af   : > { %v9738_v54 = vpop.f32.mrf.mxu2 }
 0x4b0   : > { %3662 = vst [vmem:[#allocation4 + $0x28] sm:$0xff] %v9738_v54  ;;  %v9750_v35 = vpop.f32.mrf.mxu3 }
 0x4b1   : > { %3663 = vst [vmem:[#allocation4 + $0x80] sm:$0xff] %v9750_v35 }
 0x4b7   : > { %v9759_v34 = vpop.f32.mrf.mxu2  ;;  %v3734_v50 = vld [vmem:[#allocation4 + $0x28] sm:$0xfe] }
 0x4b8   : > { %v9761_v11 = vpop.f32.mrf.mxu3  ;;  %v3735_v41 = vld [vmem:[#allocation4 + $0x80] sm:$0xfe]  ;;  %v3785_v42 = vpack.c.bf16 %v9759_v34, %v3734_v50 }
 0x4b9   : > { %v3786_v18 = vpack.c.bf16 %v9761_v11, %v3735_v41  ;;  %v6538_v50 = vld [vmem:[%s10836_s6 + $0xd8] sm:$0xf0] }
 0x4ba   : > { %v3798_v60 = vshll.u32 %v3785_v42, 16  ;;  %v3796_v12 = vshrl.u32 %v3785_v42, 16  ;;  %v6477_v42 = vor.u32 %v6971_v51, %v6474_v56  ;;  %v6514_v51 = vld [vmem:[%s10836_s6 + $0xa8] sm:$0xf0]  ;;  %v6453_v56 = vor.u32 %v6965_v24, %v6450_v2 }
 0x4bb   : > { %v3810_v17 = vshll.u32 %v3786_v18, 16  ;;  %v3808_v7 = vshrl.u32 %v3786_v18, 16  ;;  %v6464_v18 = vld [vmem:[%s10836_s6 + $0x40] sm:$0xf] }
 0x4bc   : > { %v3800_v32 = vrot.slane %v3798_v60, 1  ;;  %4371 = vmatpush.bf16.msra.mxu0 %v6477_v42 }
 0x4bd   : > { %v3812_v15 = vrot.slane %v3810_v17, 1  ;;  %v6541_v17 = vor.u32 %v6987_v1, %v6538_v50  ;;  %v6517_v1 = vor.u32 %v6981_v3, %v6514_v51  ;;  %v6504_v50 = vld [vmem:[%s10836_s6 + $0x90] sm:$0xf]  ;;  %v3726_v51 = vpack.c.bf16 %v9759_v34, %v9738_v54 }
 0x4be   : > { %v3801_v33 = vor.u32 %v3800_v32, %v3796_v12  ;;  %v6986_v32 = vld [vmem:[%s10836_s6 + $0xc4] sm:$0xf0] }
 0x4bf   : > { %v3618_v4 = vpop.f32.mrf.mxu2  ;;  %v3813_v55 = vor.u32 %v3812_v15, %v3808_v7  ;;  %v6466_v7 = vld [vmem:[%s10836_s6 + $0x48] sm:$0xf0]  ;;  %4400 = vmatpush.bf16.msra.mxu1 %v6541_v17  ;;  %v6979_v17 = vld [vmem:[%s10836_s6 + $0x94] sm:$0xf] }
 0x4c0   : > { %v3647_v38 = vpop.f32.mrf.mxu3 }
 0x4c7   : > { %v3620_v62 = vpop.f32.mrf.mxu2 }
 0x4c8   : > { %v3649_v52 = vpop.f32.mrf.mxu3  ;;  %v9765_v8 = vpack.c.bf16 %v3620_v62, %v3618_v4  ;;  %v6970_v62 = vld [vmem:[%s10836_s6 + $0x44] sm:$0xf0] }
 0x4c9   : > { %v9767_v53 = vpack.c.bf16 %v3649_v52, %v3647_v38  ;;  %v6537_v38 = vor.u32 %v6988_v27, %v6536_v57  ;;  %v6528_v52 = vld [vmem:[%s10836_s6 + $0xc0] sm:$0xf]  ;;  %v6465_v44 = vor.u32 %v6970_v62, %v6464_v18  ;;  %v6449_v57 = vor.u32 %v6966_v26, %v6448_v45  ;;  %v6442_v18 = vld [vmem:[%s10836_s6 + $0x18] sm:$0xf0] }
 0x4ca   : > { %v3803_v9 = vshll.u32 %v9765_v8, 16  ;;  %v3819_v15 = vshrl.u32 %v9765_v8, 16  ;;  %v6529_v14 = vor.u32 %v6986_v32, %v6528_v52  ;;  %v6513_v27 = vor.u32 %v6982_v39, %v6512_v58  ;;  %v6506_v62 = vld [vmem:[%s10836_s6 + $0x98] sm:$0xf0] }
 0x4cb   : > { %v3815_v5 = vshll.u32 %v9767_v53, 16  ;;  %4342 = vmatpush.bf16.msra.mxu3 %v6537_v38  ;;  %4314 = vmatpush.bf16.msra.mxu2 %v6465_v44  ;;  %v6963_v38 = vld [vmem:[%s10836_s6 + $0x14] sm:$0xf]  ;;  %v6509_v44 = vor.u32 %v6979_v17, %v6506_v62  ;;  %v6714_v17 = vld [vmem:[%s10836_s6 + $0x2f8] sm:$0xf0] }
 0x4cc   : > { %v9771_v6 = vrot.slane %v3803_v9, 1  ;;  %v6969_v9 = vld [vmem:[%s10836_s6 + $0x44] sm:$0xf]  ;;  %v6640_v62 = vld [vmem:[%s10836_s6 + $0x260] sm:$0xf] }
 0x4cd   : > { %v9773_v43 = vrot.slane %v3815_v5, 1  ;;  %v3827_v5 = vshrl.u32 %v9767_v53, 16  ;;  %v6469_v22 = vor.u32 %v6969_v9, %v6466_v7 }
 0x4ce   : > { %v3806_v0 = vsel %vm1461_vm0, %v3801_v33, %v9771_v6 }
 0x4cf   : > { %v3623_v10 = vpop.f32.mrf.mxu2  ;;  %4043 = vmatmul.bf16.vlgmr.msrb.gmra.mxu2 %v3806_v0  ;;  %v3818_v16 = vsel %vm1461_vm0, %v3813_v55, %v9773_v43  ;;  %4101 = vmatmul.bf16.vlgmr.msrb.gmra.mxu0 %v3806_v0  ;;  %v6985_v55 = vld [vmem:[%s10836_s6 + $0xc4] sm:$0xf]  ;;  %v6530_v0 = vld [vmem:[%s10836_s6 + $0xc8] sm:$0xf0] }
 0x4d0   : > { %v3652_v25 = vpop.f32.mrf.mxu3  ;;  %4072 = vmatmul.bf16.vlgmr.msrb.gmra.mxu3 %v3818_v16  ;;  %4130 = vmatmul.bf16.vlgmr.msrb.gmra.mxu1 %v3818_v16  ;;  %v6533_v40 = vor.u32 %v6985_v55, %v6530_v0  ;;  %v6978_v55 = vld [vmem:[%s10836_s6 + $0x84] sm:$0xf0] }
 0x4d1   : > { %4343 = vmatpush.bf16.msra.mxu3 %v6529_v14  ;;  %4372 = vmatpush.bf16.msra.mxu0 %v6469_v22  ;;  %v6961_v14 = vld [vmem:[%s10836_s6 + $0x4] sm:$0xf] }
 0x4d2   : > { %4401 = vmatpush.bf16.msra.mxu1 %v6533_v40 }
 0x4d5   : > { %4344 = vmatpush.bf16.msra.mxu3 %v6521_v36  ;;  %4373 = vmatpush.bf16.msra.mxu0 %v6461_v21 }
 0x4d6   : > { %4402 = vmatpush.bf16.msra.mxu1 %v6525_v13 }
 0x4d7   : > { %v3625_v28 = vpop.f32.mrf.mxu2 }
 0x4d8   : > { %v3654_v41 = vpop.f32.mrf.mxu3  ;;  %v9851_v4 = vpack.c.bf16 %v3625_v28, %v3623_v10  ;;  %v3821_v10 = vor.u32 %v3819_v15, %v9771_v6  ;;  %v6440_v28 = vld [vmem:[%s10836_s6 + $0x10] sm:$0xf]  ;;  %v6432_v15 = vld [vmem:[%s10836_s6] sm:$0xf] }
 0x4d9   : > { %v9856_v60 = vpack.c.bf16 %v3654_v41, %v3652_v25  ;;  %v3829_v25 = vor.u32 %v3827_v5, %v9773_v43  ;;  %v6456_v43 = vld [vmem:[%s10836_s6 + $0x30] sm:$0xf]  ;;  %v6980_v41 = vld [vmem:[%s10836_s6 + $0x94] sm:$0xf0]  ;;  %4345 = vmatpush.bf16.msra.mxu3 %v6513_v27  ;;  %v6441_v9 = vor.u32 %v6964_v47, %v6440_v28  ;;  %v6962_v5 = vld [vmem:[%s10836_s6 + $0x4] sm:$0xf0]  ;;  %4374 = vmatpush.bf16.msra.mxu0 %v6453_v56 }
 0x4da   : > { %v3823_v12 = vshll.u32 %v9851_v4, 16  ;;  %v6457_v61 = vor.u32 %v6968_v19, %v6456_v43  ;;  %v6505_v7 = vor.u32 %v6980_v41, %v6504_v50  ;;  %v3835_v0 = vshrl.u32 %v9851_v4, 16  ;;  %4403 = vmatpush.bf16.msra.mxu1 %v6517_v1  ;;  %v6648_v47 = vld [vmem:[%s10836_s6 + $0x270] sm:$0xf]  ;;  %v7040_v56 = vld [vmem:[%s10836_s6 + $0x274] sm:$0xf0] }
 0x4db   : > { %v3831_v33 = vshll.u32 %v9856_v60, 16  ;;  %v3843_v22 = vshrl.u32 %v9856_v60, 16  ;;  %v3727_v28 = vpack.c.bf16 %v9761_v11, %v9750_v35  ;;  %v6712_v1 = vld [vmem:[%s10836_s6 + $0x2f0] sm:$0xf]  ;;  %v6649_v54 = vor.u32 %v7040_v56, %v6648_v47  ;;  %v7056_v35 = vld [vmem:[%s10836_s6 + $0x2f4] sm:$0xf0] }
 0x4dc   : > { %v9884_v16 = vrot.slane %v3823_v12, 1  ;;  %4315 = vmatpush.bf16.msra.mxu2 %v6457_v61  ;;  %v6433_v61 = vor.u32 %v6962_v5, %v6432_v15  ;;  %v7039_v50 = vld [vmem:[%s10836_s6 + $0x274] sm:$0xf]  ;;  %v6650_v41 = vld [vmem:[%s10836_s6 + $0x278] sm:$0xf0] }
 0x4dd   : > { %v9887_v20 = vrot.slane %v3831_v33, 1  ;;  %v6496_v33 = vld [vmem:[%s10836_s6 + $0x80] sm:$0xf]  ;;  %4346 = vmatpush.bf16.msra.mxu3 %v6505_v7  ;;  %v7038_v15 = vld [vmem:[%s10836_s6 + $0x264] sm:$0xf0] }
 0x4de   : > { %v3826_v59 = vsel %vm1461_vm0, %v3821_v10, %v9884_v16  ;;  %v6497_v48 = vor.u32 %v6978_v55, %v6496_v33  ;;  %4404 = vmatpush.bf16.msra.mxu1 %v6509_v44  ;;  %v7054_v7 = vld [vmem:[%s10836_s6 + $0x2e4] sm:$0xf0]  ;;  %v6641_v5 = vor.u32 %v7038_v15, %v6640_v62  ;;  %v7037_v55 = vld [vmem:[%s10836_s6 + $0x264] sm:$0xf]  ;;  %v6706_v44 = vld [vmem:[%s10836_s6 + $0x2e8] sm:$0xf0] }
 0x4df   : > { %v3628_v46 = vpop.f32.mrf.mxu2  ;;  %4048 = vmatmul.bf16.gmra.mxu2 %v3826_v59  ;;  %v3834_v6 = vsel %vm1461_vm0, %v3829_v25, %v9887_v20  ;;  %4106 = vmatmul.bf16.gmra.mxu0 %v3826_v59  ;;  %v6445_v25 = vor.u32 %v6963_v38, %v6442_v18  ;;  %v6434_v59 = vld [vmem:[%s10836_s6 + $0x8] sm:$0xf0]  ;;  %v3845_v19 = vor.u32 %v3843_v22, %v9887_v20  ;;  %v7055_v18 = vld [vmem:[%s10836_s6 + $0x2f4] sm:$0xf] }
 0x4e0   : > { %v3657_v37 = vpop.f32.mrf.mxu3  ;;  %4077 = vmatmul.bf16.gmra.mxu3 %v3834_v6  ;;  %4135 = vmatmul.bf16.gmra.mxu1 %v3834_v6  ;;  %v6498_v6 = vld [vmem:[%s10836_s6 + $0x88] sm:$0xf0]  ;;  %v6437_v49 = vor.u32 %v6961_v14, %v6434_v59  ;;  %v3793_v20 = vpack.c.bf16 %v3750_v63, %v3750_v63  ;;  %v6713_v38 = vor.u32 %v7056_v35, %v6712_v1  ;;  %v6632_v14 = vld [vmem:[%s10836_s6 + $0x250] sm:$0xf]  ;;  %v7036_v59 = vld [vmem:[%s10836_s6 + $0x254] sm:$0xf0] }
 0x4e1   : > { %4316 = vmatpush.bf16.msra.mxu2 %v6449_v57  ;;  %4375 = vmatpush.bf16.msra.mxu0 %v6445_v25  ;;  %v7050_v63 = vld [vmem:[%s10836_s6 + $0x2c4] sm:$0xf0]  ;;  %v7047_v1 = vld [vmem:[%s10836_s6 + $0x2b4] sm:$0xf]  ;;  %v6608_v35 = vld [vmem:[%s10836_s6 + $0x220] sm:$0xf] }
 0x4e2   : > { %4347 = vmatpush.bf16.msra.mxu3 %v6497_v48  ;;  %v3855_v45 = vshll.u32 %v3793_v20, 16  ;;  %v6626_v20 = vld [vmem:[%s10836_s6 + $0x248] sm:$0xf0] }
 0x4e3   : > { %v6610_v62 = vld [vmem:[%s10836_s6 + $0x228] sm:$0xf0] }
 0x4e4   : > { %v3857_v24 = vrot.slane %v3855_v45, 1  ;;  %v6690_v45 = vld [vmem:[%s10836_s6 + $0x2c8] sm:$0xf0] }
 0x4e5   : > { %4317 = vmatpush.bf16.msra.mxu2 %v6441_v9  ;;  %4376 = vmatpush.bf16.msra.mxu0 %v6437_v49  ;;  %v6704_v9 = vld [vmem:[%s10836_s6 + $0x2e0] sm:$0xf] }
 0x4e6   : > { %4693 = vmatpush.bf16.msrb.mxu3 %v6713_v38  ;;  %v6705_v33 = vor.u32 %v7054_v7, %v6704_v9  ;;  %v6624_v49 = vld [vmem:[%s10836_s6 + $0x240] sm:$0xf]  ;;  %v6674_v7 = vld [vmem:[%s10836_s6 + $0x2a8] sm:$0xf0] }
 0x4e7   : > { %v3630_v42 = vpop.f32.mrf.mxu2  ;;  %v6672_v38 = vld [vmem:[%s10836_s6 + $0x2a0] sm:$0xf] }
 0x4e8   : > { %v3659_v52 = vpop.f32.mrf.mxu3  ;;  %v9965_v32 = vpack.c.bf16 %v3630_v42, %v3628_v46  ;;  %v6977_v46 = vld [vmem:[%s10836_s6 + $0x84] sm:$0xf]  ;;  %v10027_v42 = vor.u32 %v7039_v50, %v6650_v41  ;;  %v7030_v41 = vld [vmem:[%s10836_s6 + $0x224] sm:$0xf0] }
 0x4e9   : > { %v9970_v12 = vpack.c.bf16 %v3659_v52, %v3657_v37  ;;  %v3837_v37 = vor.u32 %v3835_v0, %v9884_v16  ;;  %v6501_v36 = vor.u32 %v6977_v46, %v6498_v6  ;;  %v3751_v16 = vld [vmem:[#allocation4 + $0x58] sm:$0x1]  ;;  %4318 = vmatpush.bf16.msra.mxu2 %v6433_v61  ;;  %v6717_v52 = vor.u32 %v7055_v18, %v6714_v17  ;;  %v6642_v0 = vld [vmem:[%s10836_s6 + $0x268] sm:$0xf0]  ;;  %v7052_v46 = vld [vmem:[%s10836_s6 + $0x2d4] sm:$0xf0] }
 0x4ea   : > { %v3839_v10 = vshll.u32 %v9965_v32, 16  ;;  %v3794_v29 = vpack.c.bf16 %v3751_v16, %v3751_v16  ;;  %v3851_v26 = vshrl.u32 %v9965_v32, 16  ;;  %4722 = vmatpush.bf16.msrb.mxu0 %v10027_v42  ;;  %v10057_v25 = vor.u32 %v7037_v55, %v6642_v0  ;;  %v7035_v6 = vld [vmem:[%s10836_s6 + $0x254] sm:$0xf]  ;;  %4694 = vmatpush.bf16.msrb.mxu3 %v6705_v33  ;;  %v7033_v16 = vld [vmem:[%s10836_s6 + $0x244] sm:$0xf] }
 0x4eb   : > { %v3847_v40 = vshll.u32 %v9970_v12, 16  ;;  %4405 = vmatpush.bf16.msra.mxu1 %v6501_v36  ;;  %v3859_v58 = vshrl.u32 %v9970_v12, 16  ;;  %v7034_v36 = vld [vmem:[%s10836_s6 + $0x244] sm:$0xf0]  ;;  %v7029_v17 = vld [vmem:[%s10836_s6 + $0x224] sm:$0xf]  ;;  %v6609_v15 = vor.u32 %v7030_v41, %v6608_v35 }
 0x4ec   : > { %v3841_v43 = vrot.slane %v3839_v10, 1  ;;  %v3863_v13 = vshll.u32 %v3794_v29, 16  ;;  %v7053_v10 = vld [vmem:[%s10836_s6 + $0x2e4] sm:$0xf]  ;;  %v7046_v18 = vld [vmem:[%s10836_s6 + $0x2a4] sm:$0xf0]  ;;  %v6613_v55 = vor.u32 %v7029_v17, %v6610_v62 }
 0x4ed   : > { %v3849_v30 = vrot.slane %v3847_v40, 1  ;;  %4664 = vmatpush.bf16.msrb.mxu2 %v6649_v54  ;;  %v6709_v22 = vor.u32 %v7053_v10, %v6706_v44  ;;  %v6696_v40 = vld [vmem:[%s10836_s6 + $0x2d0] sm:$0xf]  ;;  %v7049_v29 = vld [vmem:[%s10836_s6 + $0x2c4] sm:$0xf]  ;;  %v6673_v9 = vor.u32 %v7046_v18, %v6672_v38 }
 0x4ee   : > { %v3842_v23 = vsel %vm1461_vm0, %v3837_v37, %v3841_v43  ;;  %v3853_v39 = vor.u32 %v3851_v26, %v3841_v43  ;;  %v3865_v3 = vrot.slane %v3863_v13, 1  ;;  %v6633_v37 = vor.u32 %v7036_v59, %v6632_v14  ;;  %v6634_v43 = vld [vmem:[%s10836_s6 + $0x258] sm:$0xf0]  ;;  %4723 = vmatpush.bf16.msrb.mxu0 %v10057_v25  ;;  %v7028_v33 = vld [vmem:[%s10836_s6 + $0x214] sm:$0xf0] }
 0x4ef   : > { %4053 = vmatmul.bf16.gmra.mxu2 %v3842_v23  ;;  %v3850_v21 = vsel %vm1461_vm0, %v3845_v19, %v3849_v30  ;;  %4111 = vmatmul.bf16.gmra.mxu0 %v3842_v23  ;;  %v3861_v2 = vor.u32 %v3859_v58, %v3849_v30  ;;  %v7051_v19 = vld [vmem:[%s10836_s6 + $0x2d4] sm:$0xf]  ;;  %v6698_v30 = vld [vmem:[%s10836_s6 + $0x2d8] sm:$0xf0]  ;;  %v6697_v61 = vor.u32 %v7052_v46, %v6696_v40  ;;  %v6664_v10 = vld [vmem:[%s10836_s6 + $0x290] sm:$0xf] }
 0x4f0   : > { %4082 = vmatmul.bf16.gmra.mxu3 %v3850_v21  ;;  %4140 = vmatmul.bf16.gmra.mxu1 %v3850_v21  ;;  %v3858_v57 = vsel %vm1461_vm0, %v3853_v39, %v3857_v24  ;;  %v10087_v48 = vor.u32 %v7035_v6, %v6634_v43  ;;  %v6701_v23 = vor.u32 %v7051_v19, %v6698_v30  ;;  %v6688_v21 = vld [vmem:[%s10836_s6 + $0x2c0] sm:$0xf]  ;;  %v6616_v24 = vld [vmem:[%s10836_s6 + $0x230] sm:$0xf]  ;;  %v6682_v54 = vld [vmem:[%s10836_s6 + $0x2b8] sm:$0xf0] }
 0x4f1   : > { %v3866_v27 = vsel %vm1461_vm0, %v3861_v2, %v3865_v3  ;;  %4751 = vmatpush.bf16.msrb.mxu1 %v6717_v52  ;;  %4665 = vmatpush.bf16.msrb.mxu2 %v6641_v5  ;;  %v6625_v13 = vor.u32 %v7034_v36, %v6624_v49  ;;  %v6689_v26 = vor.u32 %v7050_v63, %v6688_v21  ;;  %v7032_v2 = vld [vmem:[%s10836_s6 + $0x234] sm:$0xf0]  ;;  %v6680_v3 = vld [vmem:[%s10836_s6 + $0x2b0] sm:$0xf]  ;;  %v7045_v52 = vld [vmem:[%s10836_s6 + $0x2a4] sm:$0xf] }
 0x4f2   : > { %4695 = vmatpush.bf16.msrb.mxu3 %v6697_v61  ;;  %4724 = vmatpush.bf16.msrb.mxu0 %v10087_v48  ;;  %v10114_v58 = vor.u32 %v7033_v16, %v6626_v20  ;;  %v6693_v39 = vor.u32 %v7049_v29, %v6690_v45  ;;  %v6685_v50 = vor.u32 %v7047_v1, %v6682_v54  ;;  %v6600_v5 = vld [vmem:[%s10836_s6 + $0x210] sm:$0xf]  ;;  %v7044_v44 = vld [vmem:[%s10836_s6 + $0x294] sm:$0xf0]  ;;  %v7027_v14 = vld [vmem:[%s10836_s6 + $0x214] sm:$0xf] }
 0x4f3   : > { %v6677_v0 = vor.u32 %v7045_v52, %v6674_v7  ;;  %v6602_v59 = vld [vmem:[%s10836_s6 + $0x218] sm:$0xf0]  ;;  %v6601_v46 = vor.u32 %v7028_v33, %v6600_v5  ;;  %v6665_v6 = vor.u32 %v7044_v44, %v6664_v10  ;;  %v6592_v19 = vld [vmem:[%s10836_s6 + $0x200] sm:$0xf]  ;;  %v7026_v30 = vld [vmem:[%s10836_s6 + $0x204] sm:$0xf0] }
 0x4f4   : > { %v6666_v40 = vld [vmem:[%s10836_s6 + $0x298] sm:$0xf0]  ;;  %v6656_v61 = vld [vmem:[%s10836_s6 + $0x280] sm:$0xf]  ;;  %v7042_v49 = vld [vmem:[%s10836_s6 + $0x284] sm:$0xf0] }
 0x4f5   : > { %4752 = vmatpush.bf16.msrb.mxu1 %v6709_v22  ;;  %4666 = vmatpush.bf16.msrb.mxu2 %v6633_v37  ;;  %v7043_v22 = vld [vmem:[%s10836_s6 + $0x294] sm:$0xf]  ;;  %v6605_v37 = vor.u32 %v7027_v14, %v6602_v59  ;;  %v7025_v36 = vld [vmem:[%s10836_s6 + $0x204] sm:$0xf]  ;;  %v6594_v21 = vld [vmem:[%s10836_s6 + $0x208] sm:$0xf0]  ;;  %v6657_v63 = vor.u32 %v7042_v49, %v6656_v61 }
 0x4f6   : > { %4696 = vmatpush.bf16.msrb.mxu3 %v6689_v26  ;;  %4725 = vmatpush.bf16.msrb.mxu0 %v10114_v58  ;;  %v6669_v43 = vor.u32 %v7043_v22, %v6666_v40  ;;  %v6597_v16 = vor.u32 %v7025_v36, %v6594_v21  ;;  %v7041_v20 = vld [vmem:[%s10836_s6 + $0x284] sm:$0xf]  ;;  %v6658_v29 = vld [vmem:[%s10836_s6 + $0x288] sm:$0xf0]  ;;  %v4428_v26 = vld [vmem:[#allocation4 + $0x80] sm:$0xfc] }
 0x4f7   : > { %v6661_v45 = vor.u32 %v7041_v20, %v6658_v29  ;;  %v4486_v54 = vrot.slane %v9856_v60, 1  ;;  %v4488_v7 = vrot.slane %v9965_v32, 1  ;;  %v4490_v33 = vrot.slane %v9970_v12, 1  ;;  %v4429_v40 = vld [vmem:[#allocation4 + $0x70] sm:$0x3] }
 0x4f9   : > { %4753 = vmatpush.bf16.msrb.mxu1 %v6701_v23  ;;  %4667 = vmatpush.bf16.msrb.mxu2 %v6625_v13  ;;  %v6593_v23 = vor.u32 %v7026_v30, %v6592_v19  ;;  %v4427_v13 = vld [vmem:[#allocation4 + $0x28] sm:$0xfc]  ;;  %v4491_v14 = vsel %vm2385_vm1, %v4486_v54, %v4490_v33 }
 0x4fd   : > { %4754 = vmatpush.bf16.msrb.mxu1 %v6693_v39  ;;  %v4482_v39 = vrot.slane %v9767_v53, 1 }
 0x4ff   : > { %4058 = vmatmul.bf16.gmra.mxu2 %v3858_v57  ;;  %4116 = vmatmul.bf16.gmra.mxu0 %v3858_v57  ;;  %v6617_v57 = vor.u32 %v7032_v2, %v6616_v24  ;;  %v4487_v18 = vsel %vm2385_vm1, %v4482_v39, %v4486_v54 }
 0x500   : > { %4087 = vmatmul.bf16.gmra.mxu3 %v3866_v27  ;;  %4145 = vmatmul.bf16.gmra.mxu1 %v3866_v27  ;;  %v7048_v27 = vld [vmem:[%s10836_s6 + $0x2b4] sm:$0xf0] }
 0x501   : > { %v6681_v47 = vor.u32 %v7048_v27, %v6680_v3  ;;  %4668 = vmatpush.bf16.msrb.mxu2 %v6617_v57  ;;  %4755 = vmatpush.bf16.msrb.mxu1 %v6685_v50 }
 0x503   : > { %4697 = vmatpush.bf16.msrb.mxu3 %v6681_v47 }
 0x505   : > { %4669 = vmatpush.bf16.msrb.mxu2 %v6609_v15  ;;  %4756 = vmatpush.bf16.msrb.mxu1 %v6677_v0 }
 0x507   : > { %4698 = vmatpush.bf16.msrb.mxu3 %v6673_v9 }
 0x509   : > { %4670 = vmatpush.bf16.msrb.mxu2 %v6601_v46  ;;  %4757 = vmatpush.bf16.msrb.mxu1 %v6669_v43  ;;  %v4466_v43 = vpack.c.bf16 %v4429_v40, %v4429_v40 }
 0x50b   : > { %4699 = vmatpush.bf16.msrb.mxu3 %v6665_v6  ;;  %v4430_v6 = vld [vmem:[#allocation4 + $0x58] sm:$0x3]  ;;  %v4492_v61 = vrot.slane %v4466_v43, 1 }
 0x50c   : > { %v4467_v19 = vpack.c.bf16 %v4430_v6, %v4430_v6 }
 0x50d   : > { %4671 = vmatpush.bf16.msrb.mxu2 %v6593_v23  ;;  %4758 = vmatpush.bf16.msrb.mxu1 %v6661_v45 }
 0x50e   : > { %v4494_v49 = vrot.slane %v4467_v19, 1 }
 0x50f   : > { %4319 = vmatmul.bf16.vlgmr.msra.gmra.mxu2 %v3726_v51  ;;  %4377 = vmatmul.bf16.vlgmr.msra.gmra.mxu0 %v3726_v51  ;;  %v7031_v51 = vld [vmem:[%s10836_s6 + $0x234] sm:$0xf] }
 0x510   : > { %4348 = vmatmul.bf16.vlgmr.msra.gmra.mxu3 %v3727_v28  ;;  %4406 = vmatmul.bf16.vlgmr.msra.gmra.mxu1 %v3727_v28  ;;  %v6618_v28 = vld [vmem:[%s10836_s6 + $0x238] sm:$0xf0]  ;;  %v4495_v20 = vsel %vm2385_vm1, %v4490_v33, %v4494_v49 }
 0x511   : > { %v10139_v56 = vor.u32 %v7031_v51, %v6618_v28  ;;  %4700 = vmatpush.bf16.msrb.mxu3 %v6657_v63  ;;  %7078 = vmatpush.bf16.msra.mxu2 %v10027_v42  ;;  %v4464_v42 = vpack.c.bf16 %v9759_v34, %v4427_v13 }
 0x513   : > { %4726 = vmatpush.bf16.msrb.mxu0 %v10139_v56  ;;  %v4478_v2 = vrot.slane %v4464_v42, 1 }
 0x515   : > { %7079 = vmatpush.bf16.msra.mxu2 %v10057_v25  ;;  %v4465_v25 = vpack.c.bf16 %v9761_v11, %v4428_v26 }
 0x517   : > { %4727 = vmatpush.bf16.msrb.mxu0 %v6613_v55  ;;  %v4481_v57 = vrot.slane %v4465_v25, 1 }
 0x519   : > { %7080 = vmatpush.bf16.msra.mxu2 %v10087_v48  ;;  %v4479_v48 = vrot.slane %v9765_v8, 1  ;;  %v4483_v51 = vsel %vm2385_vm1, %v4481_v57, %v4482_v39 }
 0x51b   : > { %4728 = vmatpush.bf16.msrb.mxu0 %v6605_v37 }
 0x51d   : > { %7081 = vmatpush.bf16.msra.mxu2 %v10114_v58  ;;  %v4480_v58 = vsel %vm2385_vm1, %v4478_v2, %v4479_v48 }
 0x51f   : > { %4324 = vmatmul.bf16.gmra.mxu2 %v9765_v8  ;;  %4382 = vmatmul.bf16.gmra.mxu0 %v9765_v8 }
 0x520   : > { %4353 = vmatmul.bf16.gmra.mxu3 %v9767_v53  ;;  %4411 = vmatmul.bf16.gmra.mxu1 %v9767_v53 }
 0x521   : > { %4729 = vmatpush.bf16.msrb.mxu0 %v6597_v16  ;;  %7082 = vmatpush.bf16.msra.mxu2 %v10139_v56  ;;  %v4484_v56 = vrot.slane %v9851_v4, 1 }
 0x523   : > { %v4485_v38 = vsel %vm2385_vm1, %v4479_v48, %v4484_v56  ;;  %v4489_v44 = vsel %vm2385_vm1, %v4484_v56, %v4488_v7 }
 0x525   : > { %7083 = vmatpush.bf16.msra.mxu2 %v6613_v55 }
 0x529   : > { %7084 = vmatpush.bf16.msra.mxu2 %v6605_v37 }
 0x52d   : > { %7085 = vmatpush.bf16.msra.mxu2 %v6597_v16  ;;  %v4493_v16 = vsel %vm2385_vm1, %v4488_v7, %v4492_v61 }
 0x52f   : > { %4329 = vmatmul.bf16.gmra.mxu2 %v9851_v4  ;;  %4387 = vmatmul.bf16.gmra.mxu0 %v9851_v4 }
 0x530   : > { %4358 = vmatmul.bf16.gmra.mxu3 %v9856_v60  ;;  %4416 = vmatmul.bf16.gmra.mxu1 %v9856_v60 }
 0x53f   : > { %4334 = vmatmul.bf16.gmra.mxu2 %v9965_v32  ;;  %4392 = vmatmul.bf16.gmra.mxu0 %v9965_v32 }
 0x540   : > { %4363 = vmatmul.bf16.gmra.mxu3 %v9970_v12  ;;  %4421 = vmatmul.bf16.gmra.mxu1 %v9970_v12 }
 0x54c   : > { %v4102_v24 = vpop.f32.mrf.mxu0 }
 0x54d   : > { %v4131_v3 = vpop.f32.mrf.mxu1 }
 0x54e   : > { %v10237_v27 = vadd.f32 %v4131_v3, %v4102_v24 }
 0x54f   : > { %4672 = vmatmul.bf16.vlgmr.msrb.gmra.mxu2 %v4480_v58  ;;  %4730 = vmatmul.bf16.vlgmr.msrb.gmra.mxu0 %v4480_v58 }
 0x550   : > { %4701 = vmatmul.bf16.vlgmr.msrb.gmra.mxu3 %v4483_v51  ;;  %4759 = vmatmul.bf16.vlgmr.msrb.gmra.mxu1 %v4483_v51 }
 0x552   : > { %v4044_v34 = vpop.f32.mrf.mxu2 }
 0x553   : > { %v4073_v11 = vpop.f32.mrf.mxu3 }
 0x554   : > { %v10241_v8 = vadd.f32 %v4073_v11, %v4044_v34  ;;  %v10243_v53 = vpop.f32.mrf.mxu0 }
 0x555   : > { %v10245_v28 = vpop.f32.mrf.mxu1 }
 0x556   : > { %v4134_v51 = vadd.f32 %v10245_v28, %v10243_v53 }
 0x55a   : > { %v10247_v47 = vpop.f32.mrf.mxu2 }
 0x55b   : > { %v10250_v1 = vpop.f32.mrf.mxu3 }
 0x55c   : > { %v4107_v35 = vpop.f32.mrf.mxu0 }
 0x55d   : > { %v4136_v50 = vpop.f32.mrf.mxu1 }
 0x55e   : > { %v10253_v41 = vadd.f32 %v4136_v50, %v4107_v35 }
 0x55f   : > { %4677 = vmatmul.bf16.gmra.mxu2 %v4485_v38  ;;  %4735 = vmatmul.bf16.gmra.mxu0 %v4485_v38 }
 0x560   : > { %4706 = vmatmul.bf16.gmra.mxu3 %v4487_v18  ;;  %4764 = vmatmul.bf16.gmra.mxu1 %v4487_v18 }
 0x562   : > { %v4049_v17 = vpop.f32.mrf.mxu2 }
 0x563   : > { %v4078_v62 = vpop.f32.mrf.mxu3 }
 0x564   : > { %v10257_v52 = vadd.f32 %v4078_v62, %v4049_v17  ;;  %v4109_v4 = vpop.f32.mrf.mxu0 }
 0x565   : > { %v4138_v15 = vpop.f32.mrf.mxu1 }
 0x566   : > { %v10259_v9 = vadd.f32 %v4138_v15, %v4109_v4 }
 0x56a   : > { %v10261_v60 = vpop.f32.mrf.mxu2 }
 0x56b   : > { %v10264_v5 = vpop.f32.mrf.mxu3 }
 0x56c   : > { %v4112_v55 = vpop.f32.mrf.mxu0 }
 0x56d   : > { %v4141_v0 = vpop.f32.mrf.mxu1 }
 0x56e   : > { %v10267_v10 = vadd.f32 %v4141_v0, %v4112_v55 }
 0x56f   : > { %4682 = vmatmul.bf16.gmra.mxu2 %v4489_v44  ;;  %4740 = vmatmul.bf16.gmra.mxu0 %v4489_v44 }
 0x570   : > { %4711 = vmatmul.bf16.gmra.mxu3 %v4491_v14  ;;  %4769 = vmatmul.bf16.gmra.mxu1 %v4491_v14 }
 0x572   : > { %v4054_v59 = vpop.f32.mrf.mxu2 }
 0x573   : > { %v4083_v22 = vpop.f32.mrf.mxu3 }
 0x574   : > { %v10271_v32 = vadd.f32 %v4083_v22, %v4054_v59  ;;  %v4114_v46 = vpop.f32.mrf.mxu0 }
 0x575   : > { %v4143_v12 = vpop.f32.mrf.mxu1 }
 0x576   : > { %v10273_v37 = vadd.f32 %v4143_v12, %v4114_v46 }
 0x57a   : > { %v10275_v30 = vpop.f32.mrf.mxu2 }
 0x57b   : > { %v10277_v23 = vpop.f32.mrf.mxu3 }
 0x57c   : > { %v4117_v36 = vpop.f32.mrf.mxu0 }
 0x57d   : > { %v4146_v21 = vpop.f32.mrf.mxu1 }
 0x57e   : > { %v10279_v63 = vadd.f32 %v4146_v21, %v4117_v36  ;;  %v4086_v21 = vadd.f32 %v10277_v23, %v10275_v30 }
 0x57f   : > { %4687 = vmatmul.bf16.gmra.mxu2 %v4493_v16 }
 0x580   : > { %4716 = vmatmul.bf16.gmra.mxu3 %v4495_v20  ;;  %4774 = vmatmul.bf16.gmra.mxu1 %v4495_v20 }
 0x582   : > { %v4059_v29 = vpop.f32.mrf.mxu2 }
 0x583   : > { %v4088_v45 = vpop.f32.mrf.mxu3 }
 0x584   : > { %v4089_v13 = vadd.f32 %v4088_v45, %v4059_v29  ;;  %v4119_v26 = vpop.f32.mrf.mxu0 }
 0x585   : > { %v4148_v42 = vpop.f32.mrf.mxu1 }
 0x586   : > { %v4149_v25 = vadd.f32 %v4148_v42, %v4119_v26 }
 0x58a   : > { %v10283_v48 = vpop.f32.mrf.mxu2 }
 0x58b   : > { %v10285_v39 = vpop.f32.mrf.mxu3 }
 0x58c   : > { %v4378_v24 = vpop.f32.mrf.mxu0  ;;  %v4091_v23 = vadd.f32 %v10285_v39, %v10283_v48 }
 0x58d   : > { %v4379_v2 = vadd.f32 %v4378_v24, %v10237_v27  ;;  %v4407_v3 = vpop.f32.mrf.mxu1  ;;  %v4076_v27 = vadd.f32 %v10250_v1, %v10247_v47 }
 0x58f   : > { %v10288_v57 = vadd.f32 %v4407_v3, %v4379_v2  ;;  %4745 = vmatmul.bf16.vlgmr.msra.gmra.mxu2 %v4493_v16 }
 0x592   : > { %v4320_v58 = vpop.f32.mrf.mxu2 }
 0x593   : > { %v4321_v34 = vadd.f32 %v4320_v58, %v10241_v8  ;;  %v4349_v11 = vpop.f32.mrf.mxu3 }
 0x594   : > { %v4380_v56 = vpop.f32.mrf.mxu0 }
 0x595   : > { %v10293_v54 = vadd.f32 %v4349_v11, %v4321_v34  ;;  %v4381_v35 = vadd.f32 %v4380_v56, %v4134_v51  ;;  %v4409_v50 = vpop.f32.mrf.mxu1 }
 0x597   : > { %v10295_v38 = vadd.f32 %v4409_v50, %v4381_v35 }
 0x59a   : > { %v4322_v18 = vpop.f32.mrf.mxu2 }
 0x59b   : > { %v4323_v17 = vadd.f32 %v4322_v18, %v4076_v27  ;;  %v4351_v62 = vpop.f32.mrf.mxu3 }
 0x59c   : > { %v4383_v4 = vpop.f32.mrf.mxu0 }
 0x59d   : > { %v10299_v15 = vadd.f32 %v4351_v62, %v4323_v17  ;;  %v4384_v53 = vadd.f32 %v4383_v4, %v10253_v41  ;;  %v4412_v8 = vpop.f32.mrf.mxu1 }
 0x59f   : > { %v10302_v28 = vadd.f32 %v4412_v8, %v4384_v53 }
 0x5a2   : > { %v4325_v7 = vpop.f32.mrf.mxu2 }
 0x5a3   : > { %v4326_v33 = vadd.f32 %v4325_v7, %v10257_v52  ;;  %v4354_v55 = vpop.f32.mrf.mxu3 }
 0x5a4   : > { %v4385_v0 = vpop.f32.mrf.mxu0 }
 0x5a5   : > { %v10305_v44 = vadd.f32 %v4354_v55, %v4326_v33  ;;  %v4386_v47 = vadd.f32 %v4385_v0, %v10259_v9  ;;  %v4414_v1 = vpop.f32.mrf.mxu1 }
 0x5a7   : > { %v10308_v14 = vadd.f32 %v4414_v1, %v4386_v47 }
 0x5aa   : > { %v10310_v59 = vpop.f32.mrf.mxu2 }
 0x5ab   : > { %v10312_v22 = vpop.f32.mrf.mxu3 }
 0x5ac   : > { %v4388_v41 = vpop.f32.mrf.mxu0 }
 0x5ad   : > { %v4389_v40 = vadd.f32 %v4388_v41, %v10267_v10  ;;  %v4417_v46 = vpop.f32.mrf.mxu1 }
 0x5af   : > { %v10315_v6 = vadd.f32 %v4417_v46, %v4389_v40 }
 0x5b2   : > { %v4330_v52 = vpop.f32.mrf.mxu2 }
 0x5b3   : > { %v4331_v12 = vadd.f32 %v4330_v52, %v10271_v32  ;;  %v4359_v43 = vpop.f32.mrf.mxu3 }
 0x5b4   : > { %v4390_v19 = vpop.f32.mrf.mxu0 }
 0x5b5   : > { %v10318_v61 = vadd.f32 %v4359_v43, %v4331_v12  ;;  %v4391_v9 = vadd.f32 %v4390_v19, %v10273_v37  ;;  %v4419_v49 = vpop.f32.mrf.mxu1 }
 0x5b7   : > { %v10321_v36 = vadd.f32 %v4419_v49, %v4391_v9 }
 0x5ba   : > { %v4332_v16 = vpop.f32.mrf.mxu2 }
 0x5bb   : > { %v4333_v10 = vadd.f32 %v4332_v16, %v4086_v21  ;;  %v4361_v20 = vpop.f32.mrf.mxu3 }
 0x5bc   : > { %v4393_v29 = vpop.f32.mrf.mxu0 }
 0x5bd   : > { %v10325_v45 = vadd.f32 %v4361_v20, %v4333_v10  ;;  %v4394_v32 = vadd.f32 %v4393_v29, %v10279_v63  ;;  %v4422_v26 = vpop.f32.mrf.mxu1 }
 0x5bf   : > { %v10328_v42 = vadd.f32 %v4422_v26, %v4394_v32 }
 0x5c2   : > { %v4335_v24 = vpop.f32.mrf.mxu2 }
 0x5c3   : > { %v4336_v2 = vadd.f32 %v4335_v24, %v4089_v13  ;;  %v4364_v37 = vpop.f32.mrf.mxu3 }
 0x5c4   : > { %v4395_v3 = vpop.f32.mrf.mxu0 }
 0x5c5   : > { %v10330_v58 = vadd.f32 %v4364_v37, %v4336_v2  ;;  %v4396_v51 = vadd.f32 %v4395_v3, %v4149_v25  ;;  %v4424_v34 = vpop.f32.mrf.mxu1  ;;  %v4796_v25 = vld [vmem:[%s10837_s7] sm:$0x3] }
 0x5c6   : > { %v10344_v48 = vperm.slane %v4796_v25, 0  ;;  %v10358_v12 = vperm.slane %v4796_v25, 1 }
 0x5c7   : > { %v10332_v30 = vadd.f32 %v4424_v34, %v4396_v51 }
 0x5ca   : > { %v4337_v11 = vpop.f32.mrf.mxu2 }
 0x5cb   : > { %v4338_v56 = vadd.f32 %v4337_v11, %v4091_v23  ;;  %v4366_v35 = vpop.f32.mrf.mxu3 }
 0x5cc   : > { %v4731_v63 = vpop.f32.mrf.mxu0 }
 0x5cd   : > { %v10336_v50 = vadd.f32 %v4366_v35, %v4338_v56  ;;  %v4760_v27 = vpop.f32.mrf.mxu1 }
 0x5ce   : > { %v4761_v18 = vadd.f32 %v4760_v27, %v4731_v63 }
 0x5d0   : > { %v10339_v13 = vadd.f32 %v4761_v18, %v10288_v57 }
 0x5d2   : > { %v4673_v17 = vpop.f32.mrf.mxu2 }
 0x5d3   : > { %v4702_v62 = vpop.f32.mrf.mxu3 }
 0x5d4   : > { %v4703_v4 = vadd.f32 %v4702_v62, %v4673_v17  ;;  %v4733_v53 = vpop.f32.mrf.mxu0 }
 0x5d5   : > { %v4762_v39 = vpop.f32.mrf.mxu1 }
 0x5d6   : > { %v4780_v8 = vadd.f32 %v4703_v4, %v10293_v54  ;;  %v4763_v7 = vadd.f32 %v4762_v39, %v4733_v53 }
 0x5d8   : > { %v10348_v33 = vadd.f32 %v4763_v7, %v10295_v38  ;;  %v4802_v57 = vadd.f32 %v10344_v48, %v4780_v8 }
 0x5da   : > { %v4675_v55 = vpop.f32.mrf.mxu2  ;;  %v10351_v0 = vmax.f32 %v4802_v57, 0.0 }
 0x5db   : > { %v4704_v47 = vpop.f32.mrf.mxu3 }
 0x5dc   : > { %v4705_v1 = vadd.f32 %v4704_v47, %v4675_v55  ;;  %4834 = vrot.lane.b32.xlu1 %v10351_v0, %s10939_s22  ;;  %v4736_v41 = vpop.f32.mrf.mxu0 }
 0x5dd   : > { %v4765_v40 = vpop.f32.mrf.mxu1 }
 0x5de   : > { %v4782_v46 = vadd.f32 %v4705_v1, %v10299_v15  ;;  %v4766_v52 = vadd.f32 %v4765_v40, %v4736_v41 }
 0x5e0   : > { %v4785_v54 = vadd.f32 %v4766_v52, %v10302_v28  ;;  %v4804_v38 = vadd.f32 %v10344_v48, %v4782_v46  ;;  %v4081_v28 = vadd.f32 %v10264_v5, %v10261_v60 }
 0x5e2   : > { %v4678_v43 = vpop.f32.mrf.mxu2  ;;  %v10360_v19 = vmax.f32 %v4804_v38, 0.0  ;;  %v4807_v9 = vadd.f32 %v10358_v12, %v4785_v54  ;;  %v4328_v32 = vadd.f32 %v10310_v59, %v4081_v28 }
 0x5e3   : > { %v4707_v49 = vpop.f32.mrf.mxu3 }
 0x5e4   : > { %v4708_v21 = vadd.f32 %v4707_v49, %v4678_v43  ;;  %4836 = vrot.lane.b32.xlu2 %v10360_v19, %s10939_s22  ;;  %v4738_v16 = vpop.f32.mrf.mxu0  ;;  %v10365_v10 = vmax.f32 %v4807_v9, 0.0  ;;  %v4357_v51 = vadd.f32 %v10312_v22, %v4328_v32 }
 0x5e5   : > { %v4767_v15 = vpop.f32.mrf.mxu1 }
 0x5e6   : > { %v4784_v20 = vadd.f32 %v4708_v21, %v10305_v44  ;;  %v4768_v29 = vadd.f32 %v4767_v15, %v4738_v16  ;;  %4854 = vrot.lane.b32.xlu1 %v10365_v10, %s10939_s22 }
 0x5e8   : > { %v4806_v26 = vadd.f32 %v10344_v48, %v4784_v20  ;;  %v4787_v24 = vadd.f32 %v4768_v29, %v10308_v14 }
 0x5ea   : > { %v4680_v2 = vpop.f32.mrf.mxu2  ;;  %v10375_v37 = vmax.f32 %v4806_v26, 0.0  ;;  %v4809_v59 = vadd.f32 %v10358_v12, %v4787_v24 }
 0x5eb   : > { %v4709_v3 = vpop.f32.mrf.mxu3 }
 0x5ec   : > { %v4710_v34 = vadd.f32 %v4709_v3, %v4680_v2  ;;  %4918 = vrot.lane.b32.xlu2 %v10365_v10, %s10940_s20  ;;  %4902 = vrot.lane.b32.xlu0 %v10375_v37, %s10940_s20  ;;  %v4741_v60 = vpop.f32.mrf.mxu0  ;;  %v10384_v11 = vmax.f32 %v4809_v59, 0.0 }
 0x5ed   : > { %v4770_v5 = vpop.f32.mrf.mxu1 }
 0x5ee   : > { %v4786_v44 = vadd.f32 %v4710_v34, %v4357_v51  ;;  %v4771_v18 = vadd.f32 %v4770_v5, %v4741_v60  ;;  %v4803_v51 = vadd.f32 %v10358_v12, %v10339_v13 }
 0x5f0   : > { %v4808_v14 = vadd.f32 %v10344_v48, %v4786_v44  ;;  %v4789_v4 = vadd.f32 %v4771_v18, %v10315_v6  ;;  %v10466_v34 = vmax.f32 %v4803_v51, 0.0 }
 0x5f2   : > { %v4683_v23 = vpop.f32.mrf.mxu2  ;;  %v10386_v56 = vmax.f32 %v4808_v14, 0.0  ;;  %v4811_v57 = vadd.f32 %v10358_v12, %v4789_v4 }
 0x5f3   : > { %v4712_v22 = vpop.f32.mrf.mxu3 }
 0x5f4   : > { %v4713_v35 = vadd.f32 %v4712_v22, %v4683_v23  ;;  %4920 = vrot.lane.b32.xlu0 %v10384_v11, %s10940_s20  ;;  %4838 = vrot.lane.b32.xlu2 %v10375_v37, %s10939_s22  ;;  %v4743_v63 = vpop.f32.mrf.mxu0  ;;  %v10409_v1 = vmax.f32 %v4811_v57, 0.0 }
 0x5f5   : > { %4904 = vrot.lane.b32.xlu1 %v10386_v56, %s10940_s20  ;;  %v4772_v27 = vpop.f32.mrf.mxu1 }
 0x5f6   : > { %v4788_v17 = vadd.f32 %v4713_v35, %v10318_v61  ;;  %v4773_v62 = vadd.f32 %v4772_v27, %v4743_v63 }
 0x5f8   : > { %v4810_v25 = vadd.f32 %v10344_v48, %v4788_v17  ;;  %v4791_v8 = vadd.f32 %v4773_v62, %v10321_v36 }
 0x5fa   : > { %v4685_v53 = vpop.f32.mrf.mxu2  ;;  %v10397_v39 = vmax.f32 %v4810_v25, 0.0  ;;  %v4813_v6 = vadd.f32 %v10358_v12, %v4791_v8 }
 0x5fb   : > { %v4714_v7 = vpop.f32.mrf.mxu3 }
 0x5fc   : > { %4856 = vrot.lane.b32.xlu2 %v10384_v11, %s10939_s22  ;;  %4840 = vrot.lane.b32.xlu0 %v10386_v56, %s10939_s22  ;;  %v4715_v61 = vadd.f32 %v4714_v7, %v4685_v53  ;;  %v10411_v41 = vmax.f32 %v4813_v6, 0.0 }
 0x5fd   : > { %4906 = vrot.lane.b32.xlu1 %v10397_v39, %s10940_s20  ;;  %v4775_v21 = vpop.f32.mrf.mxu1 }
 0x5fe   : > { %v4790_v55 = vadd.f32 %v4715_v61, %v10325_v45 }
 0x600   : > { %v4812_v46 = vadd.f32 %v10344_v48, %v4790_v55 }
 0x602   : > { %v4688_v47 = vpop.f32.mrf.mxu2  ;;  %v10421_v54 = vmax.f32 %v4812_v46, 0.0 }
 0x603   : > { %v4717_v36 = vpop.f32.mrf.mxu3 }
 0x604   : > { %4858 = vrot.lane.b32.xlu2 %v10409_v1, %s10939_s22  ;;  %4922 = vrot.lane.b32.xlu0 %v10409_v1, %s10940_s20  ;;  %v4718_v40 = vadd.f32 %v4717_v36, %v4688_v47 }
 0x605   : > { %4924 = vrot.lane.b32.xlu1 %v10411_v41, %s10940_s20 }
 0x606   : > { %v4792_v45 = vadd.f32 %v4718_v40, %v10330_v58 }
 0x608   : > { %v4814_v49 = vadd.f32 %v10344_v48, %v4792_v45 }
 0x60a   : > { %v4690_v52 = vpop.f32.mrf.mxu2  ;;  %v10432_v15 = vmax.f32 %v4814_v49, 0.0 }
 0x60b   : > { %v4719_v38 = vpop.f32.mrf.mxu3 }
 0x60c   : > { %v4720_v43 = vadd.f32 %v4719_v38, %v4690_v52  ;;  %4842 = vrot.lane.b32.xlu0 %v10397_v39, %s10939_s22  ;;  %4908 = vrot.lane.b32.xlu2 %v10421_v54, %s10940_s20 }
 0x60d   : > { %4844 = vrot.lane.b32.xlu1 %v10421_v54, %s10939_s22 }
 0x60e   : > { %v4794_v9 = vadd.f32 %v4720_v43, %v10336_v50 }
 0x610   : > { %v4816_v58 = vadd.f32 %v10344_v48, %v4794_v9  ;;  %v4777_v48 = vpop.f32.mrf.mxu1 }
 0x612   : > { %v4746_v16 = vpop.f32.mrf.mxu2  ;;  %v10444_v26 = vmax.f32 %v4816_v58, 0.0 }
 0x613   : > { %v4776_v28 = vadd.f32 %v4775_v21, %v4746_v16 }
 0x614   : > { %4860 = vrot.lane.b32.xlu0 %v10411_v41, %s10939_s22  ;;  %4910 = vrot.lane.b32.xlu2 %v10432_v15, %s10940_s20 }
 0x615   : > { %v4793_v20 = vadd.f32 %v4776_v28, %v10328_v42  ;;  %4846 = vrot.lane.b32.xlu1 %v10432_v15, %s10939_s22 }
 0x617   : > { %v4815_v50 = vadd.f32 %v10358_v12, %v4793_v20 }
 0x619   : > { %v10442_v29 = vmax.f32 %v4815_v50, 0.0 }
 0x61a   : > { %v4748_v32 = vpop.f32.mrf.mxu2 }
 0x61b   : > { %v4778_v24 = vadd.f32 %v4777_v48, %v4748_v32 }
 0x61c   : > { %4912 = vrot.lane.b32.xlu0 %v10444_v26, %s10940_s20  ;;  %4848 = vrot.lane.b32.xlu2 %v10444_v26, %s10939_s22 }
 0x61d   : > { %v4795_v42 = vadd.f32 %v4778_v24, %v10332_v30  ;;  %4926 = vrot.lane.b32.xlu1 %v10442_v29, %s10940_s20  ;;  %v4805_v30 = vadd.f32 %v10358_v12, %v10348_v33 }
 0x61f   : > { %v4817_v2 = vadd.f32 %v10358_v12, %v4795_v42  ;;  %v10468_v60 = vmax.f32 %v4805_v30, 0.0 }
 0x621   : > { %v10454_v3 = vmax.f32 %v4817_v2, 0.0 }
 0x624   : > { %4862 = vrot.lane.b32.xlu0 %v10442_v29, %s10939_s22  ;;  %4928 = vrot.lane.b32.xlu2 %v10454_v3, %s10940_s20 }
 0x625   : > { %4864 = vrot.lane.b32.xlu1 %v10454_v3, %s10939_s22 }
 0x62c   : > { %4850 = vrot.lane.b32.xlu0 %v10466_v34, %s10939_s22  ;;  %4898 = vrot.lane.b32.xlu2 %v10351_v0, %s10940_s20 }
 0x62d   : > { %4852 = vrot.lane.b32.xlu1 %v10468_v60, %s10939_s22  ;;  %s7149_s22 = scalar_lea.hbm %s10844_s14, 8 }
 0x634   : > { %4900 = vrot.lane.b32.xlu0 %v10360_v19, %s10940_s20  ;;  %4916 = vrot.lane.b32.xlu2 %v10468_v60, %s10940_s20 }
 0x635   : > { %4914 = vrot.lane.b32.xlu1 %v10466_v34, %s10940_s20  ;;  %s5511_s20 = scalar_lea.hbm %s10844_s14, %s6810_s18 }
 0x636   : > { %s5515_s0 = sshll.u32 %s5511_s20, 4  ;;  %s5516_s0 = int_to_ptr.hbm [resolvable:$true] %s5515_s0 }
 0x637   : > { %s7143_s17 = sshra.s32 %s5516_s0, 4  ;;  %s7144_s17 = int_to_ptr.hbm [resolvable:$true] %s7143_s17 }
 0x638   : > { %s7145_s27 = scalar_lea.hbm %s7144_s17, 4  ;;  %p7150_p0 = scmp.lt.s32.totalorder %s7144_s17, %s10844_s14 }
 0x639   : > { %p7146_p11 = scmp.ne.s32.totalorder %s7144_s17, %s7145_s27  ;;  %p7151_p1 = scmp.lt.s32.totalorder %s7149_s22, %s7145_s27 }
 0x63b   : > { %p7147_p12 = pnand %p7146_p11, %p7309_p5  ;;  %p7152_p2 = por %p7151_p1, %p7150_p0 }
 0x63d   : > { %p7148_p13 = pneg %p7147_p12 }
 0x63e   : > { %v10482_v13 = vpop.permute.xlu2 %4836 }
 0x63f   : > { %p7153_p3 = pnand %p7152_p2, %p7148_p13 }
 0x646   : > { %v4919_v33 = vpop.permute.xlu2 %4918 }
 0x64e   : > { %v10484_v12 = vpop.permute.xlu1 %4834  ;;  %v4839_v5 = vpop.permute.xlu2 %4838 }
 0x656   : > { %v4857_v18 = vpop.permute.xlu2 %4856 }
 0x658   : > { %v4855_v44 = vpop.permute.xlu1 %4854 }
 0x659   : > { %v4868_v59 = vsel %vm2960_vm2, %v4839_v5, %v4855_v44  ;;  %v4876_v14 = vsel %vm2960_vm2, %v4855_v44, %v4839_v5 }
 0x65a   : > { %v4886_v23 = vmax.f32 %v4876_v14, %v10375_v37  ;;  %v4887_v22 = vmax.f32 %v4868_v59, %v10365_v10 }
 0x65e   : > { %v4903_v35 = vpop.permute.xlu0 %4902  ;;  %v4859_v53 = vpop.permute.xlu2 %4858 }
 0x65f   : > { %v4932_v63 = vsel %vm3089_vm3, %v4903_v35, %v4919_v33  ;;  %v4940_v27 = vsel %vm3089_vm3, %v4919_v33, %v4903_v35  ;;  %v10556_v35 = vld [vmem:[#allocation4 + $0x70] sm:$0x3] }
 0x660   : > { %v10496_v17 = vmax.f32 %v4886_v23, %v4932_v63  ;;  %v10498_v62 = vmax.f32 %v4887_v22, %v4940_v27  ;;  %v10549_v23 = vld [vmem:[#allocation4 + $0x70] sm:$0x1]  ;;  %v10558_v63 = vld [vmem:[#allocation4 + $0x58] sm:$0x1] }
 0x662   : > { %v10873_v59 = vrot.slane %v10496_v17, 1  ;;  %v10872_v14 = vrot.slane %v10498_v62, 1 }
 0x666   : > { %v4921_v25 = vpop.permute.xlu0 %4920  ;;  %v4909_v40 = vpop.permute.xlu2 %4908 }
 0x667   : > { %v4905_v4 = vpop.permute.xlu1 %4904 }
 0x668   : > { %v4933_v6 = vsel %vm3089_vm3, %v4905_v4, %v4921_v25  ;;  %v4941_v55 = vsel %vm3089_vm3, %v4921_v25, %v4905_v4 }
 0x66e   : > { %v4841_v8 = vpop.permute.xlu0 %4840  ;;  %v10514_v52 = vpop.permute.xlu2 %4910 }
 0x66f   : > { %v4869_v37 = vsel %vm2960_vm2, %v4841_v8, %v4857_v18  ;;  %v4877_v10 = vsel %vm2960_vm2, %v4857_v18, %v4841_v8  ;;  %v4907_v7 = vpop.permute.xlu1 %4906 }
 0x670   : > { %v4888_v61 = vmax.f32 %v4877_v10, %v10386_v56  ;;  %v4889_v57 = vmax.f32 %v4869_v37, %v10384_v11  ;;  %v5114_v37 = vrot.slane %v10496_v17, 2 }
 0x672   : > { %v10510_v47 = vmax.f32 %v4888_v61, %v4933_v6  ;;  %v10512_v36 = vmax.f32 %v4889_v57, %v4941_v55  ;;  %v5064_v55 = vrot.slane %v10549_v23, 1 }
 0x674   : > { %v5044_v33 = vrot.slane %v10510_v47, 1  ;;  %v5046_v5 = vrot.slane %v10512_v36, 1  ;;  %v5118_v10 = vrot.slane %v10510_v47, 2  ;;  %v5120_v6 = vrot.slane %v10512_v36, 2 }
 0x676   : > { %v4923_v46 = vpop.permute.xlu0 %4922  ;;  %v4849_v32 = vpop.permute.xlu2 %4848  ;;  %v10554_v22 = vsel %vm2385_vm1, %v10873_v59, %v5044_v33  ;;  %v10565_v25 = vsel %vm2385_vm1, %v10872_v14, %v5046_v5 }
 0x677   : > { %v4925_v45 = vpop.permute.xlu1 %4924  ;;  %v4934_v21 = vsel %vm3089_vm3, %v4907_v7, %v4923_v46  ;;  %v4942_v58 = vsel %vm3089_vm3, %v4923_v46, %v4907_v7  ;;  %v5088_v57 = vmax.f32 %v10496_v17, %v10554_v22  ;;  %v5066_v46 = vrot.slane %v10558_v63, 1 }
 0x678   : > { %v4935_v42 = vsel %vm3089_vm3, %v4909_v40, %v4925_v45  ;;  %v4943_v2 = vsel %vm3089_vm3, %v4925_v45, %v4909_v40  ;;  %v5138_v40 = vrot.slane %v10556_v35, 2 }
 0x67e   : > { %v4843_v38 = vpop.permute.xlu0 %4842  ;;  %v4929_v4 = vpop.permute.xlu2 %4928 }
 0x67f   : > { %v4870_v56 = vsel %vm2960_vm2, %v4843_v38, %v4859_v53  ;;  %v4878_v11 = vsel %vm2960_vm2, %v4859_v53, %v4843_v38  ;;  %v4845_v43 = vpop.permute.xlu1 %4844  ;;  %v10567_v53 = vld [vmem:[#allocation4 + $0x58] sm:$0x3] }
 0x680   : > { %v4890_v9 = vmax.f32 %v4878_v11, %v10397_v39  ;;  %v4891_v49 = vmax.f32 %v4870_v56, %v10409_v1  ;;  %v5140_v38 = vrot.slane %v10567_v53, 2 }
 0x682   : > { %v10526_v16 = vmax.f32 %v4890_v9, %v4934_v21  ;;  %v10528_v28 = vmax.f32 %v4891_v49, %v4942_v58 }
 0x684   : > { %v5122_v27 = vrot.slane %v10526_v16, 2  ;;  %v5050_v18 = vrot.slane %v10528_v28, 1  ;;  %v5124_v56 = vrot.slane %v10528_v28, 2 }
 0x686   : > { %v4861_v20 = vpop.permute.xlu0 %4860  ;;  %v5123_v11 = vsel %vm3433_vm4, %v5118_v10, %v5122_v27  ;;  %v4899_v14 = vpop.permute.xlu2 %4898  ;;  %v5125_v31 = vsel %vm3433_vm4, %v5120_v6, %v5124_v56 }
 0x687   : > { %v4871_v50 = vsel %vm2960_vm2, %v4845_v43, %v4861_v20  ;;  %v4879_v48 = vsel %vm2960_vm2, %v4861_v20, %v4845_v43  ;;  %v4847_v39 = vpop.permute.xlu1 %4846  ;;  %v10588_v43 = vsel %vm2385_vm1, %v5046_v5, %v5050_v18 }
 0x688   : > { %v4892_v1 = vmax.f32 %v4879_v48, %v10421_v54  ;;  %v4893_v24 = vmax.f32 %v4871_v50, %v10411_v41  ;;  %v5048_v41 = vrot.slane %v10526_v16, 1 }
 0x68a   : > { %v10540_v51 = vmax.f32 %v4892_v1, %v4935_v42  ;;  %v10542_v30 = vmax.f32 %v4893_v24, %v4943_v2  ;;  %v5049_v61 = vsel %vm2385_vm1, %v5044_v33, %v5048_v41 }
 0x68b   : > { %v5090_v20 = vmax.f32 %v10510_v47, %v5049_v61 }
 0x68c   : > { %v5052_v8 = vrot.slane %v10540_v51, 1  ;;  %v5054_v7 = vrot.slane %v10542_v30, 1  ;;  %v5126_v21 = vrot.slane %v10540_v51, 2  ;;  %v5128_v58 = vrot.slane %v10542_v30, 2 }
 0x68e   : > { %v4913_v44 = vpop.permute.xlu0 %4912  ;;  %v5053_v49 = vsel %vm2385_vm1, %v5048_v41, %v5052_v8  ;;  %v10601_v42 = vsel %vm2385_vm1, %v5050_v18, %v5054_v7 }
 0x68f   : > { %v4927_v54 = vpop.permute.xlu1 %4926  ;;  %v4937_v50 = vsel %vm3089_vm3, %v4913_v44, %v4929_v4 }
 0x690   : > { %v4936_v23 = vsel %vm3089_vm3, %v10514_v52, %v4927_v54 }
 0x696   : > { %v4863_v9 = vpop.permute.xlu0 %4862 }
 0x697   : > { %v4872_v48 = vsel %vm2960_vm2, %v4847_v39, %v4863_v9  ;;  %v4880_v1 = vsel %vm2960_vm2, %v4863_v9, %v4847_v39  ;;  %v4865_v24 = vpop.permute.xlu1 %4864  ;;  %v4944_v39 = vsel %vm3089_vm3, %v4927_v54, %v10514_v52  ;;  %v5092_v9 = vmax.f32 %v10526_v16, %v5053_v49 }
 0x698   : > { %v4894_v2 = vmax.f32 %v4880_v1, %v10432_v15  ;;  %v4895_v33 = vmax.f32 %v4872_v48, %v10442_v29  ;;  %v4873_v5 = vsel %vm2960_vm2, %v4849_v32, %v4865_v24  ;;  %v4881_v41 = vsel %vm2960_vm2, %v4865_v24, %v4849_v32 }
 0x699   : > { %v4896_v35 = vmax.f32 %v4881_v41, %v10444_v26  ;;  %v4897_v15 = vmax.f32 %v4873_v5, %v10454_v3  ;;  %v4945_v29 = vsel %vm3089_vm3, %v4929_v4, %v4913_v44  ;;  %v10620_v1 = vmax.f32 %v5090_v20, %v5123_v11 }
 0x69a   : > { %v4958_v18 = vmax.f32 %v4894_v2, %v4936_v23  ;;  %v4959_v61 = vmax.f32 %v4895_v33, %v4944_v39  ;;  %v5091_v24 = vmax.f32 %v10512_v36, %v10588_v43  ;;  %v5127_v5 = vsel %vm3433_vm4, %v5122_v27, %v5126_v21 }
 0x69b   : > { %v4960_v32 = vmax.f32 %v4896_v35, %v4937_v50  ;;  %v4961_v48 = vmax.f32 %v4897_v15, %v4945_v29  ;;  %v5093_v44 = vmax.f32 %v10528_v28, %v10601_v42  ;;  %v5129_v16 = vsel %vm3433_vm4, %v5124_v56, %v5128_v58 }
 0x69c   : > { %v5056_v52 = vrot.slane %v4958_v18, 1  ;;  %v5130_v54 = vrot.slane %v4958_v18, 2  ;;  %v5058_v26 = vrot.slane %v4959_v61, 1  ;;  %v5132_v41 = vrot.slane %v4959_v61, 2 }
 0x69d   : > { %v5060_v3 = vrot.slane %v4960_v32, 1  ;;  %v5134_v11 = vrot.slane %v4960_v32, 2  ;;  %v5062_v49 = vrot.slane %v4961_v48, 1  ;;  %v5136_v20 = vrot.slane %v4961_v48, 2 }
 0x69e   : > { %v4851_v4 = vpop.permute.xlu0 %4850  ;;  %v5166_v50 = vmax.f32 %v5092_v9, %v5127_v5  ;;  %v5057_v39 = vsel %vm2385_vm1, %v5052_v8, %v5056_v52  ;;  %v5131_v27 = vsel %vm3433_vm4, %v5126_v21, %v5130_v54  ;;  %v5059_v15 = vsel %vm2385_vm1, %v5054_v7, %v5058_v26 }
 0x69f   : > { %v4853_v2 = vpop.permute.xlu1 %4852  ;;  %v5061_v33 = vsel %vm2385_vm1, %v5056_v52, %v5060_v3  ;;  %v5065_v23 = vsel %vm2385_vm1, %v5060_v3, %v5064_v55  ;;  %v4866_v42 = vsel %vm2960_vm2, %v10484_v12, %v4851_v4  ;;  %v4874_v35 = vsel %vm2960_vm2, %v4851_v4, %v10484_v12 }
 0x6a0   : > { %v5133_v29 = vsel %vm3433_vm4, %v5128_v58, %v5132_v41  ;;  %v4867_v55 = vsel %vm2960_vm2, %v10482_v13, %v4853_v2  ;;  %v4875_v8 = vsel %vm2960_vm2, %v4853_v2, %v10482_v13  ;;  %v5096_v21 = vmax.f32 %v4958_v18, %v5061_v33 }
 0x6a1   : > { %v5098_v9 = vmax.f32 %v4960_v32, %v5065_v23  ;;  %v5135_v52 = vsel %vm3433_vm4, %v5130_v54, %v5134_v11  ;;  %v5139_v3 = vsel %vm3433_vm4, %v5134_v11, %v5138_v40  ;;  %v5063_v12 = vsel %vm2385_vm1, %v5058_v26, %v5062_v49 }
 0x6a2   : > { %v5067_v7 = vsel %vm2385_vm1, %v5062_v49, %v5066_v46  ;;  %v5170_v58 = vmax.f32 %v5096_v21, %v5135_v52  ;;  %v5097_v4 = vmax.f32 %v4959_v61, %v5063_v12  ;;  %v5137_v45 = vsel %vm3433_vm4, %v5132_v41, %v5136_v20  ;;  %v4917_v46 = vpop.permute.xlu2 %4916 }
 0x6a3   : > { %v5172_v5 = vmax.f32 %v5098_v9, %v5139_v3  ;;  %v5099_v59 = vmax.f32 %v4961_v48, %v5067_v7  ;;  %v5141_v13 = vsel %vm3433_vm4, %v5136_v20, %v5140_v38  ;;  %v5094_v18 = vmax.f32 %v10540_v51, %v5057_v39 }
 0x6a4   : > { %v5095_v40 = vmax.f32 %v10542_v30, %v5059_v15  ;;  %v4882_v32 = vmax.f32 %v4874_v35, %v10351_v0  ;;  %v5171_v63 = vmax.f32 %v5097_v4, %v5137_v45  ;;  %v4883_v11 = vmax.f32 %v4866_v42, %v10466_v34 }
 0x6a5   : > { %v5180_v54 = vpack.c.bf16 %v5172_v5, %v5170_v58  ;;  %v5173_v26 = vmax.f32 %v5099_v59, %v5141_v13  ;;  %v4884_v61 = vmax.f32 %v4875_v8, %v10360_v19  ;;  %v4885_v48 = vmax.f32 %v4867_v55, %v10468_v60 }
 0x6a6   : > { %v4901_v41 = vpop.permute.xlu0 %4900  ;;  %v5168_v53 = vmax.f32 %v5094_v18, %v5131_v27  ;;  %v5169_v45 = vmax.f32 %v5095_v40, %v5133_v29  ;;  %v5167_v33 = vmax.f32 %v5093_v44, %v5129_v16  ;;  %v5119_v23 = vsel %vm3433_vm4, %v5114_v37, %v5118_v10 }
 0x6a7   : > { %v4931_v38 = vsel %vm3089_vm3, %v4901_v41, %v4917_v46  ;;  %v4939_v51 = vsel %vm3089_vm3, %v4917_v46, %v4901_v41  ;;  %v4915_v30 = vpop.permute.xlu1 %4914  ;;  %5203 = vmatpush.bf16.msrb.mxu2 %v5180_v54  ;;  %v5181_v0 = vpack.c.bf16 %v5173_v26, %v5171_v63  ;;  %v5116_v39 = vrot.slane %v10498_v62, 2  ;;  %v7066_v63 = vld [vmem:[%s10839_s9 + $0x38] sm:$0xff]  ;;  %v7072_v41 = vld [vmem:[%s10839_s9 + $0x68] sm:$0xff] }
 0x6a8   : > { %v4948_v59 = vmax.f32 %v4884_v61, %v4931_v38  ;;  %v4949_v49 = vmax.f32 %v4885_v48, %v4939_v51  ;;  %v4930_v34 = vsel %vm3089_vm3, %v4899_v14, %v4915_v30  ;;  %v4938_v19 = vsel %vm3089_vm3, %v4915_v30, %v4899_v14  ;;  %v7073_v61 = vld [vmem:[%s10839_s9 + $0x70] sm:$0xff]  ;;  %v7064_v48 = vld [vmem:[%s10839_s9 + $0x28] sm:$0xff]  ;;  %v7071_v38 = vld [vmem:[%s10839_s9 + $0x60] sm:$0xff] }
 0x6a9   : > { %v4946_v60 = vmax.f32 %v4882_v32, %v4930_v34  ;;  %v4947_v20 = vmax.f32 %v4883_v11, %v4938_v19  ;;  %5222 = vmatpush.bf16.msra.mxu3 %v5181_v0  ;;  %v5178_v2 = vpack.c.bf16 %v5168_v53, %v5166_v50  ;;  %v5179_v14 = vpack.c.bf16 %v5169_v45, %v5167_v33  ;;  %v7065_v11 = vld [vmem:[%s10839_s9 + $0x30] sm:$0xff]  ;;  %v7063_v53 = vld [vmem:[%s10839_s9 + $0x20] sm:$0xff]  ;;  %v7062_v51 = vld [vmem:[%s10839_s9 + $0x18] sm:$0xff] }
 0x6aa   : > { %v5162_v44 = vmax.f32 %v5088_v57, %v5119_v23  ;;  %v5165_v47 = vmax.f32 %v5091_v24, %v5125_v31  ;;  %v5121_v10 = vsel %vm3433_vm4, %v5116_v39, %v5120_v6  ;;  %v10941_v56 = vmax.f32 %v10498_v62, %v10565_v25  ;;  %v7070_v30 = vld [vmem:[%s10839_s9 + $0x58] sm:$0xff]  ;;  %v7058_v0 = vld [vmem:[%s10838_s8 + $0x8] sm:$0xff]  ;;  %v7061_v45 = vld [vmem:[%s10839_s9 + $0x10] sm:$0xff] }
 0x6ab   : > { %5204 = vmatpush.bf16.msrb.mxu2 %v5178_v2  ;;  %4962 = vst [vmem:[#allocation4 + $0x28] sm:$0xff] %v4946_v60  ;;  %v5035_v50 = vrot.slane %v4948_v59, 1  ;;  %v5038_v57 = vrot.slane %v4949_v49, 1  ;;  %v10942_v43 = vrot.slane %v10496_v17, 1  ;;  %v5109_v6 = vrot.slane %v4948_v59, 2  ;;  %v7074_v17 = vld [vmem:[%s10839_s9 + $0x78] sm:$0xff] }
 0x6ac   : > { %4963 = vst [vmem:[#allocation4 + $0x80] sm:$0xff] %v4947_v20  ;;  %v5176_v28 = vpack.c.bf16 %v10620_v1, %v5162_v44  ;;  %v5163_v16 = vmax.f32 %v10941_v56, %v5121_v10  ;;  %v10943_v42 = vrot.slane %v10498_v62, 1  ;;  %v5112_v9 = vrot.slane %v4949_v49, 2  ;;  %v7068_v34 = vld [vmem:[%s10839_s9 + $0x48] sm:$0xff]  ;;  %v7059_v19 = vld [vmem:[%s10839_s9] sm:$0xff] }
 0x6ad   : > { %5223 = vmatpush.bf16.msra.mxu3 %v5179_v14  ;;  %v5041_v24 = vsel %vm2385_vm1, %v5035_v50, %v10942_v43  ;;  %v5115_v62 = vsel %vm3433_vm4, %v5109_v6, %v5114_v37  ;;  %v7057_v37 = vld [vmem:[%s10838_s8] sm:$0xff]  ;;  %v7077_v43 = vld [vmem:[%s10841_s11 + $0x10] sm:$0xff] }
 0x6ae   : > { %v5177_v22 = vpack.c.bf16 %v5165_v47, %v5163_v16  ;;  %v5043_v1 = vsel %vm2385_vm1, %v5038_v57, %v10943_v42  ;;  %v5086_v55 = vmax.f32 %v4948_v59, %v5041_v24  ;;  %v5117_v40 = vsel %vm3433_vm4, %v5112_v9, %v5116_v39  ;;  %v7069_v59 = vld [vmem:[%s10839_s9 + $0x50] sm:$0xff]  ;;  %v5421_v16 = vld [vmem:[%s10841_s11 + $0x18] sm:$0x1]  ;;  %v7076_v24 = vld [vmem:[%s10841_s11 + $0x8] sm:$0xff] }
 0x6af   : > { %5205 = vmatpush.bf16.msrb.mxu2 %v5176_v28  ;;  %v5087_v3 = vmax.f32 %v4949_v49, %v5043_v1  ;;  %v7060_v49 = vld [vmem:[%s10839_s9 + $0x8] sm:$0xff] }
 0x6b0   : > { %v5160_v13 = vmax.f32 %v5086_v55, %v5115_v62  ;;  %v5410_v62 = vld [vmem:[%s10840_s10 + $0x18] sm:$0xff] }
 0x6b1   : > { %5224 = vmatpush.bf16.msra.mxu3 %v5177_v22  ;;  %v5161_v54 = vmax.f32 %v5087_v3, %v5117_v40 }
 0x6b2   : > { %v4998_v36 = vld [vmem:[#allocation4 + $0x28] sm:$0xfe] }
 0x6b3   : > { %v5100_v27 = vld [vmem:[#allocation4 + $0x28] sm:$0xfc]  ;;  %v5034_v35 = vrot.slane %v4998_v36, 1  ;;  %v4999_v25 = vld [vmem:[#allocation4 + $0x80] sm:$0xfe] }
 0x6b4   : > { %v5108_v15 = vrot.slane %v5100_v27, 2  ;;  %v5101_v29 = vld [vmem:[#allocation4 + $0x80] sm:$0xfc]  ;;  %v5037_v8 = vrot.slane %v4999_v25, 1  ;;  %v7075_v36 = vld [vmem:[%s10841_s11] sm:$0xff]  ;;  %v5408_v25 = vld [vmem:[%s10840_s10 + $0x8] sm:$0xff] }
 0x6b5   : > { %v5111_v21 = vrot.slane %v5101_v29, 2  ;;  %v5036_v52 = vsel %vm2385_vm1, %v5034_v35, %v5035_v50  ;;  %v5437_v50 = vunpack.c.l.b16 %v5421_v16  ;;  %v5407_v35 = vld [vmem:[%s10840_s10] sm:$0xff] }
 0x6b6   : > { %v5084_v12 = vmax.f32 %v4946_v60, %v5036_v52  ;;  %v5039_v7 = vsel %vm2385_vm1, %v5037_v8, %v5038_v57  ;;  %v5110_v58 = vsel %vm3433_vm4, %v5108_v15, %v5109_v6  ;;  %v7067_v60 = vld [vmem:[%s10839_s9 + $0x40] sm:$0xff] }
 0x6b7   : > { %v5085_v5 = vmax.f32 %v4947_v20, %v5039_v7  ;;  %v5113_v18 = vsel %vm3433_vm4, %v5111_v21, %v5112_v9  ;;  %v5441_v22 = vpack.c.b16 %v5437_v50, %v5437_v50  ;;  %v5409_v7 = vld [vmem:[%s10840_s10 + $0x10] sm:$0xff] }
 0x6b8   : > { %v5158_v4 = vmax.f32 %v5084_v12, %v5110_v58 }
 0x6b9   : > { %v5159_v32 = vmax.f32 %v5085_v5, %v5113_v18  ;;  %v5454_v57 = vsel %vm5452_vm6, %v5441_v22, 0 }
 0x6ba   : > { %v5174_v26 = vpack.c.bf16 %v5160_v13, %v5158_v4  ;;  %5460 = vmatpush.bf16.msra.mxu0 %v5454_v57 }
 0x6bb   : > { %v5175_v46 = vpack.c.bf16 %v5161_v54, %v5159_v32 }
 0x6bc   : > { %5206 = vmatpush.bf16.msrb.mxu2 %v5174_v26 }
 0x6bd   : > { %5225 = vmatpush.bf16.msra.mxu3 %v5175_v46  ;;  %v5475_v46 = vld [vmem:[%s10842_s12] sm:$0x3] }
 0x6be   : > { %5461 = vmatpush.bf16.msra.mxu0 %v7077_v43 }
 0x6bf   : > { %6726 = vmatmul.msk.bf16.vlgmr.msrb.gmra.mxu2 %vm5192_vm5, %v7057_v37 }
 0x6c0   : > { %5369 = vmatpush.bf16.msra.mxu2 %v7066_v63  ;;  %6728 = vmatmul.msk.bf16.vlgmr.msra.gmra.mxu3 %vm5192_vm5, %v7057_v37  ;;  %v7128_v37 = vld [vmem:[%s10843_s13] ss:$0 sm:$0xff] }
 0x6c1   : > { %5388 = vmatpush.bf16.msrb.mxu3 %v7074_v17 }
 0x6c2   : > { %5462 = vmatpush.bf16.msra.mxu0 %v7076_v24 }
 0x6c4   : > { %5370 = vmatpush.bf16.msra.mxu2 %v7065_v11 }
 0x6c5   : > { %5389 = vmatpush.bf16.msrb.mxu3 %v7073_v61 }
 0x6c6   : > { %5463 = vmatpush.bf16.msra.mxu0 %v7075_v36 }
 0x6c8   : > { %5371 = vmatpush.bf16.msra.mxu2 %v7064_v48 }
 0x6c9   : > { %5390 = vmatpush.bf16.msrb.mxu3 %v7072_v41 }
 0x6cc   : > { %5372 = vmatpush.bf16.msra.mxu2 %v7063_v53 }
 0x6cd   : > { %5391 = vmatpush.bf16.msrb.mxu3 %v7071_v38 }
 0x6cf   : > { %6727 = vmatmul.msk.bf16.gmra.mxu2 %vm5192_vm5, %v7058_v0 }
 0x6d0   : > { %5373 = vmatpush.bf16.msra.mxu2 %v7062_v51  ;;  %6729 = vmatmul.msk.bf16.gmra.mxu3 %vm5192_vm5, %v7058_v0 }
 0x6d1   : > { %5392 = vmatpush.bf16.msrb.mxu3 %v7070_v30 }
 0x6d4   : > { %5374 = vmatpush.bf16.msra.mxu2 %v7061_v45 }
 0x6d5   : > { %5393 = vmatpush.bf16.msrb.mxu3 %v7069_v59 }
 0x6d8   : > { %5375 = vmatpush.bf16.msra.mxu2 %v7060_v49 }
 0x6d9   : > { %5394 = vmatpush.bf16.msrb.mxu3 %v7068_v34 }
 0x6dc   : > { %5376 = vmatpush.bf16.msra.mxu2 %v7059_v19 }
 0x6dd   : > { %5395 = vmatpush.bf16.msrb.mxu3 %v7067_v60 }
 0x742   : > { %v5208_v20 = vpop.f32.mrf.mxu2 }
 0x743   : > { %v5227_v2 = vpop.f32.mrf.mxu3 }
 0x74a   : > { %v5210_v33 = vpop.f32.mrf.mxu2 }
 0x74b   : > { %v5269_v23 = vpack.c.bf16 %v5210_v33, %v5208_v20  ;;  %v5229_v39 = vpop.f32.mrf.mxu3 }
 0x74c   : > { %v5270_v31 = vpack.c.bf16 %v5229_v39, %v5227_v2 }
 0x74d   : > { %5377 = vmatmul.bf16.vlgmr.msra.gmra.mxu2 %v5269_v23 }
 0x74e   : > { %5396 = vmatmul.bf16.vlgmr.msrb.gmra.mxu3 %v5270_v31 }
 0x752   : > { %v5213_v14 = vpop.f32.mrf.mxu2 }
 0x753   : > { %v5232_v44 = vpop.f32.mrf.mxu3 }
 0x75a   : > { %v5215_v47 = vpop.f32.mrf.mxu2 }
 0x75b   : > { %v5271_v10 = vpack.c.bf16 %v5215_v47, %v5213_v14  ;;  %v5234_v28 = vpop.f32.mrf.mxu3 }
 0x75c   : > { %v5272_v56 = vpack.c.bf16 %v5234_v28, %v5232_v44 }
 0x75d   : > { %5382 = vmatmul.bf16.gmra.mxu2 %v5271_v10 }
 0x75e   : > { %5401 = vmatmul.bf16.gmra.mxu3 %v5272_v56 }
 0x7d0   : > { %v5378_v27 = vpop.f32.mrf.mxu2 }
 0x7d1   : > { %v5397_v6 = vpop.f32.mrf.mxu3 }
 0x7d2   : > { %v5398_v42 = vadd.f32 %v5397_v6, %v5378_v27 }
 0x7d4   : > { %v5411_v55 = vmul.f32 %v5407_v35, %v5398_v42 }
 0x7d8   : > { %v5380_v1 = vpop.f32.mrf.mxu2 }
 0x7d9   : > { %v5399_v15 = vpop.f32.mrf.mxu3 }
 0x7da   : > { %v5400_v29 = vadd.f32 %v5399_v15, %v5380_v1 }
 0x7dc   : > { %v5412_v8 = vmul.f32 %v5408_v25, %v5400_v29 }
 0x7de   : > { %v5422_v21 = vpack.c.bf16 %v5412_v8, %v5411_v55 }
 0x7e0   : > { %6806 = vmatmul.msk.bf16.vlgmr.msra.gmra.mxu0 %vm5445_vm7, %v5422_v21  ;;  %v5383_v9 = vpop.f32.mrf.mxu2 }
 0x7e1   : > { %v5402_v52 = vpop.f32.mrf.mxu3 }
 0x7e2   : > { %v5403_v3 = vadd.f32 %v5402_v52, %v5383_v9 }
 0x7e4   : > { %v5413_v4 = vmul.f32 %v5409_v7, %v5403_v3 }
 0x7e8   : > { %v5385_v12 = vpop.f32.mrf.mxu2 }
 0x7e9   : > { %v5404_v58 = vpop.f32.mrf.mxu3 }
 0x7ea   : > { %v5405_v5 = vadd.f32 %v5404_v58, %v5385_v12 }
 0x7ec   : > { %v5414_v13 = vmul.f32 %v5410_v62, %v5405_v5 }
 0x7ee   : > { %v5423_v18 = vpack.c.bf16 %v5414_v13, %v5413_v4 }
 0x7f0   : > { %6807 = vmatmul.msk.bf16.gmra.mxu0 %vm5445_vm7, %v5423_v18 }
 0x85d   : > { %v5465_v40 = vpop.f32.mrf.mxu0 }
 0x865   : > { %v5467_v32 = vpop.f32.mrf.mxu0 }
 0x866   : > { %v5476_v17 = vpack.c.bf16 %v5467_v32, %v5465_v40 }
 0x86d   : > { %v5470_v54 = vpop.f32.mrf.mxu0 }
 0x875   : > { %v5472_v63 = vpop.f32.mrf.mxu0 }
 0x876   : > { %v5477_v26 = vpack.c.bf16 %v5472_v63, %v5470_v54 }
 0x878   : > { %5492 = vmatpush.bf16.msra.mxu1 %v5477_v26 }
 0x87c   : > { %5493 = vmatpush.bf16.msra.mxu1 %v5476_v17 }
 0x87f   : > { %6808 = vmatmul.msk.bf16.vlgmr.msra.gmra.mxu1 %vm5482_vm8, %v5475_v46 }
 0x8fc   : > { %v5495_v11 = vpop.f32.mrf.mxu1 }
 0x8fd   : > { %v5496_v61 = vadd.f32 %v7128_v37, %v5495_v11 }
 0x8ff   : > { %5499 = vst [vmem:[%s461_s21] sm:$0xf] %v5496_v61 }
 0x900   : > { %7156 = shalt.err (!%p7153_p3)
}
 0x901   : > { %7086 = dma.vmem_to_hbm [thread:$0]  (%p7309_p5), %s5514_s29, 64, %s5516_s0, %s5501_s24  }
 0x904   : > { %v5497_v48 = vpop.f32.mrf.mxu1 }
 0x905 PF: > { %s10944_s28 = sld [smem:[#allocation8_spill]]  ;;  %p7092_p4 = scmp.ge.s32.totalorder %s7191_s16, 2 }
 0x907   : > { %p7089_p7 = pnand %p7092_p4, %p7313_p6 }
 0x909   : > { %p7090_p8 = pneg %p7089_p7 }
 0x90b   : > { %s5527_s19 = sand.u32 1, %s10944_s28  }
 0x90c   : > { %s5528_s21 = scalar_lea.sflag [#allocation6], %s5527_s19 }
 0x90d   : > { %7174 = dma.done.wait (%p7090_p8), %s5528_s21, 64  }
 0x90e   : > { %7176 = vsyncadd (%p7090_p8), %s5528_s21, 4294967232  ;;  %s10946_s16 = sld [smem:[#allocation10_spill]]  ;;  %s10949_s29 = smov %s7183_s30 }
 0x90f   : > { %s10947_s17 = sld [smem:[#allocation9_spill]] }
 0x910   : > { %s10948_s15 = sld [smem:[#allocation11_spill]] }
 0x914   : > { %p24_p9 = scmp.ge.s32.totalorder %s10946_s16, 4  }
 0x915   : > { %s10950_s30 = smov %s10947_s17 }
 0x916   :  { %26 = sbr.rel (!%p24_p9) target bundleno = 5 (0x5), region = 117 }
 0x91b   :  { %5534 = vsyncpa [#allocation6], 1 }
 0x91c   :  { %5536 = vsyncpa [#allocation6 + $0x1], 1 }

</bundles_post_ra>
